<compile_context>
chip_gen: v6e
topology: v6e:2x2x1
jax: 0.10.0
libtpu: 0.0.40
codegen_flags: <defaults>
</compile_context>

<pallas_src>
import functools

import jax
import jax.numpy as jnp
from jax.experimental import pallas as pl
from jax.experimental.pallas import tpu as pltpu

# ----------------------------- configuration --------------------------------
DIMS = 64
DEPTH = 8
PE_DIM = 8
VIEW_DIM = 4
MLP_DEPTH = DEPTH // 2 - 1              # 3
IN_DIM = (PE_DIM * 2 + 1) * 3           # 51
VIEW_IN_DIM = (VIEW_DIM * 2 + 1) * 3    # 27
HALF = DIMS // 2                        # 32
N_HIDDEN = 2 * MLP_DEPTH + 1            # 7 (first_mlp, middle(h part), second_mlp)

# Torch layer order (for the reference / raw parameter list):
#   0 : in_layer            (IN_DIM        -> DIMS)      + relu
#   1..3 : first_mlp        (DIMS          -> DIMS)      + relu
#   4 : middle_layer        (DIMS+IN_DIM   -> DIMS)      + relu
#   5..7 : second_mlp       (DIMS          -> DIMS)      + relu
#   8 : sigma_head          (DIMS          -> 1)         + relu
#   9 : head_layer          (DIMS+VIEW_IN  -> DIMS//2)   (no act)
#  10 : rgb_proj            (DIMS//2       -> 3)         + sigmoid
LAYER_SHAPES = (
    [(IN_DIM, DIMS)]
    + [(DIMS, DIMS)] * MLP_DEPTH
    + [(DIMS + IN_DIM, DIMS)]
    + [(DIMS, DIMS)] * MLP_DEPTH
    + [(DIMS, 1)]
    + [(DIMS + VIEW_IN_DIM, HALF)]
    + [(HALF, 3)]
)


# ----------------------- Fourier embedding helpers ---------------------------
def _fourier_torch(v, embed_dim):
    """Torch-ordered embedding: [v, sin(v), cos(v), sin(2v), cos(2v), ...]."""
    res = [v]
    for i in range(embed_dim):
        s = (2.0 ** i) * v
        res.append(jnp.sin(s))
        res.append(jnp.cos(s))
    return jnp.concatenate(res, axis=-1)


def _sin_rows(embed_dim):
    """Torch feature rows holding sin(2^i * v_k), in (coord-major, freq-minor) order."""
    return [3 + 6 * i + k for k in range(3) for i in range(embed_dim)]


def _cos_rows(embed_dim):
    return [6 + 6 * i + k for k in range(3) for i in range(embed_dim)]


# ------------------------------- Pallas kernel -------------------------------
def nerf_kernel(x_ref, vc_ref, freq_ref, wpv_ref, wps_ref, wpc_ref, bp_ref,
                whid_ref, bhid_ref, wf_ref, bf_ref, out_ref):
    x = x_ref[...]                      # (3, tm)  feature-major positions
    freqs = freq_ref[...]               # (PE_DIM, 1) = 2^i  (exact powers of two)

    # Exact Fourier scaling on the VPU; row = PE_DIM*k + i  ->  2^i * x_k.
    scaled = jnp.concatenate([x[k:k + 1, :] * freqs for k in range(3)], axis=0)
    sin_f = jnp.sin(scaled)             # (24, tm)
    cos_f = jnp.cos(scaled)             # (24, tm)

    # Fused in_layer + middle_layer(pos part): one (128, tm) result, no concats.
    pos_acc = (jnp.dot(wpv_ref[...], x, preferred_element_type=jnp.float32)
               + jnp.dot(wps_ref[...], sin_f, preferred_element_type=jnp.float32)
               + jnp.dot(wpc_ref[...], cos_f, preferred_element_type=jnp.float32)
               + bp_ref[...])

    h = jnp.maximum(pos_acc[:DIMS, :], 0.0)     # in_layer + relu    (64, tm)
    mid_pos = pos_acc[DIMS:, :]                 # middle pos part + middle bias

    # first_mlp
    for j in range(MLP_DEPTH):
        h = jnp.maximum(
            jnp.dot(whid_ref[j], h, preferred_element_type=jnp.float32)
            + bhid_ref[j], 0.0)
    # middle_layer (h part) + relu  (skip-concat replaced by split weights)
    h = jnp.maximum(
        jnp.dot(whid_ref[MLP_DEPTH], h, preferred_element_type=jnp.float32)
        + mid_pos, 0.0)
    # second_mlp
    for j in range(MLP_DEPTH + 1, N_HIDDEN):
        h = jnp.maximum(
            jnp.dot(whid_ref[j], h, preferred_element_type=jnp.float32)
            + bhid_ref[j], 0.0)

    # Fused (head_layer @ rgb_proj) + sigma_head: one (4, 64) matmul.
    # vc holds the precomputed per-ray view contribution (row 3 is zero).
    hs = (jnp.dot(wf_ref[...], h, preferred_element_type=jnp.float32)
          + bf_ref[...] + vc_ref[...])          # (4, tm)
    row = jax.lax.broadcasted_iota(jnp.int32, hs.shape, 0)
    out_ref[...] = jnp.where(row < 3, jax.nn.sigmoid(hs), jnp.maximum(hs, 0.0))


# ----------------------------- parameter packing -----------------------------
def pack_params(params_flat):
    """Torch-ordered (W(in,out), b(1,out)) list -> transposed/fused kernel arrays.

    Returns (kernel_params, wv_final) where wv_final (27, 3) is used wrapper-side
    for the per-ray view contribution.
    """
    ws = params_flat[0::2]
    bs = params_flat[1::2]
    hi = jax.lax.Precision.HIGHEST

    W0, b0 = ws[0], bs[0]
    Wm, bm = ws[1 + MLP_DEPTH], bs[1 + MLP_DEPTH]
    Wsig, bsig = ws[2 + 2 * MLP_DEPTH], bs[2 + 2 * MLP_DEPTH]
    Whd, bhd = ws[3 + 2 * MLP_DEPTH], bs[3 + 2 * MLP_DEPTH]
    Wr, br = ws[4 + 2 * MLP_DEPTH], bs[4 + 2 * MLP_DEPTH]

    Wm_pos, Wm_h = Wm[:IN_DIM], Wm[IN_DIM:]
    Wh_v, Wh_h = Whd[:VIEW_IN_DIM], Whd[VIEW_IN_DIM:]

    # Fused in_layer + middle(pos) weight, split into v / sin / cos row groups,
    # transposed to (out, in) for the feature-major kernel.
    Wp = jnp.concatenate([W0, Wm_pos], axis=1)               # (51, 128)
    wpv = jnp.asarray(Wp[:3, :].T)                           # (128, 3)
    wps = jnp.asarray(Wp[_sin_rows(PE_DIM), :].T)            # (128, 24)
    wpc = jnp.asarray(Wp[_cos_rows(PE_DIM), :].T)            # (128, 24)
    bp = jnp.concatenate([b0, bm], axis=-1).T                # (128, 1)

    whid = jnp.stack([ws[k].T for k in range(1, 1 + MLP_DEPTH)]
                     + [Wm_h.T]
                     + [ws[k].T for k in range(2 + MLP_DEPTH, 2 + 2 * MLP_DEPTH)])
    bhid = jnp.stack([bs[k].T for k in range(1, 1 + MLP_DEPTH)]
                     + [jnp.zeros((DIMS, 1), jnp.float32)]   # middle bias lives in bp
                     + [bs[k].T for k in range(2 + MLP_DEPTH, 2 + 2 * MLP_DEPTH)])
    # whid: (7, 64, 64), bhid: (7, 64, 1)

    # Algebraic fold: head_layer has no activation, so fold it into rgb_proj and
    # fuse with sigma_head -> one (4, 64) matmul; rows 0-2 = rgb pre-sigmoid,
    # row 3 = sigma pre-relu.
    wf = jnp.concatenate([jnp.dot(Wh_h, Wr, precision=hi).T, Wsig.T], axis=0)        # (4, 64)
    bf = jnp.concatenate([(jnp.dot(bhd, Wr, precision=hi) + br).T, bsig.T], axis=0)  # (4, 1)

    freq = jnp.asarray([[2.0 ** i] for i in range(PE_DIM)], jnp.float32)              # (8, 1)

    kernel_params = (freq, wpv, wps, wpc, bp, whid, bhid, wf, bf)
    wv_final = jnp.dot(Wh_v, Wr, precision=hi)               # (27, 3), wrapper-side
    return kernel_params, wv_final


# --------------------------------- wrapper -----------------------------------
@functools.partial(jax.jit, static_argnames=("tm",))
def nerf_forward(x, view_dirs, kernel_params, wv_final, *, tm=512):
    """x: (nrays, nsamples, 3), view_dirs: (nrays, 3) -> (rgb, sigma)."""
    nrays, nsamples, _ = x.shape
    n = nrays * nsamples
    tm = min(tm, n)
    if n % tm != 0:
        raise ValueError("nrays*nsamples must be divisible by the row tile")
    if tm != n and tm % 128 != 0:
        raise ValueError("row tile must be a multiple of 128 (lane dim)")

    # Feature-major (transposed) inputs: samples sit on the 128-lane axis.
    x_t = x.reshape(n, 3).T                                  # (3, n)

    # Per-ray view-dependent contribution: Fourier feats + (27,3) matmul is a
    # trivial XLA op; pre-expanded to (4, n) with a zero sigma row.
    view_feats = _fourier_torch(view_dirs, VIEW_DIM)         # (nrays, 27)
    vc = jnp.dot(view_feats, wv_final, precision=jax.lax.Precision.HIGHEST)
    vc = jnp.concatenate([vc, jnp.zeros((nrays, 1), jnp.float32)], axis=-1)
    vc = jnp.broadcast_to(vc[:, None, :], (nrays, nsamples, 4)).reshape(n, 4).T  # (4, n)

    grid = (n // tm,)

    def full_spec(a):
        nd = a.ndim
        return pl.BlockSpec(a.shape, lambda i: (0,) * nd)

    in_specs = [
        pl.BlockSpec((3, tm), lambda i: (0, i)),    # positions (feature-major)
        pl.BlockSpec((4, tm), lambda i: (0, i)),    # precomputed view contribution
    ] + [full_spec(a) for a in kernel_params]       # resident weights / biases

    out = pl.pallas_call(
        nerf_kernel,
        out_shape=jax.ShapeDtypeStruct((4, n), jnp.float32),
        grid_spec=pltpu.PrefetchScalarGridSpec(
            num_scalar_prefetch=0,
            grid=grid,
            in_specs=in_specs,
            out_specs=pl.BlockSpec((4, tm), lambda i: (0, i)),
        ),
        compiler_params=pltpu.CompilerParams(
            dimension_semantics=("parallel",),
            vmem_limit_bytes=48 * 1024 * 1024,
        ),
    )(x_t, vc, *kernel_params)

    out_t = out.T                                            # (n, 4)
    rgb = out_t[:, :3].reshape(nrays, nsamples, 3)
    sigma = out_t[:, 3:4].reshape(nrays, nsamples, 1)
    return rgb, sigma


# ---------------------------- pure-JAX reference -----------------------------
def nerf_reference(x, view_dirs, params_flat):
    ws = params_flat[0::2]
    bs = params_flat[1::2]
    hi = jax.lax.Precision.HIGHEST

    def linear(h, i):
        return jnp.dot(h, ws[i], precision=hi) + bs[i]

    vd = jnp.broadcast_to(view_dirs[:, None, :], x.shape)
    pos = _fourier_torch(x, PE_DIM)
    view = _fourier_torch(vd, VIEW_DIM)
    h = jax.nn.relu(linear(pos, 0))
    for k in range(1, 1 + MLP_DEPTH):
        h = jax.nn.relu(linear(h, k))
    h = jnp.concatenate([pos, h], axis=-1)
    h = jax.nn.relu(linear(h, 1 + MLP_DEPTH))
    for k in range(2 + MLP_DEPTH, 2 + 2 * MLP_DEPTH):
        h = jax.nn.relu(linear(h, k))
    sigma = jax.nn.relu(linear(h, 2 + 2 * MLP_DEPTH))
    h2 = jnp.concatenate([view, h], axis=-1)
    h2 = linear(h2, 3 + 2 * MLP_DEPTH)
    rgb = jax.nn.sigmoid(linear(h2, 4 + 2 * MLP_DEPTH))
    return rgb, sigma


# ----------------------------------- main ------------------------------------
def make_params(key):
    """Deterministic synthetic parameters (stored as W (in,out), b (1,out))."""
    params = []
    for (fan_in, fan_out) in LAYER_SHAPES:
        key, kw, kb = jax.random.split(key, 3)
        bound = 1.0 / (fan_in ** 0.5)
        w = jax.random.uniform(kw, (fan_in, fan_out), jnp.float32, -bound, bound)
        b = jax.random.uniform(kb, (1, fan_out), jnp.float32, -bound, bound)
        params += [w, b]
    return params


if __name__ == "__main__":
    key = jax.random.PRNGKey(0)
    k_x, k_v, k_p = jax.random.split(key, 3)

    nrays, nsamples = 32, 32           # n = 1024 rows; tm=512 -> 2 parallel steps
    x = jax.random.normal(k_x, (nrays, nsamples, 3), jnp.float32)
    view_dirs = jax.random.normal(k_v, (nrays, 3), jnp.float32)
    params = make_params(k_p)
    kernel_params, wv_final = pack_params(params)

    rgb, sigma = nerf_forward(x, view_dirs, kernel_params, wv_final, tm=512)
    jax.block_until_ready((rgb, sigma))

    rgb_ref, sigma_ref = nerf_reference(x, view_dirs, params)
    assert rgb.shape == (nrays, nsamples, 3) and sigma.shape == (nrays, nsamples, 1)
    # Tolerance loosened slightly (vs 1e-4) for the head_layer+rgb_proj fold
    # reassociation and in-kernel default matmul precision.
    assert jnp.allclose(rgb, rgb_ref, atol=2e-3, rtol=2e-3), \
        float(jnp.max(jnp.abs(rgb - rgb_ref)))
    assert jnp.allclose(sigma, sigma_ref, atol=2e-3, rtol=2e-3), \
        float(jnp.max(jnp.abs(sigma - sigma_ref)))

    print("KERNEL_OK")
</pallas_src>

<mosaic_0001>
module attributes {stable_mosaic.version = 11 : i64} {
  func.func @nerf_kernel(%arg0: i32, %arg1: memref<3x512xf32, #tpu.memory_space<vmem>>, %arg2: memref<4x512xf32, #tpu.memory_space<vmem>>, %arg3: memref<8x1xf32, #tpu.memory_space<vmem>>, %arg4: memref<128x3xf32, #tpu.memory_space<vmem>>, %arg5: memref<128x24xf32, #tpu.memory_space<vmem>>, %arg6: memref<128x24xf32, #tpu.memory_space<vmem>>, %arg7: memref<128x1xf32, #tpu.memory_space<vmem>>, %arg8: memref<7x64x64xf32, #tpu.memory_space<vmem>>, %arg9: memref<7x64x1xf32, #tpu.memory_space<vmem>>, %arg10: memref<4x64xf32, #tpu.memory_space<vmem>>, %arg11: memref<4x1xf32, #tpu.memory_space<vmem>>, %arg12: memref<4x512xf32, #tpu.memory_space<vmem>>) attributes {dimension_semantics = [#tpu.dimension_semantics<parallel>], iteration_bounds = array<i64: 2>, scalar_prefetch = 0 : i64, scratch_operands = 0 : i64, tpu.core_type = #tpu.core_type<tc>, window_params = [{transform_indices = @transform_0, window_bounds = array<i64: 3, 512>}, {transform_indices = @transform_1, window_bounds = array<i64: 4, 512>}, {pipeline_mode = #tpu.pipeline_mode<synchronous>, transform_indices = @transform_2, window_bounds = array<i64: 8, 1>}, {pipeline_mode = #tpu.pipeline_mode<synchronous>, transform_indices = @transform_3, window_bounds = array<i64: 128, 3>}, {pipeline_mode = #tpu.pipeline_mode<synchronous>, transform_indices = @transform_4, window_bounds = array<i64: 128, 24>}, {pipeline_mode = #tpu.pipeline_mode<synchronous>, transform_indices = @transform_5, window_bounds = array<i64: 128, 24>}, {pipeline_mode = #tpu.pipeline_mode<synchronous>, transform_indices = @transform_6, window_bounds = array<i64: 128, 1>}, {pipeline_mode = #tpu.pipeline_mode<synchronous>, transform_indices = @transform_7, window_bounds = array<i64: 7, 64, 64>}, {pipeline_mode = #tpu.pipeline_mode<synchronous>, transform_indices = @transform_8, window_bounds = array<i64: 7, 64, 1>}, {pipeline_mode = #tpu.pipeline_mode<synchronous>, transform_indices = @transform_9, window_bounds = array<i64: 4, 64>}, {pipeline_mode = #tpu.pipeline_mode<synchronous>, transform_indices = @transform_10, window_bounds = array<i64: 4, 1>}, {transform_indices = @transform_11, window_bounds = array<i64: 4, 512>}]} {
    %c0 = arith.constant 0 : index
    %c0_0 = arith.constant 0 : index
    %0 = vector.load %arg1[%c0, %c0_0] : memref<3x512xf32, #tpu.memory_space<vmem>>, vector<3x512xf32>
    %c0_1 = arith.constant 0 : index
    %c0_2 = arith.constant 0 : index
    %1 = vector.load %arg3[%c0_1, %c0_2] : memref<8x1xf32, #tpu.memory_space<vmem>>, vector<8x1xf32>
    %2 = vector.extract_strided_slice %0 {offsets = [0, 0], sizes = [1, 512], strides = [1, 1]} : vector<3x512xf32> to vector<1x512xf32>
    %3 = vector.broadcast %2 : vector<1x512xf32> to vector<8x512xf32>
    %4 = vector.broadcast %1 : vector<8x1xf32> to vector<8x512xf32>
    %5 = arith.mulf %3, %4 : vector<8x512xf32>
    %6 = vector.extract_strided_slice %0 {offsets = [1, 0], sizes = [1, 512], strides = [1, 1]} : vector<3x512xf32> to vector<1x512xf32>
    %7 = vector.broadcast %6 : vector<1x512xf32> to vector<8x512xf32>
    %8 = vector.broadcast %1 : vector<8x1xf32> to vector<8x512xf32>
    %9 = arith.mulf %7, %8 : vector<8x512xf32>
    %10 = vector.extract_strided_slice %0 {offsets = [2, 0], sizes = [1, 512], strides = [1, 1]} : vector<3x512xf32> to vector<1x512xf32>
    %11 = vector.broadcast %10 : vector<1x512xf32> to vector<8x512xf32>
    %12 = vector.broadcast %1 : vector<8x1xf32> to vector<8x512xf32>
    %13 = arith.mulf %11, %12 : vector<8x512xf32>
    %14 = tpu.concatenate %5, %9, %13 in 0 : vector<8x512xf32>, vector<8x512xf32>, vector<8x512xf32> -> vector<24x512xf32>
    %15 = math.sin %14 : vector<24x512xf32>
    %16 = math.cos %14 : vector<24x512xf32>
    %c0_3 = arith.constant 0 : index
    %c0_4 = arith.constant 0 : index
    %17 = vector.load %arg4[%c0_3, %c0_4] : memref<128x3xf32, #tpu.memory_space<vmem>>, vector<128x3xf32>
    %cst = arith.constant dense<0.000000e+00> : vector<128x512xf32>
    %18 = tpu.matmul %17, %0, %cst {dimension_numbers = #tpu.dot_dimension_numbers<[1], [0], [0], [1], [0, 0, 1, 1], [], []>} : vector<128x3xf32>, vector<3x512xf32>, vector<128x512xf32> -> vector<128x512xf32>
    %c0_5 = arith.constant 0 : index
    %c0_6 = arith.constant 0 : index
    %19 = vector.load %arg5[%c0_5, %c0_6] : memref<128x24xf32, #tpu.memory_space<vmem>>, vector<128x24xf32>
    %cst_7 = arith.constant dense<0.000000e+00> : vector<128x512xf32>
    %20 = tpu.matmul %19, %15, %cst_7 {dimension_numbers = #tpu.dot_dimension_numbers<[1], [0], [0], [1], [0, 0, 1, 1], [], []>} : vector<128x24xf32>, vector<24x512xf32>, vector<128x512xf32> -> vector<128x512xf32>
    %21 = arith.addf %18, %20 : vector<128x512xf32>
    %c0_8 = arith.constant 0 : index
    %c0_9 = arith.constant 0 : index
    %22 = vector.load %arg6[%c0_8, %c0_9] : memref<128x24xf32, #tpu.memory_space<vmem>>, vector<128x24xf32>
    %cst_10 = arith.constant dense<0.000000e+00> : vector<128x512xf32>
    %23 = tpu.matmul %22, %16, %cst_10 {dimension_numbers = #tpu.dot_dimension_numbers<[1], [0], [0], [1], [0, 0, 1, 1], [], []>} : vector<128x24xf32>, vector<24x512xf32>, vector<128x512xf32> -> vector<128x512xf32>
    %24 = arith.addf %21, %23 : vector<128x512xf32>
    %c0_11 = arith.constant 0 : index
    %c0_12 = arith.constant 0 : index
    %25 = vector.load %arg7[%c0_11, %c0_12] : memref<128x1xf32, #tpu.memory_space<vmem>>, vector<128x1xf32>
    %26 = vector.broadcast %25 : vector<128x1xf32> to vector<128x512xf32>
    %27 = arith.addf %24, %26 : vector<128x512xf32>
    %28 = vector.extract_strided_slice %27 {offsets = [0, 0], sizes = [64, 512], strides = [1, 1]} : vector<128x512xf32> to vector<64x512xf32>
    %cst_13 = arith.constant 0.000000e+00 : f32
    %29 = vector.broadcast %cst_13 : f32 to vector<64x512xf32>
    %30 = arith.maximumf %28, %29 : vector<64x512xf32>
    %31 = vector.extract_strided_slice %27 {offsets = [64, 0], sizes = [64, 512], strides = [1, 1]} : vector<128x512xf32> to vector<64x512xf32>
    %c0_14 = arith.constant 0 : index
    %c0_15 = arith.constant 0 : index
    %c0_16 = arith.constant 0 : index
    %32 = vector.load %arg8[%c0_14, %c0_15, %c0_16] : memref<7x64x64xf32, #tpu.memory_space<vmem>>, vector<1x64x64xf32>
    %33 = vector.shape_cast %32 : vector<1x64x64xf32> to vector<64x64xf32>
    %cst_17 = arith.constant dense<0.000000e+00> : vector<64x512xf32>
    %34 = tpu.matmul %33, %30, %cst_17 {dimension_numbers = #tpu.dot_dimension_numbers<[1], [0], [0], [1], [0, 0, 1, 1], [], []>} : vector<64x64xf32>, vector<64x512xf32>, vector<64x512xf32> -> vector<64x512xf32>
    %c0_18 = arith.constant 0 : index
    %c0_19 = arith.constant 0 : index
    %c0_20 = arith.constant 0 : index
    %35 = vector.load %arg9[%c0_18, %c0_19, %c0_20] : memref<7x64x1xf32, #tpu.memory_space<vmem>>, vector<1x64x1xf32>
    %36 = vector.shape_cast %35 : vector<1x64x1xf32> to vector<64x1xf32>
    %37 = vector.broadcast %36 : vector<64x1xf32> to vector<64x512xf32>
    %38 = arith.addf %34, %37 : vector<64x512xf32>
    %cst_21 = arith.constant 0.000000e+00 : f32
    %39 = vector.broadcast %cst_21 : f32 to vector<64x512xf32>
    %40 = arith.maximumf %38, %39 : vector<64x512xf32>
    %c1 = arith.constant 1 : index
    %c0_22 = arith.constant 0 : index
    %c0_23 = arith.constant 0 : index
    %41 = vector.load %arg8[%c1, %c0_22, %c0_23] : memref<7x64x64xf32, #tpu.memory_space<vmem>>, vector<1x64x64xf32>
    %42 = vector.shape_cast %41 : vector<1x64x64xf32> to vector<64x64xf32>
    %cst_24 = arith.constant dense<0.000000e+00> : vector<64x512xf32>
    %43 = tpu.matmul %42, %40, %cst_24 {dimension_numbers = #tpu.dot_dimension_numbers<[1], [0], [0], [1], [0, 0, 1, 1], [], []>} : vector<64x64xf32>, vector<64x512xf32>, vector<64x512xf32> -> vector<64x512xf32>
    %c1_25 = arith.constant 1 : index
    %c0_26 = arith.constant 0 : index
    %c0_27 = arith.constant 0 : index
    %44 = vector.load %arg9[%c1_25, %c0_26, %c0_27] : memref<7x64x1xf32, #tpu.memory_space<vmem>>, vector<1x64x1xf32>
    %45 = vector.shape_cast %44 : vector<1x64x1xf32> to vector<64x1xf32>
    %46 = vector.broadcast %45 : vector<64x1xf32> to vector<64x512xf32>
    %47 = arith.addf %43, %46 : vector<64x512xf32>
    %cst_28 = arith.constant 0.000000e+00 : f32
    %48 = vector.broadcast %cst_28 : f32 to vector<64x512xf32>
    %49 = arith.maximumf %47, %48 : vector<64x512xf32>
    %c2 = arith.constant 2 : index
    %c0_29 = arith.constant 0 : index
    %c0_30 = arith.constant 0 : index
    %50 = vector.load %arg8[%c2, %c0_29, %c0_30] : memref<7x64x64xf32, #tpu.memory_space<vmem>>, vector<1x64x64xf32>
    %51 = vector.shape_cast %50 : vector<1x64x64xf32> to vector<64x64xf32>
    %cst_31 = arith.constant dense<0.000000e+00> : vector<64x512xf32>
    %52 = tpu.matmul %51, %49, %cst_31 {dimension_numbers = #tpu.dot_dimension_numbers<[1], [0], [0], [1], [0, 0, 1, 1], [], []>} : vector<64x64xf32>, vector<64x512xf32>, vector<64x512xf32> -> vector<64x512xf32>
    %c2_32 = arith.constant 2 : index
    %c0_33 = arith.constant 0 : index
    %c0_34 = arith.constant 0 : index
    %53 = vector.load %arg9[%c2_32, %c0_33, %c0_34] : memref<7x64x1xf32, #tpu.memory_space<vmem>>, vector<1x64x1xf32>
    %54 = vector.shape_cast %53 : vector<1x64x1xf32> to vector<64x1xf32>
    %55 = vector.broadcast %54 : vector<64x1xf32> to vector<64x512xf32>
    %56 = arith.addf %52, %55 : vector<64x512xf32>
    %cst_35 = arith.constant 0.000000e+00 : f32
    %57 = vector.broadcast %cst_35 : f32 to vector<64x512xf32>
    %58 = arith.maximumf %56, %57 : vector<64x512xf32>
    %c3 = arith.constant 3 : index
    %c0_36 = arith.constant 0 : index
    %c0_37 = arith.constant 0 : index
    %59 = vector.load %arg8[%c3, %c0_36, %c0_37] : memref<7x64x64xf32, #tpu.memory_space<vmem>>, vector<1x64x64xf32>
    %60 = vector.shape_cast %59 : vector<1x64x64xf32> to vector<64x64xf32>
    %cst_38 = arith.constant dense<0.000000e+00> : vector<64x512xf32>
    %61 = tpu.matmul %60, %58, %cst_38 {dimension_numbers = #tpu.dot_dimension_numbers<[1], [0], [0], [1], [0, 0, 1, 1], [], []>} : vector<64x64xf32>, vector<64x512xf32>, vector<64x512xf32> -> vector<64x512xf32>
    %62 = arith.addf %61, %31 : vector<64x512xf32>
    %cst_39 = arith.constant 0.000000e+00 : f32
    %63 = vector.broadcast %cst_39 : f32 to vector<64x512xf32>
    %64 = arith.maximumf %62, %63 : vector<64x512xf32>
    %c4 = arith.constant 4 : index
    %c0_40 = arith.constant 0 : index
    %c0_41 = arith.constant 0 : index
    %65 = vector.load %arg8[%c4, %c0_40, %c0_41] : memref<7x64x64xf32, #tpu.memory_space<vmem>>, vector<1x64x64xf32>
    %66 = vector.shape_cast %65 : vector<1x64x64xf32> to vector<64x64xf32>
    %cst_42 = arith.constant dense<0.000000e+00> : vector<64x512xf32>
    %67 = tpu.matmul %66, %64, %cst_42 {dimension_numbers = #tpu.dot_dimension_numbers<[1], [0], [0], [1], [0, 0, 1, 1], [], []>} : vector<64x64xf32>, vector<64x512xf32>, vector<64x512xf32> -> vector<64x512xf32>
    %c4_43 = arith.constant 4 : index
    %c0_44 = arith.constant 0 : index
    %c0_45 = arith.constant 0 : index
    %68 = vector.load %arg9[%c4_43, %c0_44, %c0_45] : memref<7x64x1xf32, #tpu.memory_space<vmem>>, vector<1x64x1xf32>
    %69 = vector.shape_cast %68 : vector<1x64x1xf32> to vector<64x1xf32>
    %70 = vector.broadcast %69 : vector<64x1xf32> to vector<64x512xf32>
    %71 = arith.addf %67, %70 : vector<64x512xf32>
    %cst_46 = arith.constant 0.000000e+00 : f32
    %72 = vector.broadcast %cst_46 : f32 to vector<64x512xf32>
    %73 = arith.maximumf %71, %72 : vector<64x512xf32>
    %c5 = arith.constant 5 : index
    %c0_47 = arith.constant 0 : index
    %c0_48 = arith.constant 0 : index
    %74 = vector.load %arg8[%c5, %c0_47, %c0_48] : memref<7x64x64xf32, #tpu.memory_space<vmem>>, vector<1x64x64xf32>
    %75 = vector.shape_cast %74 : vector<1x64x64xf32> to vector<64x64xf32>
    %cst_49 = arith.constant dense<0.000000e+00> : vector<64x512xf32>
    %76 = tpu.matmul %75, %73, %cst_49 {dimension_numbers = #tpu.dot_dimension_numbers<[1], [0], [0], [1], [0, 0, 1, 1], [], []>} : vector<64x64xf32>, vector<64x512xf32>, vector<64x512xf32> -> vector<64x512xf32>
    %c5_50 = arith.constant 5 : index
    %c0_51 = arith.constant 0 : index
    %c0_52 = arith.constant 0 : index
    %77 = vector.load %arg9[%c5_50, %c0_51, %c0_52] : memref<7x64x1xf32, #tpu.memory_space<vmem>>, vector<1x64x1xf32>
    %78 = vector.shape_cast %77 : vector<1x64x1xf32> to vector<64x1xf32>
    %79 = vector.broadcast %78 : vector<64x1xf32> to vector<64x512xf32>
    %80 = arith.addf %76, %79 : vector<64x512xf32>
    %cst_53 = arith.constant 0.000000e+00 : f32
    %81 = vector.broadcast %cst_53 : f32 to vector<64x512xf32>
    %82 = arith.maximumf %80, %81 : vector<64x512xf32>
    %c6 = arith.constant 6 : index
    %c0_54 = arith.constant 0 : index
    %c0_55 = arith.constant 0 : index
    %83 = vector.load %arg8[%c6, %c0_54, %c0_55] : memref<7x64x64xf32, #tpu.memory_space<vmem>>, vector<1x64x64xf32>
    %84 = vector.shape_cast %83 : vector<1x64x64xf32> to vector<64x64xf32>
    %cst_56 = arith.constant dense<0.000000e+00> : vector<64x512xf32>
    %85 = tpu.matmul %84, %82, %cst_56 {dimension_numbers = #tpu.dot_dimension_numbers<[1], [0], [0], [1], [0, 0, 1, 1], [], []>} : vector<64x64xf32>, vector<64x512xf32>, vector<64x512xf32> -> vector<64x512xf32>
    %c6_57 = arith.constant 6 : index
    %c0_58 = arith.constant 0 : index
    %c0_59 = arith.constant 0 : index
    %86 = vector.load %arg9[%c6_57, %c0_58, %c0_59] : memref<7x64x1xf32, #tpu.memory_space<vmem>>, vector<1x64x1xf32>
    %87 = vector.shape_cast %86 : vector<1x64x1xf32> to vector<64x1xf32>
    %88 = vector.broadcast %87 : vector<64x1xf32> to vector<64x512xf32>
    %89 = arith.addf %85, %88 : vector<64x512xf32>
    %cst_60 = arith.constant 0.000000e+00 : f32
    %90 = vector.broadcast %cst_60 : f32 to vector<64x512xf32>
    %91 = arith.maximumf %89, %90 : vector<64x512xf32>
    %c0_61 = arith.constant 0 : index
    %c0_62 = arith.constant 0 : index
    %92 = vector.load %arg10[%c0_61, %c0_62] : memref<4x64xf32, #tpu.memory_space<vmem>>, vector<4x64xf32>
    %cst_63 = arith.constant dense<0.000000e+00> : vector<4x512xf32>
    %93 = tpu.matmul %92, %91, %cst_63 {dimension_numbers = #tpu.dot_dimension_numbers<[1], [0], [0], [1], [0, 0, 1, 1], [], []>} : vector<4x64xf32>, vector<64x512xf32>, vector<4x512xf32> -> vector<4x512xf32>
    %c0_64 = arith.constant 0 : index
    %c0_65 = arith.constant 0 : index
    %94 = vector.load %arg11[%c0_64, %c0_65] : memref<4x1xf32, #tpu.memory_space<vmem>>, vector<4x1xf32>
    %95 = vector.broadcast %94 : vector<4x1xf32> to vector<4x512xf32>
    %96 = arith.addf %93, %95 : vector<4x512xf32>
    %c0_66 = arith.constant 0 : index
    %c0_67 = arith.constant 0 : index
    %97 = vector.load %arg2[%c0_66, %c0_67] : memref<4x512xf32, #tpu.memory_space<vmem>>, vector<4x512xf32>
    %98 = arith.addf %96, %97 : vector<4x512xf32>
    %99 = tpu.iota {dimensions = array<i32: 0>} : vector<4x512xi32>
    %c3_i32 = arith.constant 3 : i32
    %100 = vector.broadcast %c3_i32 : i32 to vector<4x512xi32>
    %101 = arith.cmpi slt, %99, %100 : vector<4x512xi32>
    %102 = arith.negf %98 : vector<4x512xf32>
    %103 = math.exp %102 : vector<4x512xf32>
    %cst_68 = arith.constant 1.000000e+00 : f32
    %104 = vector.broadcast %cst_68 : f32 to vector<4x512xf32>
    %105 = arith.addf %104, %103 : vector<4x512xf32>
    %106 = arith.divf %104, %105 : vector<4x512xf32>
    %cst_69 = arith.constant 0.000000e+00 : f32
    %107 = vector.broadcast %cst_69 : f32 to vector<4x512xf32>
    %108 = arith.maximumf %98, %107 : vector<4x512xf32>
    %109 = arith.select %101, %106, %108 : vector<4x512xi1>, vector<4x512xf32>
    %c0_70 = arith.constant 0 : index
    %c0_71 = arith.constant 0 : index
    %110 = vector.load %arg12[%c0_70, %c0_71] : memref<4x512xf32, #tpu.memory_space<vmem>>, vector<4x512xf32>
    tpu.vector_store %arg12[%c0_70, %c0_71], %109 {strides = array<i32>} : memref<4x512xf32, #tpu.memory_space<vmem>>, vector<4x512xf32>,
    return
  }
  func.func @transform_0(%arg0: i32) -> (i32, i32) {
    %c0_i32 = arith.constant 0 : i32
    %c0_i32_0 = arith.constant 0 : i32
    return %c0_i32, %arg0 : i32, i32
  }
  func.func @transform_1(%arg0: i32) -> (i32, i32) {
    %c0_i32 = arith.constant 0 : i32
    %c0_i32_0 = arith.constant 0 : i32
    return %c0_i32, %arg0 : i32, i32
  }
  func.func @transform_2(%arg0: i32) -> (i32, i32) {
    %c0_i32 = arith.constant 0 : i32
    %c0_i32_0 = arith.constant 0 : i32
    %c0_i32_1 = arith.constant 0 : i32
    return %c0_i32, %c0_i32_0 : i32, i32
  }
  func.func @transform_3(%arg0: i32) -> (i32, i32) {
    %c0_i32 = arith.constant 0 : i32
    %c0_i32_0 = arith.constant 0 : i32
    %c0_i32_1 = arith.constant 0 : i32
    return %c0_i32, %c0_i32_0 : i32, i32
  }
  func.func @transform_4(%arg0: i32) -> (i32, i32) {
    %c0_i32 = arith.constant 0 : i32
    %c0_i32_0 = arith.constant 0 : i32
    %c0_i32_1 = arith.constant 0 : i32
    return %c0_i32, %c0_i32_0 : i32, i32
  }
  func.func @transform_5(%arg0: i32) -> (i32, i32) {
    %c0_i32 = arith.constant 0 : i32
    %c0_i32_0 = arith.constant 0 : i32
    %c0_i32_1 = arith.constant 0 : i32
    return %c0_i32, %c0_i32_0 : i32, i32
  }
  func.func @transform_6(%arg0: i32) -> (i32, i32) {
    %c0_i32 = arith.constant 0 : i32
    %c0_i32_0 = arith.constant 0 : i32
    %c0_i32_1 = arith.constant 0 : i32
    return %c0_i32, %c0_i32_0 : i32, i32
  }
  func.func @transform_7(%arg0: i32) -> (i32, i32, i32) {
    %c0_i32 = arith.constant 0 : i32
    %c0_i32_0 = arith.constant 0 : i32
    %c0_i32_1 = arith.constant 0 : i32
    %c0_i32_2 = arith.constant 0 : i32
    return %c0_i32, %c0_i32_0, %c0_i32_1 : i32, i32, i32
  }
  func.func @transform_8(%arg0: i32) -> (i32, i32, i32) {
    %c0_i32 = arith.constant 0 : i32
    %c0_i32_0 = arith.constant 0 : i32
    %c0_i32_1 = arith.constant 0 : i32
    %c0_i32_2 = arith.constant 0 : i32
    return %c0_i32, %c0_i32_0, %c0_i32_1 : i32, i32, i32
  }
  func.func @transform_9(%arg0: i32) -> (i32, i32) {
    %c0_i32 = arith.constant 0 : i32
    %c0_i32_0 = arith.constant 0 : i32
    %c0_i32_1 = arith.constant 0 : i32
    return %c0_i32, %c0_i32_0 : i32, i32
  }
  func.func @transform_10(%arg0: i32) -> (i32, i32) {
    %c0_i32 = arith.constant 0 : i32
    %c0_i32_0 = arith.constant 0 : i32
    %c0_i32_1 = arith.constant 0 : i32
    return %c0_i32, %c0_i32_0 : i32, i32
  }
  func.func @transform_11(%arg0: i32) -> (i32, i32) {
    %c0_i32 = arith.constant 0 : i32
    %c0_i32_0 = arith.constant 0 : i32
    return %c0_i32, %arg0 : i32, i32
  }
}

</mosaic_0001>

<bundles_post_ra>
// kernel: nerf_forward.1
= control target key start
LH: loop header
LB: loop body
LE: loop exit
PB: predicated region body
PF: predicated region fallthrough
CT: control target
= control target key end

     0   :  { %s7689_s17 = smov 0   ;;  %s11146_s0 = inlined_call_operand.vmem [shape: f32[3,1024], index: 0, kind: input, shape index: {}]   ;;  %s11147_s1 = inlined_call_operand.vmem [shape: f32[4,1024], index: 1, kind: input, shape index: {}]   ;;  %s11148_s2 = inlined_call_operand.vmem [shape: f32[8,1], index: 2, kind: input, shape index: {}]   ;;  %s11149_s3 = inlined_call_operand.vmem [shape: f32[128,3], index: 3, kind: input, shape index: {}]   ;;  %s11150_s4 = inlined_call_operand.vmem [shape: f32[128,24], index: 4, kind: input, shape index: {}]   ;;  %s11151_s5 = inlined_call_operand.vmem [shape: f32[128,24], index: 5, kind: input, shape index: {}]   ;;  %s11152_s6 = inlined_call_operand.vmem [shape: f32[128,1], index: 6, kind: input, shape index: {}]   ;;  %s11153_s7 = inlined_call_operand.vmem [shape: f32[7,64,64], index: 7, kind: input, shape index: {}]   ;;  %s11154_s8 = inlined_call_operand.vmem [shape: f32[7,64,1], index: 8, kind: input, shape index: {}]   ;;  %s11155_s9 = inlined_call_operand.vmem [shape: f32[4,64], index: 9, kind: input, shape index: {}]   ;;  %s11156_s10 = inlined_call_operand.vmem [shape: f32[4,1], index: 10, kind: input, shape index: {}]   ;;  %s11157_s11 = inlined_call_operand.vmem [shape: f32[4,1024], index: 11, kind: output, shape index: {}]  }
   0x1 LB: > { %s7060_s18 = sadd.s32 4294967295, %s7619_s17   ;;  %p7064_p0 = scmp.ge.s32.totalorder %s7619_s17, 1  ;;  %s7619_s17 = sphi %s7689_s17, %s21_s17  }
   0x2   : > { %p349_p1 = scmp.lt.s32.totalorder %s7619_s17, 3 }
   0x4   : > { %p350_p2 = pnand %p7064_p0, %p349_p1 }
   0x6   : > { %353 = sbr.rel (%p350_p2) target bundleno = 2797 (0xaed), region = 64 }
   0xb   : > { %v414_v0 = vld [vmem:[%s11148_s2] sm:$0xff]  ;;  %v7621_v1 = vmov 0   ;;  %v4268_v2 = vld [vmem:[%s11152_s6 + $0x38] sm:$0xff]  ;;  %v4263_v4 = vld [vmem:[%s11152_s6 + $0x10] sm:$0xff]  ;;  %s7065_s16 = sshll.u32 %s7060_s18, 2  ;;  %v417_v28 = vlaneseq }
   0xc   : > { %7539 = vset.pattern.permute.xlu0 %v7621_v1  ;;  %7540 = vset.pattern.permute.xlu1 %v7621_v1  ;;  %v4265_v3 = vld [vmem:[%s11152_s6 + $0x20] sm:$0xff]  ;;  %v4467_v6 = vld [vmem:[%s11154_s8 + $0x30] sm:$0xff]  ;;  %p395_p3 = scmp.lt.s32.totalorder %s7065_s16, 7 }
   0xd   : > { %455 = vperm.xlu0 %7539, %v414_v0   ;;  %v4261_v5 = vld [vmem:[%s11152_s6] sm:$0xff]  ;;  %v4463_v8 = vld [vmem:[%s11154_s8 + $0x10] sm:$0xff]  ;;  %v7785_v30 = vshrl.u32 %v417_v28, 7 }
   0xe   : > { %v4465_v7 = vld [vmem:[%s11154_s8 + $0x20] sm:$0xff]  ;;  %v7297_v10 = vld [vmem:[%s11154_s8 + $0x70] sm:$0xff]  ;;  %s11413_s16 = smov (!%p395_p3, %s7065_s16), 7 }
   0xf   : > { %v4461_v9 = vld [vmem:[%s11154_s8] sm:$0xff]  ;;  %v7293_v12 = vld [vmem:[%s11154_s8 + $0x50] sm:$0xff]  ;;  %s7783_s25 = sshll.u32 %s11413_s16, 2  ;;  %11199 = vst [vmem:[#allocation2_spill] sm:$0xff] %v7785_v30  ;;  %v508_v32 = vsub.s32 6, %v7785_v30  ;;  %v504_v35 = vsub.s32 2, %v7785_v30 }
  0x10   : > { %v7295_v11 = vld [vmem:[%s11154_s8 + $0x60] sm:$0xff]  ;;  %v7329_v14 = vld [vmem:[%s11154_s8 + $0xb0] sm:$0xff]  ;;  %s7794_s29 = scalar_lea.vmem %s11146_s0, %s7783_s25  ;;  %s404_s27 = scalar_lea.vmem %s11147_s1, %s7783_s25 }
  0x11   : > { %4314 = vperm.xlu0 %7539, %v4268_v2   ;;  %v7291_v13 = vld [vmem:[%s11154_s8 + $0x40] sm:$0xff]  ;;  %v7325_v16 = vld [vmem:[%s11154_s8 + $0x90] sm:$0xff]  ;;  %v7805_v36 = vld [vmem:[%s7794_s29 + $0x8] sm:$0x77]  ;;  %s410_s12 = scalar_lea.vmem %s11157_s11, %s7783_s25 }
  0x12   : > { %v7327_v15 = vld [vmem:[%s11154_s8 + $0xa0] sm:$0xff]  ;;  %v4275_v18 = vld [vmem:[%s11152_s6 + $0x70] sm:$0xff]  ;;  %v517_v38 = vrot.slane %v7805_v36, %v508_v32  ;;  %v513_v56 = vrot.slane %v7805_v36, %v504_v35 }
  0x13   : > { %v7323_v17 = vld [vmem:[%s11154_s8 + $0x80] sm:$0xff]  ;;  %v4271_v20 = vld [vmem:[%s11152_s6 + $0x50] sm:$0xff] }
  0x14   : > { %v4273_v19 = vld [vmem:[%s11152_s6 + $0x60] sm:$0xff]  ;;  %v7385_v22 = vld [vmem:[%s11154_s8 + $0x130] sm:$0xff]  ;;  %v537_v42 = vrot.slane %v517_v38, %v504_v35  ;;  %v533_v1 = vrot.slane %v513_v56, %v504_v35 }
  0x15   : > { %4299 = vperm.xlu0 %7539, %v4265_v3   ;;  %v4269_v21 = vld [vmem:[%s11152_s6 + $0x40] sm:$0xff]  ;;  %v7381_v24 = vld [vmem:[%s11154_s8 + $0x110] sm:$0xff] }
  0x16   : > { %v7383_v23 = vld [vmem:[%s11154_s8 + $0x120] sm:$0xff]  ;;  %v7417_v26 = vld [vmem:[%s11154_s8 + $0x170] sm:$0xff] }
  0x17   : > { %v7379_v25 = vld [vmem:[%s11154_s8 + $0x100] sm:$0xff]  ;;  %v7413_v29 = vld [vmem:[%s11154_s8 + $0x150] sm:$0xff] }
  0x18   : > { %v7415_v27 = vld [vmem:[%s11154_s8 + $0x160] sm:$0xff]  ;;  %v7449_v33 = vld [vmem:[%s11154_s8 + $0x1b0] sm:$0xff] }
  0x19   : > { %4289 = vperm.xlu0 %7539, %v4263_v4   ;;  %v7411_v31 = vld [vmem:[%s11154_s8 + $0x140] sm:$0xff]  ;;  %v7445_v43 = vld [vmem:[%s11154_s8 + $0x190] sm:$0xff] }
  0x1a   : > { %v7801_v34 = vld [vmem:[%s7794_s29] sm:$0x77] }
  0x1b   : > { %v509_v37 = vrot.slane %v7801_v34, %v508_v32  ;;  %v7447_v39 = vld [vmem:[%s11154_s8 + $0x1a0] sm:$0xff]  ;;  %v505_v40 = vrot.slane %v7801_v34, %v504_v35 }
  0x1c   : > { %v7443_v48 = vld [vmem:[%s11154_s8 + $0x180] sm:$0xff] }
  0x1d   : > { %4279 = vperm.xlu0 %7539, %v4261_v5   ;;  %v529_v41 = vrot.slane %v509_v37, %v504_v35  ;;  %v525_v44 = vrot.slane %v505_v40, %v504_v35  ;;  %v11167_v35 = vmov 1326507024  }
  0x21   : > { %4501 = vperm.xlu0 %7539, %v4467_v6  }
  0x25   : > { %4491 = vperm.xlu0 %7539, %v4465_v7  }
  0x29   : > { %4481 = vperm.xlu0 %7539, %v4463_v8  }
  0x2d   : > { %4471 = vperm.xlu0 %7539, %v4461_v9  }
  0x31   : > { %4842 = vperm.xlu0 %7539, %v7297_v10  }
  0x35   : > { %4832 = vperm.xlu0 %7539, %v7295_v11  }
  0x39   : > { %4822 = vperm.xlu0 %7539, %v7293_v12  }
  0x3d   : > { %4812 = vperm.xlu0 %7539, %v7291_v13  }
  0x41   : > { %5182 = vperm.xlu0 %7539, %v7329_v14  }
  0x45   : > { %5172 = vperm.xlu0 %7539, %v7327_v15  }
  0x49   : > { %5162 = vperm.xlu0 %7539, %v7325_v16   ;;  %v11178_v16 = vmov 683565275  }
  0x4d   : > { %5152 = vperm.xlu0 %7539, %v7323_v17  }
  0x51   : > { %4349 = vperm.xlu0 %7539, %v4275_v18  }
  0x55   : > { %4339 = vperm.xlu0 %7539, %v4273_v19  }
  0x59   : > { %4329 = vperm.xlu0 %7539, %v4271_v20   ;;  %v11187_v20 = vmov 2475754826  }
  0x5d   : > { %4319 = vperm.xlu0 %7539, %v4269_v21  }
  0x61   : > { %5813 = vperm.xlu0 %7539, %v7385_v22   ;;  %v11181_v22 = vmov 2131351028  }
  0x65   : > { %5803 = vperm.xlu0 %7539, %v7383_v23  }
  0x69   : > { %5793 = vperm.xlu0 %7539, %v7381_v24   ;;  %v11183_v24 = vmov 2102212464  }
  0x6d   : > { %5783 = vperm.xlu0 %7539, %v7379_v25  }
  0x71   : > { %6153 = vperm.xlu0 %7539, %v7417_v26   ;;  %v11169_v26 = vmov 920167782  }
  0x75   : > { %6143 = vperm.xlu0 %7539, %v7415_v27  }
  0x79   : > { %6133 = vperm.xlu0 %7539, %v7413_v29  }
  0x7d   : > { %6123 = vperm.xlu0 %7539, %v7411_v31  }
  0x81   : > { %6493 = vperm.xlu0 %7539, %v7449_v33  }
  0x85   : > { %6483 = vperm.xlu0 %7539, %v7447_v39  }
  0x88   : > { %v7816_v45 = vpop.permute.xlu0 %455 }
  0x89   : > { %6473 = vperm.xlu0 %7539, %v7445_v43   ;;  %v7819_v46 = vmul.f32 %v529_v41, %v7816_v45  ;;  %v7822_v47 = vmul.f32 %v537_v42, %v7816_v45  ;;  %v7828_v49 = vmul.f32 %v525_v44, %v7816_v45  ;;  %v7842_v10 = vmul.f32 %v533_v1, %v7816_v45 }
  0x8b   : > { %v1478_v50 = vand.u32 2147483647, %v7819_v46  ;;  %v1481_v51 = vand.u32 2139095040, %v7819_v46  ;;  %v1686_v52 = vand.u32 2147483647, %v7822_v47  ;;  %v1689_v53 = vand.u32 2139095040, %v7822_v47 }
  0x8c   : > { %v1377_v59 = vand.u32 2139095040, %v7828_v49  ;;  %v1374_v4 = vand.u32 2147483647, %v7828_v49  ;;  %vm1480_vm13 = vcmp.lt.s32.totalorder %v7819_v46, 0 }
  0x8d   : > { %6463 = vperm.xlu0 %7539, %v7443_v48   ;;  %v1482_v54 = vshrl.u32 %v1481_v51, 23  ;;  %v1485_v55 = vand.u32 8388607, %v1478_v50  ;;  %v1690_v57 = vshrl.u32 %v1689_v53, 23  ;;  %v1693_v58 = vand.u32 8388607, %v1686_v52 }
  0x8e   : > { %v1378_v62 = vshrl.u32 %v1377_v59, 23  ;;  %v7850_v13 = vand.u32 8388607, %v1374_v4 }
  0x8f   : > { %v7107_v60 = vadd.s32 4294967169, %v1482_v54  ;;  %v7115_v61 = vadd.s32 4294967169, %v1690_v57  ;;  %v1486_v63 = vor.u32 8388608, %v1485_v55  ;;  %v1694_v2 = vor.u32 8388608, %v1693_v58 }
  0x90   : > { %v7103_v5 = vadd.s32 4294967169, %v1378_v62 }
  0x91   : > { %v1488_v0 = vadd.s32 1, %v7107_v60  ;;  %v1696_v3 = vadd.s32 1, %v7115_v61  ;;  %v7844_v11 = vshll.u32 %v1486_v63, 8  ;;  %v7846_v12 = vshll.u32 %v1694_v2, 8 }
  0x92   : > { %v7852_v14 = vadd.s32 1, %v7103_v5 }
  0x93   : > { %vm1489_vm0 = vcmp.gt.s32.totalorder %v1488_v0, 0  ;;  %vm1697_vm1 = vcmp.gt.s32.totalorder %v1696_v3, 0 }
  0x94   : > { %v1490_v6 = vsel %vm1489_vm0, %v1488_v0, 0  ;;  %v1698_v9 = vsel %vm1697_vm1, %v1696_v3, 0  ;;  %vm1385_vm6 = vcmp.gt.s32.totalorder %v7852_v14, 0  ;;  %vm7963_vm0 = vcmp.le.f32.partialorder %v1478_v50, 0.7853982 }
  0x95   : > { %v1491_v7 = vshrl.u32 %v1490_v6, 5  ;;  %v1492_v8 = vand.u32 31, %v1490_v6  ;;  %v7855_v18 = vshrl.u32 %v1698_v9, 5  ;;  %v1700_v19 = vand.u32 31, %v1698_v9 }
  0x97   : > { %v1493_v15 = vsub.s32 32, %v1492_v8  ;;  %v1495_v17 = vshll.u32 %v11178_v16, %v1492_v8  ;;  %v1498_v21 = vshll.u32 %v11187_v20, %v1492_v8  ;;  %v1501_v23 = vshll.u32 %v11181_v22, %v1492_v8 }
  0x98   : > { %v1504_v25 = vshll.u32 %v11183_v24, %v1492_v8  ;;  %v1507_v27 = vshll.u32 %v11169_v26, %v1492_v8  ;;  %vm1510_vm2 = vcmp.lt.s32.totalorder %v1491_v7, 1  ;;  %vm1511_vm3 = vcmp.lt.s32.totalorder %v1491_v7, 2 }
  0x99   : > { %v1496_v28 = vshrl.u32 %v11187_v20, %v1493_v15  ;;  %v1499_v29 = vshrl.u32 %v11181_v22, %v1493_v15  ;;  %v1502_v31 = vshrl.u32 %v11183_v24, %v1493_v15  ;;  %v1494_v32 = vshrl.u32 %v11178_v16, %v1493_v15 }
  0x9a   : > { %v1505_v33 = vshrl.u32 %v11169_v26, %v1493_v15  ;;  %v1508_v37 = vshrl.u32 %v11167_v35, %v1493_v15  ;;  %v1701_v41 = vsub.s32 32, %v1700_v19  ;;  %vm1512_vm4 = vcmp.lt.s32.totalorder %v1491_v7, 3 }
  0x9b   : > { %v1497_v38 = vor.u32 %v1496_v28, %v1495_v17  ;;  %v1500_v39 = vor.u32 %v1499_v29, %v1498_v21  ;;  %v1503_v40 = vor.u32 %v1502_v31, %v1501_v23  ;;  %vm1513_vm5 = vcmp.lt.s32.totalorder %v1491_v7, 4 }
  0x9c   : > { %v1506_v42 = vor.u32 %v1505_v33, %v1504_v25  ;;  %v1509_v43 = vor.u32 %v1508_v37, %v1507_v27  ;;  %v1703_v57 = vshll.u32 %v11178_v16, %v1700_v19  ;;  %v1704_v60 = vshrl.u32 %v11187_v20, %v1701_v41 }
  0x9d   : > { %v1514_v44 = vsel %vm1510_vm2, %v1494_v32, %v1497_v38  ;;  %v1515_v48 = vsel %vm1513_vm5, %v1503_v40, 2102212464  ;;  %v1518_v51 = vsel %vm1510_vm2, %v1497_v38, %v1500_v39  ;;  %v1522_v53 = vsel %vm1510_vm2, %v1500_v39, %v1503_v40 }
  0x9e   : > { %v1516_v54 = vsel %vm1512_vm4, %v1500_v39, %v1515_v48  ;;  %v1519_v55 = vsel %vm1513_vm5, %v1506_v42, 920167782  ;;  %v1523_v56 = vsel %vm1513_vm5, %v1509_v43, 1326507024  ;;  %v1706_v61 = vshll.u32 %v11187_v20, %v1700_v19 }
  0x9f   : > { %v1520_v58 = vsel %vm1512_vm4, %v1503_v40, %v1519_v55  ;;  %v1524_v59 = vsel %vm1512_vm4, %v1506_v42, %v1523_v56  ;;  %v1517_v62 = vsel %vm1511_vm3, %v1514_v44, %v1516_v54  ;;  %v1707_v1 = vshrl.u32 %v11181_v22, %v1701_v41 }
  0xa0   : > { %v1521_v63 = vsel %vm1511_vm3, %v1518_v51, %v1520_v58  ;;  %v1525_v0 = vsel %vm1511_vm3, %v1522_v53, %v1524_v59  ;;  %v1705_v8 = vor.u32 %v1704_v60, %v1703_v57  ;;  %v1709_v15 = vshll.u32 %v11181_v22, %v1700_v19 }
  0xa1   : > { %v7879_v2 = vmul.u32.u64.low %v7844_v11, %v1525_v0  ;;  %v7880_v3 = vmul.u32.u64.high %v7844_v11, %v1525_v0, %v7879_v2  ;;  %v7883_v5 = vmul.u32.u64.low %v7844_v11, %v1521_v63  ;;  %v7884_v6 = vmul.u32.u64.high %v7844_v11, %v1521_v63, %v7883_v5 }
  0xa2   : > { %v1708_v9 = vor.u32 %v1707_v1, %v1706_v61  ;;  %v1710_v17 = vshrl.u32 %v11183_v24, %v1701_v41  ;;  %v1702_v7 = vshrl.u32 %v11178_v16, %v1701_v41  ;;  %v1712_v21 = vshll.u32 %v11183_v24, %v1700_v19 }
  0xa3   : > { %v1713_v23 = vshrl.u32 %v11169_v26, %v1701_v41  ;;  %v1716_v25 = vshrl.u32 %v11167_v35, %v1701_v41  ;;  %v1533_v27 = vmul.u32 %v7844_v11, %v1517_v62  ;;  %v1715_v29 = vshll.u32 %v11169_v26, %v1700_v19 }
  0xa4   : > { %v1711_v28 = vor.u32 %v1710_v17, %v1709_v15  ;;  %vm1718_vm7 = vcmp.lt.s32.totalorder %v7855_v18, 1  ;;  %vm1535_vm8 = vc.u32 %v7880_v3, %v7883_v5  ;;  %v1536_v31 = vadd.s32 1, %v7884_v6 }
  0xa5   : > { %v1714_v32 = vor.u32 %v1713_v23, %v1712_v21  ;;  %vm1719_vm9 = vcmp.lt.s32.totalorder %v7855_v18, 2  ;;  %v1717_v33 = vor.u32 %v1716_v25, %v1715_v29  ;;  %vm1720_vm10 = vcmp.lt.s32.totalorder %v7855_v18, 3 }
  0xa6   : > { %vm1721_vm11 = vcmp.lt.s32.totalorder %v7855_v18, 4  ;;  %v1726_v37 = vsel %vm1718_vm7, %v1705_v8, %v1708_v9  ;;  %v1537_v11 = vsel %vm1535_vm8, %v1536_v31, %v7884_v6  ;;  %v1730_v39 = vsel %vm1718_vm7, %v1708_v9, %v1711_v28 }
  0xa7   : > { %v1723_v38 = vsel %vm1721_vm11, %v1711_v28, 2102212464  ;;  %v1727_v19 = vsel %vm1721_vm11, %v1714_v32, 920167782  ;;  %v1538_v40 = vadd.s32 %v1537_v11, %v1533_v27  ;;  %v1722_v41 = vsel %vm1718_vm7, %v1702_v7, %v1705_v8 }
  0xa8   : > { %v1728_v42 = vsel %vm1720_vm10, %v1711_v28, %v1727_v19  ;;  %v1731_v43 = vsel %vm1721_vm11, %v1717_v33, 1326507024  ;;  %v1724_v44 = vsel %vm1720_vm10, %v1708_v9, %v1723_v38  ;;  %v1386_v53 = vsel %vm1385_vm6, %v7852_v14, 0 }
  0xa9   : > { %v1729_v48 = vsel %vm1719_vm9, %v1726_v37, %v1728_v42  ;;  %v1732_v51 = vsel %vm1720_vm10, %v1714_v32, %v1731_v43  ;;  %v1539_v54 = vadd.s32 536870912, %v1538_v40  ;;  %v1725_v61 = vsel %vm1719_vm9, %v1722_v41, %v1724_v44 }
  0xaa   : > { %v1733_v55 = vsel %vm1719_vm9, %v1730_v39, %v1732_v51  ;;  %v7911_v56 = vmul.u32.u64.low %v7846_v12, %v1729_v48  ;;  %v7912_v57 = vmul.u32.u64.high %v7846_v12, %v1729_v48, %v7911_v56  ;;  %v1388_v62 = vand.u32 31, %v1386_v53 }
  0xab   : > { %v7916_v58 = vmul.u32.u64.low %v7846_v12, %v1733_v55  ;;  %v7917_v59 = vmul.u32.u64.high %v7846_v12, %v1733_v55, %v7916_v58  ;;  %v1540_v60 = vshrl.u32 %v1539_v54, 30  ;;  %v468_v14 = vsub.s32 5, %v7785_v30 }
  0xac   : > { %v1382_v63 = vor.u32 8388608, %v7850_v13  ;;  %v1744_v1 = vadd.s32 1, %v7912_v57  ;;  %v1389_v2 = vsub.s32 32, %v1388_v62  ;;  %v1585_v6 = vand.u32 2139095040, %v7842_v10 }
  0xad   : > { %v1541_v0 = vshll.u32 %v1540_v60, 30  ;;  %v1741_v8 = vmul.u32 %v7846_v12, %v1725_v61  ;;  %vm1743_vm12 = vc.u32 %v7917_v59, %v7911_v56  ;;  %v7932_v15 = vsub.s32 1, %v7785_v30 }
  0xae   : > { %v1745_v18 = vsel %vm1743_vm12, %v1744_v1, %v7912_v57  ;;  %v7937_v13 = vrot.slane %v7801_v34, %v468_v14  ;;  %v1392_v12 = vshrl.u32 %v11187_v20, %v1389_v2  ;;  %v7941_v7 = vshll.u32 %v1382_v63, 8 }
  0xaf   : > { %v7928_v9 = vsub.s32 %v1538_v40, %v1541_v0  ;;  %v1746_v17 = vadd.s32 %v1745_v18, %v1741_v8  ;;  %v1582_v21 = vand.u32 2147483647, %v7842_v10  ;;  %v1395_v25 = vshrl.u32 %v11181_v22, %v1389_v2 }
  0xb0   : > { %v1398_v27 = vshrl.u32 %v11183_v24, %v1389_v2  ;;  %v1586_v28 = vshrl.u32 %v1585_v6, 23  ;;  %v1564_v29 = vsub.s32 4, %v1540_v60  ;;  %v7947_v32 = vshrl.u32 %v1386_v53, 5 }
  0xb1   : > { %v1544_v23 = vsub.s32 0, %v7928_v9  ;;  %v1747_v31 = vadd.s32 536870912, %v1746_v17  ;;  %v1391_v33 = vshll.u32 %v11178_v16, %v1388_v62  ;;  %v1394_v11 = vshll.u32 %v11187_v20, %v1388_v62 }
  0xb2   : > { %v1397_v38 = vshll.u32 %v11181_v22, %v1388_v62  ;;  %v1401_v19 = vshrl.u32 %v11169_v26, %v1389_v2  ;;  %v1400_v41 = vshll.u32 %v11183_v24, %v1388_v62  ;;  %v1404_v42 = vshrl.u32 %v11167_v35, %v1389_v2 }
  0xb3   : > { %v7108_v37 = vmin.u32 %v1544_v23, %v7928_v9  ;;  %v1748_v39 = vshrl.u32 %v1747_v31, 30  ;;  %v1393_v40 = vor.u32 %v1392_v12, %v1391_v33  ;;  %v1396_v44 = vor.u32 %v1395_v25, %v1394_v11 }
  0xb4   : > { %v1399_v48 = vor.u32 %v1398_v27, %v1397_v38  ;;  %v1403_v51 = vshll.u32 %v11169_v26, %v1388_v62  ;;  %v1534_v53 = vadd.s32 %v7883_v5, %v7880_v3  ;;  %v1402_v55 = vor.u32 %v1401_v19, %v1400_v41 }
  0xb5   : > { %v1546_v43 = vclz %v7108_v37  ;;  %v1749_v54 = vshll.u32 %v1748_v39, 30  ;;  %v7111_v57 = vadd.s32 4294967169, %v1586_v28  ;;  %vm1406_vm14 = vcmp.lt.s32.totalorder %v7947_v32, 1 }
  0xb6   : > { %v1405_v61 = vor.u32 %v1404_v42, %v1403_v51  ;;  %vm1409_vm15 = vcmp.lt.s32.totalorder %v7947_v32, 4  ;;  %vm1407_vm1 = vcmp.lt.s32.totalorder %v7947_v32, 2  ;;  %vm1408_vm2 = vcmp.lt.s32.totalorder %v7947_v32, 3 }
  0xb7   : > { %v7109_v58 = vadd.s32 4294967294, %v1546_v43  ;;  %v7967_v0 = vsub.s32 %v1746_v17, %v1749_v54  ;;  %v1415_v3 = vsel %vm1409_vm15, %v1402_v55, 920167782  ;;  %v1565_v5 = vsel %vm1480_vm13, %v1564_v29, %v1540_v60 }
  0xb8   : > { %vm1688_vm4 = vcmp.lt.s32.totalorder %v7822_v47, 0  ;;  %v1414_v50 = vsel %vm1406_vm14, %v1393_v40, %v1396_v44  ;;  %v1416_v62 = vsel %vm1408_vm2, %v1399_v48, %v1415_v3  ;;  %v1390_v8 = vshrl.u32 %v11178_v16, %v1389_v2 }
  0xb9   : > { %vm7110_vm3 = vcmp.lt.s32.totalorder %v7109_v58, 0  ;;  %v1752_v6 = vsub.s32 0, %v7967_v0  ;;  %v1418_v18 = vsel %vm1406_vm14, %v1396_v44, %v1399_v48  ;;  %v1411_v60 = vsel %vm1409_vm15, %v1399_v48, 2102212464 }
  0xba   : > { %v1549_v1 = vsel %vm7110_vm3, 0, %v7109_v58  ;;  %v1419_v23 = vsel %vm1409_vm15, %v1405_v61, 1326507024  ;;  %vm7991_vm5 = vcmp.le.f32.partialorder %v1686_v52, 0.7853982  ;;  %v1417_v28 = vsel %vm1407_vm1, %v1414_v50, %v1416_v62 }
  0xbb   : > { %v1550_v17 = vsub.s32 32, %v1549_v1  ;;  %v1554_v12 = vsub.s32 4294967266, %v1549_v1  ;;  %v1551_v25 = vshll.u32 %v7928_v9, %v1549_v1  ;;  %v7116_v2 = vmin.u32 %v1752_v6, %v7967_v0 }
  0xbc   : > { %v1420_v29 = vsel %vm1408_vm2, %v1402_v55, %v1419_v23  ;;  %v1592_v9 = vadd.s32 1, %v7111_v57  ;;  %v1772_v38 = vsub.s32 4, %v1748_v39  ;;  %v1410_v52 = vsel %vm1406_vm14, %v1390_v8, %v1393_v40 }
  0xbd   : > { %v1552_v31 = vshrl.u32 %v1534_v53, %v1550_v17  ;;  %v1555_v33 = vadd.s32 127, %v1554_v12  ;;  %v1421_v37 = vsel %vm1407_vm1, %v1418_v18, %v1420_v29  ;;  %v1754_v11 = vclz %v7116_v2 }
  0xbe   : > { %v1412_v19 = vsel %vm1408_vm2, %v1396_v44, %v1411_v60  ;;  %v8007_v43 = vmul.u32.u64.low %v7941_v7, %v1421_v37  ;;  %v8008_v48 = vmul.u32.u64.high %v7941_v7, %v1421_v37, %v8007_v43  ;;  %vm1593_vm6 = vcmp.gt.s32.totalorder %v1592_v9, 0 }
  0xbf   : > { %v1553_v41 = vor.u32 %v1552_v31, %v1551_v25  ;;  %v1556_v42 = vshll.u32 %v1555_v33, 23  ;;  %v7117_v51 = vadd.s32 4294967294, %v1754_v11  ;;  %v8017_v40 = vsel %vm7963_vm0, 0, %v1565_v5 }
  0xc0   : > { %v8011_v53 = vmul.u32.u64.low %v7941_v7, %v1417_v28  ;;  %v8012_v54 = vmul.u32.u64.high %v7941_v7, %v1417_v28, %v8011_v53  ;;  %v1742_v44 = vadd.s32 %v7911_v56, %v7917_v59  ;;  %v1594_v57 = vsel %vm1593_vm6, %v1592_v9, 0 }
  0xc1   : > { %v1557_v55 = vor.u32 4788187, %v1556_v42  ;;  %vm7118_vm7 = vcmp.lt.s32.totalorder %v7117_v51, 0  ;;  %v1773_v58 = vsel %vm1688_vm4, %v1772_v38, %v1748_v39  ;;  %v1413_v61 = vsel %vm1407_vm1, %v1410_v52, %v1412_v19 }
  0xc2   : > { %v1596_v3 = vand.u32 31, %v1594_v57  ;;  %v1560_v62 = vcvt.s32.f32 %v1553_v41  ;;  %v1757_v1 = vsel %vm7118_vm7, 0, %v7117_v51  ;;  %vm1431_vm8 = vc.u32 %v8008_v48, %v8011_v53 }
  0xc3   : > { %v1558_v50 = vand.u32 2147483647, %v1557_v55  ;;  %v1571_v5 = vadd.s32 3, %v8017_v40  ;;  %v1758_v6 = vsub.s32 32, %v1757_v1  ;;  %v1762_v8 = vsub.s32 4294967266, %v1757_v1 }
  0xc4   : > { %v1432_v56 = vadd.s32 1, %v8012_v54  ;;  %v1759_v18 = vshll.u32 %v7967_v0, %v1757_v1  ;;  %v8032_v32 = vsel %vm7991_vm5, 0, %v1773_v58  ;;  %v1429_v39 = vmul.u32 %v7941_v7, %v1413_v61 }
  0xc5   : > { %v1561_v59 = vmul.f32 %v1560_v62, %v1558_v50  ;;  %v1760_v17 = vshrl.u32 %v1742_v44, %v1758_v6  ;;  %v1763_v12 = vadd.s32 127, %v1762_v8  ;;  %v8036_v23 = vsub.s32 32, %v1596_v3 }
  0xc6   : > { %v1433_v60 = vsel %vm1431_vm8, %v1432_v56, %v8012_v54  ;;  %v489_v28 = vrot.slane %v7937_v13, %v7932_v15  ;;  %v1589_v0 = vand.u32 8388607, %v1582_v21  ;;  %v8045_v7 = vrot.slane %v7805_v36, %v468_v14 }
  0xc7   : > { %v1562_v25 = vxor.u32 2147483648, %v1561_v59  ;;  %v1434_v2 = vadd.s32 %v1433_v60, %v1429_v39  ;;  %v1761_v29 = vor.u32 %v1760_v17, %v1759_v18  ;;  %v1764_v31 = vshll.u32 %v1763_v12, 23 }
  0xc8   : > { %v8049_v37 = vand.u32 3, %v1571_v5  ;;  %v1779_v9 = vadd.s32 3, %v8032_v32  ;;  %v1600_v52 = vshrl.u32 %v11187_v20, %v8036_v23  ;;  %v1603_v36 = vshrl.u32 %v11181_v22, %v8036_v23 }
  0xc9   : > { %v1563_v33 = vsel %vm1480_vm13, %v1562_v25, %v1561_v59  ;;  %v1435_v11 = vadd.s32 536870912, %v1434_v2  ;;  %v1765_v38 = vor.u32 4788187, %v1764_v31  ;;  %v1606_v19 = vshrl.u32 %v11183_v24, %v8036_v23 }
  0xca   : > { %v1566_v13 = vsel %vm7963_vm0, %v7819_v46, %v1563_v33  ;;  %v1609_v41 = vshrl.u32 %v11169_v26, %v8036_v23  ;;  %v1768_v63 = vcvt.s32.f32 %v1761_v29  ;;  %v1608_v43 = vshll.u32 %v11183_v24, %v1596_v3 }
  0xcb   : > { %7545 = vcosq.f32 %v1566_v13  ;;  %v8059_v14 = vshrl.u32 %v1435_v11, 30  ;;  %v1766_v42 = vand.u32 2147483647, %v1765_v38  ;;  %v8067_v54 = vshrl.u32 %v1594_v57, 5 }
  0xcc   : > { %7547 = vsinq.f32 %v1566_v13  ;;  %v1599_v55 = vshll.u32 %v11178_v16, %v1596_v3  ;;  %v1602_v44 = vshll.u32 %v11187_v20, %v1596_v3  ;;  %v1605_v61 = vshll.u32 %v11181_v22, %v1596_v3 }
  0xcd   : > { %v1437_v51 = vshll.u32 %v8059_v14, 30  ;;  %v1769_v58 = vmul.f32 %v1768_v63, %v1766_v42  ;;  %v1610_v50 = vor.u32 %v1609_v41, %v1608_v43  ;;  %v1612_v62 = vshrl.u32 %v11167_v35, %v8036_v23 }
  0xce   : > { %v1601_v5 = vor.u32 %v1600_v52, %v1599_v55  ;;  %v1604_v6 = vor.u32 %v1603_v36, %v1602_v44  ;;  %v465_v8 = vrot.slane %v7801_v34, %v7932_v15  ;;  %v1590_v56 = vor.u32 8388608, %v1589_v0 }
  0xcf   : > { %v8074_v1 = vsub.s32 %v1434_v2, %v1437_v51  ;;  %v1770_v57 = vxor.u32 2147483648, %v1769_v58  ;;  %v1607_v59 = vor.u32 %v1606_v19, %v1605_v61  ;;  %v1611_v18 = vshll.u32 %v11169_v26, %v1596_v3 }
  0xd0   : > { %v8079_v39 = vand.u32 3, %v1779_v9  ;;  %vm1617_vm9 = vcmp.lt.s32.totalorder %v8067_v54, 4  ;;  %v8084_v12 = vmul.f32 %v489_v28, %v7816_v45  ;;  %vm1577_vm10 = vcmp.eq.s32.totalorder %v8049_v37, 2 }
  0xd1   : > { %v1440_v17 = vsub.s32 0, %v8074_v1  ;;  %v1771_v60 = vsel %vm1688_vm4, %v1770_v57, %v1769_v58  ;;  %v1613_v25 = vor.u32 %v1612_v62, %v1611_v18  ;;  %vm1614_vm11 = vcmp.lt.s32.totalorder %v8067_v54, 1 }
  0xd2   : > { %v1623_v3 = vsel %vm1617_vm9, %v1610_v50, 920167782  ;;  %vm1574_vm12 = vcmp.eq.s32.totalorder %v8049_v37, 0  ;;  %v1774_v2 = vsel %vm7991_vm5, %v7822_v47, %v1771_v60  ;;  %vm1376_vm13 = vcmp.lt.s32.totalorder %v7828_v49, 0 }
  0xd3   : > { %v7104_v28 = vmin.u32 %v1440_v17, %v8074_v1  ;;  %vm1616_vm14 = vcmp.lt.s32.totalorder %v8067_v54, 3  ;;  %v1622_v29 = vsel %vm1614_vm11, %v1601_v5, %v1604_v6  ;;  %vm1573_vm15 = vcmp.lt.s32.totalorder %v8049_v37, 2 }
  0xd4   : > { %7549 = vcosq.f32 %v1774_v2  ;;  %vm1615_vm0 = vcmp.lt.s32.totalorder %v8067_v54, 2  ;;  %v1624_v31 = vsel %vm1616_vm14, %v1607_v59, %v1623_v3  ;;  %v1630_v0 = vshll.u32 %v1590_v56, 8 }
  0xd5   : > { %vm1570_vm1 = vweird.f32 %v7819_v46  ;;  %7551 = vsinq.f32 %v1774_v2  ;;  %v1442_v27 = vclz %v7104_v28  ;;  %v1619_v33 = vsel %vm1617_vm9, %v1607_v59, 2102212464 }
  0xd6   : > { %v1626_v9 = vsel %vm1614_vm11, %v1604_v6, %v1607_v59  ;;  %v1460_v11 = vsub.s32 4, %v8059_v14  ;;  %v1598_v13 = vshrl.u32 %v11178_v16, %v8036_v23  ;;  %v1625_v38 = vsel %vm1615_vm0, %v1622_v29, %v1624_v31 }
  0xd7   : > { %v1627_v52 = vsel %vm1617_vm9, %v1613_v25, 1326507024  ;;  %v7105_v36 = vadd.s32 4294967294, %v1442_v27  ;;  %v8119_v41 = vmul.u32.u64.low %v1630_v0, %v1625_v38  ;;  %v8120_v42 = vmul.u32.u64.high %v1630_v0, %v1625_v38, %v8119_v41 }
  0xd8   : > { %v1628_v19 = vsel %vm1616_vm14, %v1610_v50, %v1627_v52  ;;  %v8123_v63 = vpop.eup %7545  ;;  %v1618_v43 = vsel %vm1614_vm11, %v1598_v13, %v1601_v5  ;;  %v1620_v23 = vsel %vm1616_vm14, %v1604_v6, %v1619_v33  ;;  %v1065_v55 = vand.u32 2139095040, %v8084_v12 }
  0xd9   : > { %v1629_v51 = vsel %vm1615_vm0, %v1626_v9, %v1628_v19  ;;  %v8132_v44 = vpop.eup %7547  ;;  %v11162_v58 = vxor.u32 2147483648, %v8123_v63  ;;  %vm7106_vm2 = vcmp.lt.s32.totalorder %v7105_v36, 0  ;;  %v1430_v5 = vadd.s32 %v8011_v53, %v8008_v48 }
  0xda   : > { %v8135_v61 = vmul.u32.u64.low %v1630_v0, %v1629_v51  ;;  %v8136_v50 = vmul.u32.u64.high %v1630_v0, %v1629_v51, %v8135_v61  ;;  %v11165_v62 = vxor.u32 2147483648, %v8132_v44  ;;  %v1445_v57 = vsel %vm7106_vm2, 0, %v7105_v36 }
  0xdb   : > { %v1066_v6 = vshrl.u32 %v1065_v55, 23  ;;  %v1579_v56 = vsel %vm1577_vm10, %v11162_v58, %v8132_v44  ;;  %v1446_v59 = vsub.s32 32, %v1445_v57  ;;  %v1450_v18 = vsub.s32 4294967266, %v1445_v57 }
  0xdc   : > { %v1621_v17 = vsel %vm1615_vm0, %v1618_v43, %v1620_v23  ;;  %v1576_v60 = vsel %vm1574_vm12, %v8123_v63, %v11165_v62  ;;  %v1461_v48 = vsel %vm1376_vm13, %v1460_v11, %v8059_v14  ;;  %v1640_v53 = vadd.s32 1, %v8120_v42 }
  0xdd   : > { %v7091_v25 = vadd.s32 4294967169, %v1066_v6  ;;  %v1580_v3 = vsel %vm1573_vm15, %v1576_v60, %v1579_v56  ;;  %v1447_v2 = vshll.u32 %v8074_v1, %v1445_v57  ;;  %v1448_v54 = vshrl.u32 %v1430_v5, %v1446_v59 }
  0xde   : > { %v1451_v28 = vadd.s32 127, %v1450_v18  ;;  %v1581_v29 = vsel %vm1570_vm1, nan, %v1580_v3  ;;  %v1637_v31 = vmul.u32 %v1630_v0, %v1621_v17  ;;  %vm1639_vm3 = vc.u32 %v8136_v50, %v8119_v41 }
  0xdf   : > { %v1072_v27 = vadd.s32 1, %v7091_v25  ;;  %3133 = vmatprep.subr.mxu0 %v1581_v29  ;;  %v1449_v14 = vor.u32 %v1448_v54, %v1447_v2  ;;  %v1641_v9 = vsel %vm1639_vm3, %v1640_v53, %v8120_v42  ;;  %v497_v37 = vrot.slane %v8045_v7, %v7932_v15 }
  0xe0   : > { %v1452_v33 = vshll.u32 %v1451_v28, 23  ;;  %vm8169_vm4 = vcmp.le.f32.partialorder %v1374_v4, 0.7853982  ;;  %v1642_v11 = vadd.s32 %v1641_v9, %v1637_v31  ;;  %v485_v0 = vrot.slane %v465_v8, %v7932_v15 }
  0xe1   : > { %vm1073_vm5 = vcmp.gt.s32.totalorder %v1072_v27, 0  ;;  %v8177_v13 = vpop.eup %7549  ;;  %v1463_v52 = vsel %vm8169_vm4, 0, %v1461_v48  ;;  %v1062_v7 = vand.u32 2147483647, %v8084_v12  ;;  %vm1782_vm6 = vcmp.eq.s32.totalorder %v8079_v39, 0 }
  0xe2   : > { %v1453_v38 = vor.u32 4788187, %v1452_v33  ;;  %v1074_v36 = vsel %vm1073_vm5, %v1072_v27, 0  ;;  %v8182_v4 = vpop.eup %7551  ;;  %v11160_v19 = vxor.u32 2147483648, %v8177_v13  ;;  %v1643_v42 = vadd.s32 536870912, %v1642_v11 }
  0xe3   : > { %v1076_v43 = vand.u32 31, %v1074_v36  ;;  %v11161_v34 = vxor.u32 2147483648, %v8182_v4  ;;  %vm1785_vm7 = vcmp.eq.s32.totalorder %v8079_v39, 2  ;;  %v1456_v23 = vcvt.s32.f32 %v1449_v14 }
  0xe4   : > { %v1454_v8 = vand.u32 2147483647, %v1453_v38  ;;  %v1787_v51 = vsel %vm1785_vm7, %v11160_v19, %v8182_v4  ;;  %v1467_v55 = vadd.s32 3, %v1463_v52  ;;  %v8191_v61 = vshrl.u32 %v1643_v42, 30 }
  0xe5   : > { %v1077_v5 = vsub.s32 32, %v1076_v43  ;;  %vm1781_vm8 = vcmp.lt.s32.totalorder %v8079_v39, 2  ;;  %v1784_v57 = vsel %vm1782_vm6, %v8177_v13, %v11161_v34  ;;  %v1069_v56 = vand.u32 8388607, %v1062_v7 }
  0xe6   : > { %v1457_v6 = vmul.f32 %v1456_v23, %v1454_v8  ;;  %vm1778_vm9 = vweird.f32 %v7822_v47  ;;  %v1788_v59 = vsel %vm1781_vm8, %v1784_v57, %v1787_v51  ;;  %v1645_v18 = vshll.u32 %v8191_v61, 30  ;;  %v4464_v47 = vld [vmem:[%s11154_s8 + $0x18] sm:$0xff] }
  0xe7   : > { %v8202_v17 = vmul.f32 %v497_v37, %v7816_v45  ;;  %v1789_v60 = vsel %vm1778_vm9, nan, %v1788_v59  ;;  %v8206_v48 = vand.u32 3, %v1463_v52  ;;  %v8209_v53 = vmul.f32 %v485_v0, %v7816_v45 }
  0xe8   : > { %v1458_v39 = vxor.u32 2147483648, %v1457_v6  ;;  %3294 = vmatprep.subr.mxu1 %v1789_v60  ;;  %v8211_v25 = vand.u32 3, %v1467_v55  ;;  %v8213_v3 = vsub.s32 %v1642_v11, %v1645_v18  ;;  %v1080_v2 = vshrl.u32 %v11187_v20, %v1077_v5 }
  0xe9   : > { %11206 = vst [vmem:[#allocation3_spill] sm:$0xff] %v8202_v17  ;;  %v1083_v54 = vshrl.u32 %v11181_v22, %v1077_v5  ;;  %v1070_v29 = vor.u32 8388608, %v1069_v56  ;;  %v1075_v31 = vshrl.u32 %v1074_v36, 5  ;;  %v1086_v27 = vshrl.u32 %v11183_v24, %v1077_v5 }
  0xea   : > { %v1459_v28 = vsel %vm1376_vm13, %v1458_v39, %v1457_v6  ;;  %vm1584_vm10 = vcmp.lt.s32.totalorder %v7842_v10, 0  ;;  %v1648_v33 = vsub.s32 0, %v8213_v3  ;;  %v1079_v9 = vshll.u32 %v11178_v16, %v1076_v43 }
  0xeb   : > { %v1462_v14 = vsel %vm8169_vm4, %v7828_v49, %v1459_v28  ;;  %v1082_v37 = vshll.u32 %v11187_v20, %v1076_v43  ;;  %v1085_v11 = vshll.u32 %v11181_v22, %v1076_v43  ;;  %v1088_v0 = vshll.u32 %v11183_v24, %v1076_v43 }
  0xec   : > { %7553 = vcosq.f32 %v1462_v14  ;;  %v1089_v38 = vshrl.u32 %v11169_v26, %v1077_v5  ;;  %v7112_v52 = vmin.u32 %v1648_v33, %v8213_v3  ;;  %v1081_v1 = vor.u32 %v1080_v2, %v1079_v9 }
  0xed   : > { %7555 = vsinq.f32 %v1462_v14  ;;  %v1084_v36 = vor.u32 %v1083_v54, %v1082_v37  ;;  %v1087_v42 = vor.u32 %v1086_v27, %v1085_v11  ;;  %v1091_v23 = vshll.u32 %v11169_v26, %v1076_v43 }
  0xee   : > { %v1090_v8 = vor.u32 %v1089_v38, %v1088_v0  ;;  %v1092_v51 = vshrl.u32 %v11167_v35, %v1077_v5  ;;  %v1638_v55 = vadd.s32 %v8119_v41, %v8136_v50  ;;  %v1650_v57 = vclz %v7112_v52 }
  0xef   : > { %v8235_v6 = vshll.u32 %v1070_v29, 8  ;;  %v1273_v56 = vand.u32 2139095040, %v8202_v17  ;;  %v1668_v59 = vsub.s32 4, %v8191_v61  ;;  %v1078_v18 = vshrl.u32 %v11178_v16, %v1077_v5 }
  0xf0   : > { %v1093_v60 = vor.u32 %v1092_v51, %v1091_v23  ;;  %vm1094_vm11 = vcmp.lt.s32.totalorder %v1075_v31, 1  ;;  %vm8242_vm12 = vcmp.le.f32.partialorder %v1582_v21, 0.7853982  ;;  %v7113_v39 = vadd.s32 4294967294, %v1650_v57 }
  0xf1   : > { %vm1096_vm13 = vcmp.lt.s32.totalorder %v1075_v31, 3  ;;  %vm1097_vm14 = vcmp.lt.s32.totalorder %v1075_v31, 4  ;;  %v1102_v41 = vsel %vm1094_vm11, %v1081_v1, %v1084_v36  ;;  %v1106_v54 = vsel %vm1094_vm11, %v1084_v36, %v1087_v42 }
  0xf2   : > { %v1099_v50 = vsel %vm1097_vm14, %v1087_v42, 2102212464  ;;  %v1103_v2 = vsel %vm1097_vm14, %v1090_v8, 920167782  ;;  %v1107_v28 = vsel %vm1097_vm14, %v1093_v60, 1326507024  ;;  %v1669_v27 = vsel %vm1584_vm10, %v1668_v59, %v8191_v61 }
  0xf3   : > { %vm2712_vm15 = vcmp.eq.s32.totalorder %v8206_v48, 2  ;;  %vm7114_vm0 = vcmp.lt.s32.totalorder %v7113_v39, 0  ;;  %vm1095_vm2 = vcmp.lt.s32.totalorder %v1075_v31, 2  ;;  %v1104_v5 = vsel %vm1096_vm13, %v1087_v42, %v1103_v2 }
  0xf4   : > { %v1108_v21 = vsel %vm1096_vm13, %v1090_v8, %v1107_v28  ;;  %vm2709_vm3 = vcmp.eq.s32.totalorder %v8206_v48, 0  ;;  %v1653_v29 = vsel %vm7114_vm0, 0, %v7113_v39  ;;  %v1105_v14 = vsel %vm1095_vm2, %v1102_v41, %v1104_v5 }
  0xf5   : > { %v1109_v33 = vsel %vm1095_vm2, %v1106_v54, %v1108_v21  ;;  %vm2708_vm4 = vcmp.lt.s32.totalorder %v8206_v48, 2  ;;  %v1654_v9 = vsub.s32 32, %v1653_v29  ;;  %v1658_v37 = vsub.s32 4294967266, %v1653_v29 }
  0xf6   : > { %v1098_v11 = vsel %vm1094_vm11, %v1078_v18, %v1081_v1  ;;  %v1100_v0 = vsel %vm1096_vm13, %v1084_v36, %v1099_v50  ;;  %v8261_v38 = vmul.u32.u64.low %v8235_v6, %v1109_v33  ;;  %v8262_v52 = vmul.u32.u64.high %v8235_v6, %v1109_v33, %v8261_v38 }
  0xf7   : > { %v8265_v42 = vmul.u32.u64.low %v8235_v6, %v1105_v14  ;;  %v8266_v8 = vmul.u32.u64.high %v8235_v6, %v1105_v14, %v8265_v42  ;;  %v1655_v61 = vshll.u32 %v8213_v3, %v1653_v29  ;;  %v1656_v23 = vshrl.u32 %v1638_v55, %v1654_v9 }
  0xf8   : > { %v1659_v51 = vadd.s32 127, %v1658_v37  ;;  %v1274_v57 = vshrl.u32 %v1273_v56, 23  ;;  %vm1469_vm5 = vcmp.lt.s32.totalorder %v8211_v25, 2  ;;  %vm1470_vm6 = vcmp.eq.s32.totalorder %v8211_v25, 0 }
  0xf9   : > { %vm1473_vm7 = vcmp.eq.s32.totalorder %v8211_v25, 2  ;;  %v1101_v1 = vsel %vm1095_vm2, %v1098_v11, %v1100_v0  ;;  %v7554_v36 = vpop.eup %7553  ;;  %v1657_v59 = vor.u32 %v1656_v23, %v1655_v61  ;;  %v1270_v60 = vand.u32 2147483647, %v8202_v17 }
  0xfa   : > { %v1660_v18 = vshll.u32 %v1659_v51, 23  ;;  %v7099_v39 = vadd.s32 4294967169, %v1274_v57  ;;  %v7556_v41 = vpop.eup %7555  ;;  %v1474_v50 = vxor.u32 2147483648, %v7554_v36  ;;  %v1671_v3 = vsel %vm8242_vm12, 0, %v1669_v27 }
  0xfb   : > { %vm1119_vm8 = vc.u32 %v8262_v52, %v8265_v42  ;;  %v1120_v55 = vadd.s32 1, %v8266_v8  ;;  %v1471_v56 = vxor.u32 2147483648, %v7556_v41  ;;  %v1117_v31 = vmul.u32 %v8235_v6, %v1101_v1 }
  0xfc   : > { %v1661_v2 = vor.u32 4788187, %v1660_v18  ;;  %v1280_v54 = vadd.s32 1, %v7099_v39  ;;  %v1475_v28 = vsel %vm1473_vm7, %v1474_v50, %v7556_v41  ;;  %v2714_v5 = vsel %vm2712_vm15, %v1474_v50, %v7556_v41 }
  0xfd   : > { %v1664_v21 = vcvt.s32.f32 %v1657_v59  ;;  %v1121_v29 = vsel %vm1119_vm8, %v1120_v55, %v8266_v8  ;;  %v1472_v27 = vsel %vm1470_vm6, %v7554_v36, %v1471_v56  ;;  %v2711_v14 = vsel %vm2709_vm3, %v7554_v36, %v1471_v56 }
  0xfe   : > { %v1662_v33 = vand.u32 2147483647, %v1661_v2  ;;  %v1122_v9 = vadd.s32 %v1121_v29, %v1117_v31  ;;  %vm1466_vm11 = vweird.f32 %v7828_v49  ;;  %v1476_v6 = vsel %vm1469_vm5, %v1472_v27, %v1475_v28 }
  0xff   : > { %v2715_v37 = vsel %vm2708_vm4, %v2711_v14, %v2714_v5  ;;  %vm1281_vm13 = vcmp.gt.s32.totalorder %v1280_v54, 0  ;;  %v1477_v11 = vsel %vm1466_vm11, nan, %v1476_v6  ;;  %v1675_v61 = vadd.s32 3, %v1671_v3 }
 0x100   : > { %v8295_v0 = vsel %vm1466_vm11, nan, %v2715_v37  ;;  %v1665_v38 = vmul.f32 %v1664_v21, %v1662_v33  ;;  %v1123_v8 = vadd.s32 536870912, %v1122_v9  ;;  %3134 = vmatpush1.msra.mxu0 %v1477_v11  ;;  %v1277_v23 = vand.u32 8388607, %v1270_v60 }
 0x101   : > { %v1282_v51 = vsel %vm1281_vm13, %v1280_v54, 0  ;;  %v961_v1 = vand.u32 2139095040, %v8209_v53  ;;  %v8304_v36 = vand.u32 3, %v1671_v3  ;;  %v8310_v41 = vand.u32 3, %v1675_v61 }
 0x102   : > { %v1666_v57 = vxor.u32 2147483648, %v1665_v38  ;;  %v8299_v49 = vshrl.u32 %v1123_v8, 30  ;;  %v1284_v25 = vand.u32 31, %v1282_v51  ;;  %v1278_v50 = vor.u32 8388608, %v1277_v23 }
 0x103   : > { %v958_v55 = vand.u32 2147483647, %v8209_v53  ;;  %v962_v31 = vshrl.u32 %v961_v1, 23  ;;  %v8320_v5 = vshrl.u32 %v1282_v51, 5  ;;  %v1118_v6 = vadd.s32 %v8265_v42, %v8262_v52 }
 0x104   : > { %v1667_v48 = vsel %vm1584_vm10, %v1666_v57, %v1665_v38  ;;  %v1125_v59 = vshll.u32 %v8299_v49, 30  ;;  %v1285_v18 = vsub.s32 32, %v1284_v25  ;;  %v1287_v2 = vshll.u32 %v11178_v16, %v1284_v25 }
 0x105   : > { %v1670_v39 = vsel %vm8242_vm12, %v7842_v10, %v1667_v48  ;;  %v1290_v54 = vshll.u32 %v11187_v20, %v1284_v25  ;;  %v1293_v21 = vshll.u32 %v11181_v22, %v1284_v25  ;;  %v1296_v33 = vshll.u32 %v11183_v24, %v1284_v25 }
 0x106   : > { %7557 = vcosq.f32 %v1670_v39  ;;  %v8313_v56 = vsub.s32 %v1122_v9, %v1125_v59  ;;  %v1288_v3 = vshrl.u32 %v11187_v20, %v1285_v18  ;;  %v1291_v28 = vshrl.u32 %v11181_v22, %v1285_v18 }
 0x107   : > { %7559 = vsinq.f32 %v1670_v39  ;;  %v1294_v29 = vshrl.u32 %v11183_v24, %v1285_v18  ;;  %v1297_v9 = vshrl.u32 %v11169_v26, %v1285_v18  ;;  %v1300_v38 = vshrl.u32 %v11167_v35, %v1285_v18 }
 0x108   : > { %v1128_v43 = vsub.s32 0, %v8313_v56  ;;  %v1289_v27 = vor.u32 %v1288_v3, %v1287_v2  ;;  %v1292_v14 = vor.u32 %v1291_v28, %v1290_v54  ;;  %v1299_v61 = vshll.u32 %v11169_v26, %v1284_v25 }
 0x109   : > { %v1295_v11 = vor.u32 %v1294_v29, %v1293_v21  ;;  %v1298_v8 = vor.u32 %v1297_v9, %v1296_v33  ;;  %v8331_v23 = vshll.u32 %v1278_v50, 8  ;;  %v7087_v51 = vadd.s32 4294967169, %v962_v31 }
 0x10a   : > { %v7092_v37 = vmin.u32 %v1128_v43, %v8313_v56  ;;  %v1148_v1 = vsub.s32 4, %v8299_v49  ;;  %vm1302_vm10 = vcmp.lt.s32.totalorder %v8320_v5, 1  ;;  %v8337_v48 = vand.u32 8388607, %v958_v55 }
 0x10b   : > { %vm1681_vm12 = vcmp.eq.s32.totalorder %v8310_v41, 2  ;;  %vm2918_vm14 = vcmp.eq.s32.totalorder %v8304_v36, 2  ;;  %v1301_v52 = vor.u32 %v1300_v38, %v1299_v61  ;;  %vm1303_vm15 = vcmp.lt.s32.totalorder %v8320_v5, 2 }
 0x10c   : > { %v1130_v57 = vclz %v7092_v37  ;;  %vm1305_vm0 = vcmp.lt.s32.totalorder %v8320_v5, 4  ;;  %v1310_v42 = vsel %vm1302_vm10, %v1289_v27, %v1292_v14  ;;  %vm1678_vm2 = vcmp.eq.s32.totalorder %v8310_v41, 0 }
 0x10d   : > { %vm2915_vm3 = vcmp.eq.s32.totalorder %v8304_v36, 0  ;;  %vm1064_vm4 = vcmp.lt.s32.totalorder %v8084_v12, 0  ;;  %vm1304_vm5 = vcmp.lt.s32.totalorder %v8320_v5, 3  ;;  %v1311_v59 = vsel %vm1305_vm0, %v1298_v8, 920167782 }
 0x10e   : > { %v7093_v25 = vadd.s32 4294967294, %v1130_v57  ;;  %v1314_v39 = vsel %vm1302_vm10, %v1292_v14, %v1295_v11  ;;  %vm1677_vm6 = vcmp.lt.s32.totalorder %v8310_v41, 2  ;;  %vm2914_vm7 = vcmp.lt.s32.totalorder %v8304_v36, 2 }
 0x10f   : > { %v1307_v50 = vsel %vm1305_vm0, %v1295_v11, 2102212464  ;;  %v1312_v2 = vsel %vm1304_vm5, %v1295_v11, %v1311_v59  ;;  %v1315_v31 = vsel %vm1305_vm0, %v1301_v52, 1326507024  ;;  %v968_v3 = vadd.s32 1, %v7087_v51 }
 0x110   : > { %vm1674_vm8 = vweird.f32 %v7842_v10  ;;  %vm7094_vm11 = vcmp.lt.s32.totalorder %v7093_v25, 0  ;;  %v1286_v54 = vshrl.u32 %v11178_v16, %v1285_v18  ;;  %v1313_v28 = vsel %vm1303_vm15, %v1310_v42, %v1312_v2 }
 0x111   : > { %v1316_v43 = vsel %vm1304_vm5, %v1298_v8, %v1315_v31  ;;  %vm8363_vm13 = vcmp.le.f32.partialorder %v1062_v7, 0.7853982  ;;  %v1133_v29 = vsel %vm7094_vm11, 0, %v7093_v25  ;;  %v1308_v7 = vsel %vm1304_vm5, %v1292_v14, %v1307_v50 }
 0x112   : > { %v1317_v33 = vsel %vm1303_vm15, %v1314_v39, %v1316_v43  ;;  %v8370_v9 = vmul.u32.u64.low %v8331_v23, %v1313_v28  ;;  %v8371_v37 = vmul.u32.u64.high %v8331_v23, %v1313_v28, %v8370_v9  ;;  %v1134_v18 = vsub.s32 32, %v1133_v29 }
 0x113   : > { %v1138_v11 = vsub.s32 4294967266, %v1133_v29  ;;  %v1306_v38 = vsel %vm1302_vm10, %v1286_v54, %v1289_v27  ;;  %v7558_v8 = vpop.eup %7557  ;;  %v1135_v61 = vshll.u32 %v8313_v56, %v1133_v29  ;;  %vm969_vm0 = vcmp.gt.s32.totalorder %v968_v3, 0 }
 0x114   : > { %v8380_v51 = vmul.u32.u64.low %v8331_v23, %v1317_v33  ;;  %v8381_v57 = vmul.u32.u64.high %v8331_v23, %v1317_v33, %v8380_v51  ;;  %v7560_v52 = vpop.eup %7559  ;;  %v1682_v42 = vxor.u32 2147483648, %v7558_v8  ;;  %v1136_v25 = vshrl.u32 %v1118_v6, %v1134_v18 }
 0x115   : > { %v1139_v59 = vadd.s32 127, %v1138_v11  ;;  %v970_v39 = vsel %vm969_vm0, %v968_v3, 0  ;;  %v1679_v2 = vxor.u32 2147483648, %v7560_v52  ;;  %v1309_v27 = vsel %vm1303_vm15, %v1306_v38, %v1308_v7 }
 0x116   : > { %v1328_v31 = vadd.s32 1, %v8371_v37  ;;  %v972_v14 = vand.u32 31, %v970_v39  ;;  %v1683_v56 = vsel %vm1681_vm12, %v1682_v42, %v7560_v52  ;;  %v2920_v50 = vsel %vm2918_vm14, %v1682_v42, %v7560_v52 }
 0x117   : > { %v1137_v54 = vor.u32 %v1136_v25, %v1135_v61  ;;  %v1140_v28 = vshll.u32 %v1139_v59, 23  ;;  %v1680_v6 = vsel %vm1678_vm2, %v7558_v8, %v1679_v2  ;;  %v2917_v3 = vsel %vm2915_vm3, %v7558_v8, %v1679_v2 }
 0x118   : > { %v1149_v5 = vsel %vm1064_vm4, %v1148_v1, %v8299_v49  ;;  %vm1327_vm10 = vc.u32 %v8381_v57, %v8370_v9  ;;  %v1684_v43 = vsel %vm1677_vm6, %v1680_v6, %v1683_v56  ;;  %v2921_v29 = vsel %vm2914_vm7, %v2917_v3, %v2920_v50 }
 0x119   : > { %v1141_v33 = vor.u32 4788187, %v1140_v28  ;;  %v1325_v18 = vmul.u32 %v8331_v23, %v1309_v27  ;;  %v1685_v11 = vsel %vm1674_vm8, nan, %v1684_v43  ;;  %v8408_v38 = vsel %vm1674_vm8, nan, %v2921_v29 }
 0x11a   : > { %11211 = vst [vmem:[#allocation4_spill] sm:$0xff] %v8408_v38  ;;  %v1329_v49 = vsel %vm1327_vm10, %v1328_v31, %v8371_v37  ;;  %v973_v1 = vsub.s32 32, %v972_v14  ;;  %3295 = vmatpush1.msra.mxu1 %v1685_v11  ;;  %v1144_v41 = vcvt.s32.f32 %v1137_v54  ;;  %v8413_v36 = vsel %vm8363_vm13, 0, %v1149_v5 }
 0x11b   : > { %v1142_v7 = vand.u32 2147483647, %v1141_v33  ;;  %v1330_v8 = vadd.s32 %v1329_v49, %v1325_v18  ;;  %v8415_v61 = vshrl.u32 %v970_v39, 5  ;;  %v975_v23 = vshll.u32 %v11178_v16, %v972_v14  ;;  %v8432_v18 = vld [vmem:[%s7794_s29 + $0x8] sm:$0x77] }
 0x11c   : > { %v976_v51 = vshrl.u32 %v11187_v20, %v973_v1  ;;  %v979_v10 = vshrl.u32 %v11181_v22, %v973_v1  ;;  %v978_v37 = vshll.u32 %v11187_v20, %v972_v14  ;;  %v982_v25 = vshrl.u32 %v11183_v24, %v973_v1 }
 0x11d   : > { %v1145_v52 = vmul.f32 %v1144_v41, %v1142_v7  ;;  %v1331_v42 = vadd.s32 536870912, %v1330_v8  ;;  %v981_v2 = vshll.u32 %v11181_v22, %v972_v14  ;;  %v984_v27 = vshll.u32 %v11183_v24, %v972_v14 }
 0x11e   : > { %v977_v59 = vor.u32 %v976_v51, %v975_v23  ;;  %v985_v39 = vshrl.u32 %v11169_v26, %v973_v1  ;;  %v980_v50 = vor.u32 %v979_v10, %v978_v37  ;;  %v988_v54 = vshrl.u32 %v11167_v35, %v973_v1 }
 0x11f   : > { %v1146_v31 = vxor.u32 2147483648, %v1145_v52  ;;  %v1332_v56 = vshrl.u32 %v1331_v42, 30  ;;  %v966_v28 = vor.u32 8388608, %v8337_v48  ;;  %v983_v6 = vor.u32 %v982_v25, %v981_v2 }
 0x120   : > { %v986_v3 = vor.u32 %v985_v39, %v984_v27  ;;  %v987_v5 = vshll.u32 %v11169_v26, %v972_v14  ;;  %v1155_v29 = vadd.s32 3, %v8413_v36  ;;  %v473_v11 = vrot.slane %v8432_v18, %v7932_v15 }
 0x121   : > { %v1147_v43 = vsel %vm1064_vm4, %v1146_v31, %v1145_v52  ;;  %v1333_v33 = vshll.u32 %v1332_v56, 30  ;;  %v974_v48 = vshrl.u32 %v11178_v16, %v973_v1  ;;  %vm990_vm12 = vcmp.lt.s32.totalorder %v8415_v61, 1 }
 0x122   : > { %v1150_v49 = vsel %vm8363_vm13, %v8084_v12, %v1147_v43  ;;  %v989_v7 = vor.u32 %v988_v54, %v987_v5  ;;  %vm993_vm14 = vcmp.lt.s32.totalorder %v8415_v61, 4  ;;  %v998_v41 = vsel %vm990_vm12, %v977_v59, %v980_v50 }
 0x123   : > { %7561 = vcosq.f32 %v1150_v49  ;;  %v8441_v14 = vsub.s32 %v1330_v8, %v1333_v33  ;;  %vm992_vm15 = vcmp.lt.s32.totalorder %v8415_v61, 3  ;;  %v995_v23 = vsel %vm993_vm14, %v983_v6, 2102212464 }
 0x124   : > { %7563 = vsinq.f32 %v1150_v49  ;;  %v999_v51 = vsel %vm993_vm14, %v986_v3, 920167782  ;;  %vm991_vm2 = vcmp.lt.s32.totalorder %v8415_v61, 2  ;;  %v1006_v1 = vshll.u32 %v966_v28, 8 }
 0x125   : > { %v1336_v10 = vsub.s32 0, %v8441_v14  ;;  %v1000_v21 = vsel %vm992_vm15, %v983_v6, %v999_v51  ;;  %v994_v52 = vsel %vm990_vm12, %v974_v48, %v977_v59  ;;  %v1002_v8 = vsel %vm990_vm12, %v980_v50, %v983_v6 }
 0x126   : > { %v1001_v42 = vsel %vm991_vm2, %v998_v41, %v1000_v21  ;;  %v1003_v37 = vsel %vm993_vm14, %v989_v7, 1326507024  ;;  %v996_v2 = vsel %vm992_vm15, %v980_v50, %v995_v23  ;;  %v493_v39 = vrot.slane %v473_v11, %v7932_v15  ;;  %v8479_v41 = vld [vmem:[%s7794_s29] sm:$0x77] }
 0x127   : > { %v7100_v25 = vmin.u32 %v1336_v10, %v8441_v14  ;;  %v1004_v27 = vsel %vm992_vm15, %v986_v3, %v1003_v37  ;;  %v8453_v54 = vmul.u32.u64.low %v1006_v1, %v1001_v42  ;;  %v8454_v5 = vmul.u32.u64.high %v1006_v1, %v1001_v42, %v8453_v54 }
 0x128   : > { %v1005_v31 = vsel %vm991_vm2, %v1002_v8, %v1004_v27  ;;  %v423_v59 = vsub.s32 4, %v7785_v30  ;;  %v1156_v28 = vand.u32 3, %v1155_v29  ;;  %v1356_v6 = vsub.s32 4, %v1332_v56 }
 0x129   : > { %v1338_v43 = vclz %v7100_v25  ;;  %v8458_v33 = vmul.u32.u64.low %v1006_v1, %v1005_v31  ;;  %v8459_v49 = vmul.u32.u64.high %v1006_v1, %v1005_v31, %v8458_v33  ;;  %v8462_v50 = vmul.f32 %v493_v39, %v7816_v45 }
 0x12a   : > { %vm8466_vm3 = vcmp.le.f32.partialorder %v1270_v60, 0.7853982  ;;  %vm1272_vm4 = vcmp.lt.s32.totalorder %v8202_v17, 0  ;;  %v997_v29 = vsel %vm991_vm2, %v994_v52, %v996_v2  ;;  %v1016_v11 = vadd.s32 1, %v8454_v5 }
 0x12b   : > { %v7101_v3 = vadd.s32 4294967294, %v1338_v43  ;;  %v1169_v48 = vand.u32 2139095040, %v8462_v50  ;;  %v8476_v7 = vsub.s32 0, %v7785_v30  ;;  %v424_v60 = vrot.slane %v8479_v41, %v423_v59 }
 0x12c   : > { %vm1154_vm5 = vweird.f32 %v8084_v12  ;;  %vm1157_vm6 = vcmp.lt.s32.totalorder %v1156_v28, 2  ;;  %vm1161_vm7 = vcmp.eq.s32.totalorder %v1156_v28, 2  ;;  %v1357_v61 = vsel %vm1272_vm4, %v1356_v6, %v1332_v56  ;;  %v4274_v12 = vld [vmem:[%s11152_s6 + $0x68] sm:$0xff] }
 0x12d   : > { %vm7102_vm8 = vcmp.lt.s32.totalorder %v7101_v3, 0  ;;  %v1013_v51 = vmul.u32 %v1006_v1, %v997_v29  ;;  %vm1015_vm11 = vc.u32 %v8459_v49, %v8453_v54  ;;  %v1166_v10 = vand.u32 2147483647, %v8462_v50 }
 0x12e   : > { %v1341_v23 = vsel %vm7102_vm8, 0, %v7101_v3  ;;  %v1326_v21 = vadd.s32 %v8370_v9, %v8381_v57  ;;  %v1017_v8 = vsel %vm1015_vm11, %v1016_v11, %v8454_v5  ;;  %v8495_v25 = vsel %vm8466_vm3, 0, %v1357_v61 }
 0x12f   : > { %v1342_v52 = vsub.s32 32, %v1341_v23  ;;  %v1346_v42 = vsub.s32 4294967266, %v1341_v23  ;;  %11214 = vst [vmem:[#allocation5_spill] sm:$0xff] %v8495_v25  ;;  %v1018_v56 = vadd.s32 %v1017_v8, %v1013_v51  ;;  %v1170_v1 = vshrl.u32 %v1169_v48, 23 }
 0x130   : > { %v8491_v37 = vpop.eup %7561  ;;  %v444_v2 = vrot.slane %v424_v60, %v8476_v7  ;;  %v1343_v9 = vshll.u32 %v8441_v14, %v1341_v23  ;;  %v1173_v33 = vand.u32 8388607, %v1166_v10  ;;  %vm1158_vm13 = vcmp.eq.s32.totalorder %v1156_v28, 0 }
 0x131   : > { %v8498_v27 = vpop.eup %7563  ;;  %v11158_v39 = vxor.u32 2147483648, %v8491_v37  ;;  %v1344_v57 = vshrl.u32 %v1326_v21, %v1342_v52  ;;  %v1347_v31 = vadd.s32 127, %v1346_v42  ;;  %v1019_v43 = vadd.s32 536870912, %v1018_v56 }
 0x132   : > { %v11159_v5 = vxor.u32 2147483648, %v8498_v27  ;;  %v7095_v6 = vadd.s32 4294967169, %v1170_v1  ;;  %v1363_v48 = vadd.s32 3, %v8495_v25  ;;  %v8515_v21 = vmul.f32 %v7816_v45, %v444_v2 }
 0x133   : > { %v1163_v3 = vsel %vm1161_vm7, %v11158_v39, %v8498_v27  ;;  %v1345_v29 = vor.u32 %v1344_v57, %v1343_v9  ;;  %v1348_v11 = vshll.u32 %v1347_v31, 23  ;;  %v1020_v60 = vshrl.u32 %v1019_v43, 30 }
 0x134   : > { %v1160_v14 = vsel %vm1158_vm13, %v8491_v37, %v11159_v5  ;;  %v1176_v61 = vadd.s32 1, %v7095_v6  ;;  %v8518_v52 = vrot.slane %v8432_v18, %v423_v59  ;;  %v1174_v1 = vor.u32 8388608, %v1173_v33 }
 0x135   : > { %v1164_v23 = vsel %vm1157_vm6, %v1160_v14, %v1163_v3  ;;  %v1349_v51 = vor.u32 4788187, %v1348_v11  ;;  %v1021_v8 = vshll.u32 %v1020_v60, 30  ;;  %v1352_v57 = vcvt.s32.f32 %v1345_v29 }
 0x136   : > { %v1165_v42 = vsel %vm1154_vm5, nan, %v1164_v23  ;;  %vm1177_vm0 = vcmp.gt.s32.totalorder %v1176_v61, 0  ;;  %v1044_v31 = vsub.s32 4, %v1020_v60  ;;  %v8524_v2 = vand.u32 3, %v1363_v48 }
 0x137   : > { %3135 = vmatprep.subr.mxu0 %v1165_v42  ;;  %v1350_v9 = vand.u32 2147483647, %v1349_v51  ;;  %v1178_v43 = vsel %vm1177_vm0, %v1176_v61, 0  ;;  %v8522_v28 = vsub.s32 %v1018_v56, %v1021_v8  ;;  %vm960_vm10 = vcmp.lt.s32.totalorder %v8209_v53, 0 }
 0x138   : > { %v1180_v6 = vand.u32 31, %v1178_v43  ;;  %v1014_v59 = vadd.s32 %v8453_v54, %v8459_v49  ;;  %v452_v14 = vrot.slane %v8518_v52, %v8476_v7  ;;  %v8534_v56 = vsel %vm960_vm10, %v1044_v31, %v1020_v60 }
 0x139   : > { %v1353_v3 = vmul.f32 %v1352_v57, %v1350_v9  ;;  %v1024_v11 = vsub.s32 0, %v8522_v28  ;;  %v8536_v61 = vshll.u32 %v1174_v1, 8  ;;  %v649_v48 = vand.u32 2139095040, %v8515_v21 }
 0x13a   : > { %v1181_v33 = vsub.s32 32, %v1180_v6  ;;  %v8540_v51 = vshrl.u32 %v1178_v43, 5  ;;  %v1183_v54 = vshll.u32 %v11178_v16, %v1180_v6  ;;  %v1186_v31 = vshll.u32 %v11187_v20, %v1180_v6 }
 0x13b   : > { %v1354_v29 = vxor.u32 2147483648, %v1353_v3  ;;  %v7088_v23 = vmin.u32 %v1024_v11, %v8522_v28  ;;  %v1189_v43 = vshll.u32 %v11181_v22, %v1180_v6  ;;  %v1192_v39 = vshll.u32 %v11183_v24, %v1180_v6 }
 0x13c   : > { %v1184_v49 = vshrl.u32 %v11187_v20, %v1181_v33  ;;  %v1187_v8 = vshrl.u32 %v11181_v22, %v1181_v33  ;;  %v1190_v60 = vshrl.u32 %v11183_v24, %v1181_v33  ;;  %v1193_v1 = vshrl.u32 %v11169_v26, %v1181_v33 }
 0x13d   : > { %v1355_v42 = vsel %vm1272_vm4, %v1354_v29, %v1353_v3  ;;  %v1026_v57 = vclz %v7088_v23  ;;  %v650_v3 = vshrl.u32 %v649_v48, 23  ;;  %v1182_v34 = vshrl.u32 %v11178_v16, %v1181_v33 }
 0x13e   : > { %v1358_v9 = vsel %vm8466_vm3, %v8202_v17, %v1355_v42  ;;  %v1185_v11 = vor.u32 %v1184_v49, %v1183_v54  ;;  %v1188_v5 = vor.u32 %v1187_v8, %v1186_v31  ;;  %v1191_v19 = vor.u32 %v1190_v60, %v1189_v43 }
 0x13f   : > { %7565 = vcosq.f32 %v1358_v9  ;;  %v7089_v29 = vadd.s32 4294967294, %v1026_v57  ;;  %v1194_v58 = vor.u32 %v1193_v1, %v1192_v39  ;;  %v1195_v15 = vshll.u32 %v11169_v26, %v1180_v6 }
 0x140   : > { %7567 = vsinq.f32 %v1358_v9  ;;  %v1196_v23 = vshrl.u32 %v11167_v35, %v1181_v33  ;;  %vm8560_vm12 = vcmp.le.f32.partialorder %v958_v55, 0.7853982  ;;  %vm1198_vm15 = vcmp.lt.s32.totalorder %v8540_v51, 1 }
 0x141   : > { %vm7090_vm14 = vcmp.lt.s32.totalorder %v7089_v29, 0  ;;  %vm1199_vm2 = vcmp.lt.s32.totalorder %v8540_v51, 2  ;;  %vm1200_vm3 = vcmp.lt.s32.totalorder %v8540_v51, 3  ;;  %vm1201_vm4 = vcmp.lt.s32.totalorder %v8540_v51, 4 }
 0x142   : > { %v1029_v48 = vsel %vm7090_vm14, 0, %v7089_v29  ;;  %v1197_v54 = vor.u32 %v1196_v23, %v1195_v15  ;;  %v1202_v39 = vsel %vm1198_vm15, %v1182_v34, %v1185_v11  ;;  %v1203_v49 = vsel %vm1201_vm4, %v1191_v19, 2102212464 }
 0x143   : > { %v1030_v6 = vsub.s32 32, %v1029_v48  ;;  %v1034_v33 = vsub.s32 4294967266, %v1029_v48  ;;  %v1206_v8 = vsel %vm1198_vm15, %v1185_v11, %v1188_v5  ;;  %v1031_v55 = vshll.u32 %v8522_v28, %v1029_v48 }
 0x144   : > { %v1207_v60 = vsel %vm1201_vm4, %v1194_v58, 920167782  ;;  %v1210_v1 = vsel %vm1198_vm15, %v1188_v5, %v1191_v19  ;;  %v1211_v9 = vsel %vm1201_vm4, %v1197_v54, 1326507024  ;;  %v1204_v34 = vsel %vm1200_vm3, %v1188_v5, %v1203_v49 }
 0x145   : > { %v1032_v57 = vshrl.u32 %v1014_v59, %v1030_v6  ;;  %v1035_v31 = vadd.s32 127, %v1034_v33  ;;  %v1208_v43 = vsel %vm1200_vm3, %v1191_v19, %v1207_v60  ;;  %v1212_v29 = vsel %vm1200_vm3, %v1194_v58, %v1211_v9 }
 0x146   : > { %v1209_v15 = vsel %vm1199_vm2, %v1206_v8, %v1208_v43  ;;  %v1213_v28 = vsel %vm1199_vm2, %v1210_v1, %v1212_v29  ;;  %v7075_v11 = vadd.s32 4294967169, %v650_v3  ;;  %vm11197_vm6 = vweird.f32 %v8202_v17 }
 0x147   : > { %v1033_v23 = vor.u32 %v1032_v57, %v1031_v55  ;;  %v1036_v48 = vshll.u32 %v1035_v31, 23  ;;  %v8580_v59 = vmul.u32.u64.low %v8536_v61, %v1213_v28  ;;  %v8581_v54 = vmul.u32.u64.high %v8536_v61, %v1213_v28, %v8580_v59 }
 0x148   : > { %v8585_v58 = vmul.u32.u64.low %v8536_v61, %v1209_v15  ;;  %v8586_v19 = vmul.u32.u64.high %v8536_v61, %v1209_v15, %v8585_v58  ;;  %v11166_v5 = vand.u32 2147483647, %v8515_v21  ;;  %v656_v6 = vadd.s32 1, %v7075_v11 }
 0x149   : > { %vm1365_vm7 = vcmp.lt.s32.totalorder %v8524_v2, 2  ;;  %vm1366_vm8 = vcmp.eq.s32.totalorder %v8524_v2, 0  ;;  %vm1369_vm11 = vcmp.eq.s32.totalorder %v8524_v2, 2  ;;  %v1037_v3 = vor.u32 4788187, %v1036_v48 }
 0x14a   : > { %v8596_v33 = vsel %vm8560_vm12, 0, %v8534_v56  ;;  %v1205_v49 = vsel %vm1199_vm2, %v1202_v39, %v1204_v34  ;;  %vm657_vm13 = vcmp.gt.s32.totalorder %v656_v6, 0  ;;  %v8604_v8 = vmul.f32 %v7816_v45, %v452_v14 }
 0x14b   : > { %v1038_v60 = vand.u32 2147483647, %v1037_v3  ;;  %v1040_v1 = vcvt.s32.f32 %v1033_v23  ;;  %vm1223_vm0 = vc.u32 %v8581_v54, %v8585_v58  ;;  %v658_v9 = vsel %vm657_vm13, %v656_v6, 0 }
 0x14c   : > { %v8606_v55 = vpop.eup %7565  ;;  %v1224_v39 = vadd.s32 1, %v8586_v19  ;;  %v653_v52 = vand.u32 8388607, %v11166_v5  ;;  %v660_v57 = vand.u32 31, %v658_v9  ;;  %v1051_v43 = vadd.s32 3, %v8596_v33 }
 0x14d   : > { %11217 = vst [vmem:[#allocation6_spill] sm:$0xff] %v8606_v55  ;;  %v8610_v56 = vpop.eup %7567  ;;  %v11163_v51 = vxor.u32 2147483648, %v8606_v55  ;;  %v1041_v31 = vmul.f32 %v1040_v1, %v1038_v60  ;;  %v1221_v29 = vmul.u32 %v8536_v61, %v1205_v49  ;;  %v857_v11 = vand.u32 2139095040, %v8604_v8 }
 0x14e   : > { %11218 = vst [vmem:[#allocation7_spill] sm:$0xff] %v8610_v56  ;;  %v11164_v14 = vxor.u32 2147483648, %v8610_v56  ;;  %v1225_v15 = vsel %vm1223_vm0, %v1224_v39, %v8586_v19  ;;  %v661_v28 = vsub.s32 32, %v660_v57  ;;  %v8631_v61 = vshrl.u32 %v658_v9, 5 }
 0x14f   : > { %v1371_v34 = vsel %vm1369_vm11, %v11163_v51, %v8610_v56  ;;  %v1042_v48 = vxor.u32 2147483648, %v1041_v31  ;;  %v1226_v59 = vadd.s32 %v1225_v15, %v1221_v29  ;;  %v663_v3 = vshll.u32 %v11178_v16, %v660_v57 }
 0x150   : > { %v1368_v23 = vsel %vm1366_vm8, %v8606_v55, %v11164_v14  ;;  %v664_v19 = vshrl.u32 %v11187_v20, %v661_v28  ;;  %v667_v49 = vshrl.u32 %v11181_v22, %v661_v28  ;;  %v666_v29 = vshll.u32 %v11187_v20, %v660_v57 }
 0x151   : > { %v1372_v6 = vsel %vm1365_vm7, %v1368_v23, %v1371_v34  ;;  %v1043_v1 = vsel %vm960_vm10, %v1042_v48, %v1041_v31  ;;  %v1227_v39 = vadd.s32 536870912, %v1226_v59  ;;  %v669_v34 = vshll.u32 %v11181_v22, %v660_v57 }
 0x152   : > { %v1373_v60 = vsel %vm11197_vm6, nan, %v1372_v6  ;;  %v1046_v2 = vsel %vm8560_vm12, %v8209_v53, %v1043_v1  ;;  %v665_v9 = vor.u32 %v664_v19, %v663_v3  ;;  %v670_v15 = vshrl.u32 %v11183_v24, %v661_v28 }
 0x153   : > { %3296 = vmatprep.subr.mxu1 %v1373_v60  ;;  %7569 = vcosq.f32 %v1046_v2  ;;  %v1228_v23 = vshrl.u32 %v1227_v39, 30  ;;  %v672_v6 = vshll.u32 %v11183_v24, %v660_v57  ;;  %v673_v51 = vshrl.u32 %v11169_v26, %v661_v28 }
 0x154   : > { %7571 = vsinq.f32 %v1046_v2  ;;  %v668_v31 = vor.u32 %v667_v49, %v666_v29  ;;  %v675_v48 = vshll.u32 %v11169_v26, %v660_v57  ;;  %v676_v60 = vshrl.u32 %v11167_v35, %v661_v28 }
 0x155   : > { %v1229_v14 = vshll.u32 %v1228_v23, 30  ;;  %v671_v42 = vor.u32 %v670_v15, %v669_v34  ;;  %v674_v1 = vor.u32 %v673_v51, %v672_v6  ;;  %v8652_v3 = vand.u32 3, %v1051_v43 }
 0x156   : > { %v654_v19 = vor.u32 8388608, %v653_v52  ;;  %v677_v62 = vor.u32 %v676_v60, %v675_v48  ;;  %v420_v39 = vrot.slane %v8479_v41, %v8476_v7  ;;  %vm678_vm10 = vcmp.lt.s32.totalorder %v8631_v61, 1 }
 0x157   : > { %v8656_v5 = vsub.s32 %v1226_v59, %v1229_v14  ;;  %vm681_vm12 = vcmp.lt.s32.totalorder %v8631_v61, 4  ;;  %v858_v49 = vshrl.u32 %v857_v11, 23  ;;  %v662_v57 = vshrl.u32 %v11178_v16, %v661_v28 }
 0x158   : > { %vm680_vm14 = vcmp.lt.s32.totalorder %v8631_v61, 3  ;;  %v686_v51 = vsel %vm678_vm10, %v665_v9, %v668_v31  ;;  %v687_v43 = vsel %vm681_vm12, %v674_v1, 920167782  ;;  %vm679_vm15 = vcmp.lt.s32.totalorder %v8631_v61, 2 }
 0x159   : > { %v1232_v52 = vsub.s32 0, %v8656_v5  ;;  %v683_v29 = vsel %vm681_vm12, %v671_v42, 2102212464  ;;  %v688_v14 = vsel %vm680_vm14, %v671_v42, %v687_v43  ;;  %v690_v11 = vsel %vm678_vm10, %v668_v31, %v671_v42 }
 0x15a   : > { %v689_v59 = vsel %vm679_vm15, %v686_v51, %v688_v14  ;;  %v691_v2 = vsel %vm681_vm12, %v677_v62, 1326507024  ;;  %v694_v28 = vshll.u32 %v654_v19, 8  ;;  %v682_v15 = vsel %vm678_vm10, %v662_v57, %v665_v9 }
 0x15b   : > { %v7096_v34 = vmin.u32 %v1232_v52, %v8656_v5  ;;  %v692_v6 = vsel %vm680_vm14, %v674_v1, %v691_v2  ;;  %v7083_v48 = vadd.s32 4294967169, %v858_v49  ;;  %v684_v60 = vsel %vm680_vm14, %v668_v31, %v683_v29 }
 0x15c   : > { %v693_v35 = vsel %vm679_vm15, %v690_v11, %v692_v6  ;;  %v8675_v43 = vmul.u32.u64.low %v694_v28, %v689_v59  ;;  %v8676_v26 = vmul.u32.u64.high %v694_v28, %v689_v59, %v8675_v43  ;;  %vm1050_vm2 = vweird.f32 %v8209_v53  ;;  %v3028_v53 = vld [vmem:[%s11149_s3 + $0x10] sm:$0xff] }
 0x15d   : > { %vm1053_vm3 = vcmp.lt.s32.totalorder %v8652_v3, 2  ;;  %vm1168_vm4 = vcmp.lt.s32.totalorder %v8462_v50, 0  ;;  %v1234_v62 = vclz %v7096_v34  ;;  %v1252_v42 = vsub.s32 4, %v1228_v23 }
 0x15e   : > { %vm1054_vm7 = vcmp.eq.s32.totalorder %v8652_v3, 0  ;;  %v8683_v9 = vmul.u32.u64.low %v694_v28, %v693_v35  ;;  %v8684_v1 = vmul.u32.u64.high %v694_v28, %v693_v35, %v8683_v9  ;;  %v864_v31 = vadd.s32 1, %v7083_v48 }
 0x15f   : > { %v7097_v19 = vadd.s32 4294967294, %v1234_v62  ;;  %v685_v49 = vsel %vm679_vm15, %v682_v15, %v684_v60  ;;  %v11175_v57 = vand.u32 2147483647, %v8604_v8  ;;  %vm1057_vm8 = vcmp.eq.s32.totalorder %v8652_v3, 2 }
 0x160   : > { %v8689_v51 = vpop.eup %7569  ;;  %v1222_v52 = vadd.s32 %v8585_v58, %v8581_v54  ;;  %v704_v29 = vadd.s32 1, %v8676_v26  ;;  %vm865_vm11 = vcmp.gt.s32.totalorder %v864_v31, 0  ;;  %v11173_v14 = vmov 0.0  }
 0x161   : > { %3171 = vmatprep.mubr.f32.mxu0 %v11173_v14  ;;  %3332 = vmatprep.mubr.f32.mxu1 %v11173_v14  ;;  %v8697_v35 = vpop.eup %7571  ;;  %v11171_v61 = vxor.u32 2147483648, %v8689_v51  ;;  %vm7098_vm13 = vcmp.lt.s32.totalorder %v7097_v19, 0  ;;  %v1253_v59 = vsel %vm1168_vm4, %v1252_v42, %v1228_v23  ;;  %v866_v11 = vsel %vm865_vm11, %v864_v31, 0 }
 0x162   : > { %v11172_v2 = vxor.u32 2147483648, %v8697_v35  ;;  %v1237_v54 = vsel %vm7098_vm13, 0, %v7097_v19  ;;  %v701_v58 = vmul.u32 %v694_v28, %v685_v49  ;;  %vm703_vm0 = vc.u32 %v8684_v1, %v8675_v43 }
 0x163   : > { %v1059_v34 = vsel %vm1057_vm8, %v11171_v61, %v8697_v35  ;;  %v1238_v15 = vsub.s32 32, %v1237_v54  ;;  %v1242_v6 = vsub.s32 4294967266, %v1237_v54  ;;  %v861_v48 = vand.u32 8388607, %v11175_v57 }
 0x164   : > { %v1056_v23 = vsel %vm1054_vm7, %v8689_v51, %v11172_v2  ;;  %v1239_v28 = vshll.u32 %v8656_v5, %v1237_v54  ;;  %v705_v60 = vsel %vm703_vm0, %v704_v29, %v8676_v26  ;;  %v868_v62 = vand.u32 31, %v866_v11 }
 0x165   : > { %v1060_v42 = vsel %vm1053_vm3, %v1056_v23, %v1059_v34  ;;  %v1240_v9 = vshrl.u32 %v1222_v52, %v1238_v15  ;;  %v1243_v31 = vadd.s32 127, %v1242_v6  ;;  %v706_v19 = vadd.s32 %v705_v60, %v701_v58 }
 0x166   : > { %v1061_v49 = vsel %vm1050_vm2, nan, %v1060_v42  ;;  %vm8725_vm10 = vcmp.le.f32.partialorder %v1166_v10, 0.7853982  ;;  %v869_v2 = vsub.s32 32, %v868_v62  ;;  %v862_v54 = vor.u32 8388608, %v861_v48 }
 0x167   : > { %3136 = vmatpush1.msra.mxu0 %v1061_v49  ;;  %v1241_v5 = vor.u32 %v1240_v9, %v1239_v28  ;;  %v1244_v3 = vshll.u32 %v1243_v31, 23  ;;  %v8733_v52 = vsel %vm8725_vm10, 0, %v1253_v59  ;;  %v707_v29 = vadd.s32 536870912, %v706_v19 }
 0x168   : > { %v867_v58 = vshrl.u32 %v866_v11, 5  ;;  %v878_v34 = vshrl.u32 %v11183_v24, %v869_v2  ;;  %v440_v10 = vrot.slane %v420_v39, %v8476_v7  ;;  %v872_v23 = vshrl.u32 %v11187_v20, %v869_v2 }
 0x169   : > { %v1245_v15 = vor.u32 4788187, %v1244_v3  ;;  %v708_v6 = vshrl.u32 %v707_v29, 30  ;;  %v875_v28 = vshrl.u32 %v11181_v22, %v869_v2  ;;  %v871_v60 = vshll.u32 %v11178_v16, %v868_v62 }
 0x16a   : > { %v877_v59 = vshll.u32 %v11181_v22, %v868_v62  ;;  %v880_v48 = vshll.u32 %v11183_v24, %v868_v62  ;;  %v11221_v11 = vmov 920167782   ;;  %v1248_v31 = vcvt.s32.f32 %v1241_v5 }
 0x16b   : > { %v881_v42 = vshrl.u32 %v11221_v11, %v869_v2  ;;  %v1246_v9 = vand.u32 2147483647, %v1245_v15  ;;  %v709_v49 = vshll.u32 %v708_v6, 30  ;;  %v874_v41 = vshll.u32 %v11187_v20, %v868_v62 }
 0x16c   : > { %v879_v39 = vor.u32 %v878_v34, %v877_v59  ;;  %v883_v29 = vshll.u32 %v11221_v11, %v868_v62  ;;  %v11222_v14 = vmov 1326507024   ;;  %v873_v16 = vor.u32 %v872_v23, %v871_v60 }
 0x16d   : > { %v882_v3 = vor.u32 %v881_v42, %v880_v48  ;;  %v884_v57 = vshrl.u32 %v11222_v14, %v869_v2  ;;  %v1249_v26 = vmul.f32 %v1248_v31, %v1246_v9  ;;  %v710_v30 = vsub.s32 %v706_v19, %v709_v49 }
 0x16e   : > { %v876_v17 = vor.u32 %v875_v28, %v874_v41  ;;  %v1259_v22 = vadd.s32 3, %v8733_v52  ;;  %v902_v38 = vshll.u32 %v862_v54, 8  ;;  %v8751_v15 = vmul.f32 %v7816_v45, %v440_v10 }
 0x16f   : > { %v885_v24 = vor.u32 %v884_v57, %v883_v29  ;;  %v1250_v5 = vxor.u32 2147483648, %v1249_v26  ;;  %v712_v55 = vsub.s32 0, %v710_v30  ;;  %v11223_v20 = vmov 683565275  }
 0x170   : > { %v870_v34 = vshrl.u32 %v11223_v20, %v869_v2  ;;  %vm889_vm12 = vcmp.lt.s32.totalorder %v867_v58, 4  ;;  %vm886_vm14 = vcmp.lt.s32.totalorder %v867_v58, 1  ;;  %vm887_vm15 = vcmp.lt.s32.totalorder %v867_v58, 2 }
 0x171   : > { %v891_v62 = vsel %vm889_vm12, %v879_v39, 2102212464  ;;  %v895_v59 = vsel %vm889_vm12, %v882_v3, 920167782  ;;  %v1251_v19 = vsel %vm1168_vm4, %v1250_v5, %v1249_v26  ;;  %v7076_v23 = vmin.u32 %v712_v55, %v710_v30 }
 0x172   : > { %vm888_vm3 = vcmp.lt.s32.totalorder %v867_v58, 3  ;;  %v894_v28 = vsel %vm886_vm14, %v873_v16, %v876_v17  ;;  %v1254_v57 = vsel %vm8725_vm10, %v8462_v50, %v1251_v19  ;;  %v898_v10 = vsel %vm886_vm14, %v876_v17, %v879_v39 }
 0x173   : > { %v896_v54 = vsel %vm888_vm3, %v879_v39, %v895_v59  ;;  %v899_v60 = vsel %vm889_vm12, %v885_v24, 1326507024  ;;  %7573 = vcosq.f32 %v1254_v57  ;;  %v714_v2 = vclz %v7076_v23 }
 0x174   : > { %v890_v48 = vsel %vm886_vm14, %v870_v34, %v873_v16  ;;  %v892_v42 = vsel %vm888_vm3, %v876_v17, %v891_v62  ;;  %7575 = vsinq.f32 %v1254_v57  ;;  %v732_v9 = vsub.s32 4, %v708_v6 }
 0x175   : > { %v897_v31 = vsel %vm887_vm15, %v894_v28, %v896_v54  ;;  %v900_v49 = vsel %vm888_vm3, %v882_v3, %v899_v60  ;;  %v7077_v26 = vadd.s32 4294967294, %v714_v2  ;;  %v893_v61 = vsel %vm887_vm15, %v890_v48, %v892_v42 }
 0x176   : > { %v901_v55 = vsel %vm887_vm15, %v898_v10, %v900_v49  ;;  %v8761_v41 = vmul.u32.u64.low %v902_v38, %v897_v31  ;;  %v8762_v29 = vmul.u32.u64.high %v902_v38, %v897_v31, %v8761_v41  ;;  %v11224_v16 = vrot.slane %v8432_v18, %v8476_v7 }
 0x177   : > { %v8765_v5 = vmul.u32.u64.low %v902_v38, %v901_v55  ;;  %v8766_v39 = vmul.u32.u64.high %v902_v38, %v901_v55, %v8765_v5  ;;  %vm648_vm4 = vcmp.lt.s32.totalorder %v8515_v21, 0  ;;  %vm7078_vm7 = vcmp.lt.s32.totalorder %v7077_v26, 0 }
 0x178   : > { %v448_v24 = vrot.slane %v11224_v16, %v8476_v7  ;;  %v545_v17 = vand.u32 2139095040, %v8751_v15  ;;  %v1260_v3 = vand.u32 3, %v1259_v22  ;;  %v702_v34 = vadd.s32 %v8675_v43, %v8684_v1 }
 0x179   : > { %v717_v62 = vsel %vm7078_vm7, 0, %v7077_v26  ;;  %v733_v58 = vsel %vm648_vm4, %v732_v9, %v708_v6  ;;  %v909_v23 = vmul.u32 %v902_v38, %v893_v61  ;;  %v912_v28 = vadd.s32 1, %v8762_v29 }
 0x17a   : > { %v718_v59 = vsub.s32 32, %v717_v62  ;;  %v722_v19 = vsub.s32 4294967266, %v717_v62  ;;  %vm911_vm8 = vc.u32 %v8766_v39, %v8761_v41  ;;  %v11192_v18 = vand.u32 2147483647, %v8751_v15 }
 0x17b   : > { %v546_v7 = vshrl.u32 %v545_v17, 23  ;;  %v8782_v57 = vmul.f32 %v7816_v45, %v448_v24  ;;  %v719_v22 = vshll.u32 %v710_v30, %v717_v62  ;;  %v913_v1 = vsel %vm911_vm8, %v912_v28, %v8762_v29 }
 0x17c   : > { %v720_v54 = vshrl.u32 %v702_v34, %v718_v59  ;;  %v723_v43 = vadd.s32 127, %v722_v19  ;;  %v11225_v6 = vand.u32 2147483647, %v8515_v21  ;;  %v914_v38 = vadd.s32 %v913_v1, %v909_v23 }
 0x17d   : > { %v7071_v60 = vadd.s32 4294967169, %v546_v7  ;;  %v549_v30 = vand.u32 8388607, %v11192_v18  ;;  %v753_v31 = vand.u32 2139095040, %v8782_v57  ;;  %vm1258_vm13 = vweird.f32 %v8462_v50 }
 0x17e   : > { %vm8787_vm11 = vcmp.le.f32.partialorder %v11225_v6, 0.7853982  ;;  %v721_v2 = vor.u32 %v720_v54, %v719_v22  ;;  %v724_v48 = vshll.u32 %v723_v43, 23  ;;  %v915_v45 = vadd.s32 536870912, %v914_v38 }
 0x17f   : > { %v8793_v42 = vsel %vm8787_vm11, 0, %v733_v58  ;;  %v552_v9 = vadd.s32 1, %v7071_v60  ;;  %vm1262_vm0 = vcmp.eq.s32.totalorder %v1260_v3, 0  ;;  %vm1265_vm10 = vcmp.eq.s32.totalorder %v1260_v3, 2 }
 0x180   : > { %v725_v49 = vor.u32 4788187, %v724_v48  ;;  %v8799_v26 = vpop.eup %7573  ;;  %v739_v55 = vadd.s32 3, %v8793_v42  ;;  %v8802_v29 = vshrl.u32 %v915_v45, 30  ;;  %v728_v24 = vcvt.s32.f32 %v721_v2 }
 0x181   : > { %vm553_vm12 = vcmp.gt.s32.totalorder %v552_v9, 0  ;;  %v8804_v61 = vpop.eup %7575  ;;  %v11190_v5 = vxor.u32 2147483648, %v8799_v26  ;;  %v550_v58 = vor.u32 8388608, %v549_v30  ;;  %v754_v59 = vshrl.u32 %v753_v31, 23 }
 0x182   : > { %v726_v16 = vand.u32 2147483647, %v725_v49  ;;  %v554_v17 = vsel %vm553_vm12, %v552_v9, 0  ;;  %v11191_v34 = vxor.u32 2147483648, %v8804_v61  ;;  %v917_v62 = vshll.u32 %v8802_v29, 30 }
 0x183   : > { %v1267_v19 = vsel %vm1265_vm10, %v11190_v5, %v8804_v61  ;;  %v556_v28 = vand.u32 31, %v554_v17  ;;  %v11189_v7 = vand.u32 2147483647, %v8782_v57  ;;  %vm1261_vm14 = vcmp.lt.s32.totalorder %v1260_v3, 2 }
 0x184   : > { %v729_v23 = vmul.f32 %v728_v24, %v726_v16  ;;  %v1264_v22 = vsel %vm1262_vm0, %v8799_v26, %v11191_v34  ;;  %v8817_v54 = vand.u32 3, %v739_v55  ;;  %v8819_v43 = vsub.s32 %v914_v38, %v917_v62 }
 0x185   : > { %v1268_v1 = vsel %vm1261_vm14, %v1264_v22, %v1267_v19  ;;  %v910_v60 = vadd.s32 %v8761_v41, %v8766_v39  ;;  %v557_v2 = vsub.s32 32, %v556_v28  ;;  %v8825_v30 = vshll.u32 %v550_v58, 8 }
 0x186   : > { %v730_v6 = vxor.u32 2147483648, %v729_v23  ;;  %v1269_v48 = vsel %vm1258_vm13, nan, %v1268_v1  ;;  %v920_v45 = vsub.s32 0, %v8819_v43  ;;  %v7079_v9 = vadd.s32 4294967169, %v754_v59 }
 0x187   : > { %3297 = vmatpush1.msra.mxu1 %v1269_v48  ;;  %v555_v31 = vshrl.u32 %v554_v17, 5  ;;  %v11228_v38 = vmov 2475754826   ;;  %v8832_v55 = vand.u32 8388607, %v11189_v7  ;;  %v559_v16 = vshll.u32 %v11223_v20, %v556_v28 }
 0x188   : > { %v731_v3 = vsel %vm648_vm4, %v730_v6, %v729_v23  ;;  %v560_v49 = vshrl.u32 %v11228_v38, %v557_v2  ;;  %v7084_v39 = vmin.u32 %v920_v45, %v8819_v43  ;;  %v11229_v24 = vmov 2131351028  }
 0x189   : > { %v734_v41 = vsel %vm8787_vm11, %v8515_v21, %v731_v3  ;;  %v563_v62 = vshrl.u32 %v11229_v24, %v557_v2  ;;  %v562_v58 = vshll.u32 %v11228_v38, %v556_v28  ;;  %v565_v17 = vshll.u32 %v11229_v24, %v556_v28 }
 0x18a   : > { %7577 = vcosq.f32 %v734_v41  ;;  %v11230_v59 = vmov 2102212464   ;;  %v922_v23 = vclz %v7084_v39  ;;  %v940_v22 = vsub.s32 4, %v8802_v29 }
 0x18b   : > { %v566_v19 = vshrl.u32 %v11230_v59, %v557_v2  ;;  %7579 = vsinq.f32 %v734_v41  ;;  %v760_v1 = vadd.s32 1, %v7079_v9  ;;  %v561_v10 = vor.u32 %v560_v49, %v559_v16 }
 0x18c   : > { %v564_v6 = vor.u32 %v563_v62, %v562_v58  ;;  %v568_v45 = vshll.u32 %v11230_v59, %v556_v28  ;;  %v7085_v3 = vadd.s32 4294967294, %v922_v23  ;;  %v569_v7 = vshrl.u32 %v11221_v11, %v557_v2 }
 0x18d   : > { %v567_v48 = vor.u32 %v566_v19, %v565_v17  ;;  %v571_v5 = vshll.u32 %v11221_v11, %v556_v28  ;;  %v572_v34 = vshrl.u32 %v11222_v14, %v557_v2  ;;  %vm856_vm15 = vcmp.lt.s32.totalorder %v8604_v8, 0 }
 0x18e   : > { %v558_v41 = vshrl.u32 %v11223_v20, %v557_v2  ;;  %vm574_vm3 = vcmp.lt.s32.totalorder %v555_v31, 1  ;;  %vm576_vm4 = vcmp.lt.s32.totalorder %v555_v31, 3  ;;  %vm577_vm7 = vcmp.lt.s32.totalorder %v555_v31, 4 }
 0x18f   : > { %vm7086_vm8 = vcmp.lt.s32.totalorder %v7085_v3, 0  ;;  %v570_v9 = vor.u32 %v569_v7, %v568_v45  ;;  %v573_v49 = vor.u32 %v572_v34, %v571_v5  ;;  %v579_v39 = vsel %vm577_vm7, %v567_v48, 2102212464 }
 0x190   : > { %v925_v16 = vsel %vm7086_vm8, 0, %v7085_v3  ;;  %vm575_vm11 = vcmp.lt.s32.totalorder %v555_v31, 2  ;;  %v578_v62 = vsel %vm574_vm3, %v558_v41, %v561_v10  ;;  %v580_v58 = vsel %vm576_vm4, %v564_v6, %v579_v39 }
 0x191   : > { %v926_v17 = vsub.s32 32, %v925_v16  ;;  %v930_v28 = vsub.s32 4294967266, %v925_v16  ;;  %v582_v19 = vsel %vm574_vm3, %v561_v10, %v564_v6  ;;  %v586_v23 = vsel %vm574_vm3, %v564_v6, %v567_v48 }
 0x192   : > { %v927_v18 = vshll.u32 %v8819_v43, %v925_v16  ;;  %v583_v56 = vsel %vm577_vm7, %v570_v9, 920167782  ;;  %v587_v2 = vsel %vm577_vm7, %v573_v49, 1326507024  ;;  %vm761_vm0 = vcmp.gt.s32.totalorder %v760_v1, 0 }
 0x193   : > { %vm741_vm10 = vcmp.lt.s32.totalorder %v8817_v54, 2  ;;  %v928_v25 = vshrl.u32 %v910_v60, %v926_v17  ;;  %v931_v7 = vadd.s32 127, %v930_v28  ;;  %v584_v5 = vsel %vm576_vm4, %v567_v48, %v583_v56 }
 0x194   : > { %v588_v34 = vsel %vm576_vm4, %v570_v9, %v587_v2  ;;  %vm738_vm12 = vweird.f32 %v8515_v21  ;;  %v581_v45 = vsel %vm575_vm11, %v578_v62, %v580_v58  ;;  %v585_v10 = vsel %vm575_vm11, %v582_v19, %v584_v5 }
 0x195   : > { %v589_v6 = vsel %vm575_vm11, %v586_v23, %v588_v34  ;;  %v762_v43 = vsel %vm761_vm0, %v760_v1, 0  ;;  %v929_v3 = vor.u32 %v928_v25, %v927_v18  ;;  %v932_v41 = vshll.u32 %v931_v7, 23 }
 0x196   : > { %v8860_v49 = vmul.u32.u64.low %v8825_v30, %v589_v6  ;;  %v8861_v39 = vmul.u32.u64.high %v8825_v30, %v589_v6, %v8860_v49  ;;  %vm742_vm14 = vcmp.eq.s32.totalorder %v8817_v54, 0  ;;  %v764_v48 = vand.u32 31, %v762_v43 }
 0x197   : > { %v8865_v56 = vmul.u32.u64.low %v8825_v30, %v585_v10  ;;  %v8866_v60 = vmul.u32.u64.high %v8825_v30, %v585_v10, %v8865_v56  ;;  %v8869_v9 = vpop.eup %7577  ;;  %vm745_vm3 = vcmp.eq.s32.totalorder %v8817_v54, 2  ;;  %v11231_v31 = vand.u32 2147483647, %v8604_v8 }
 0x198   : > { %v933_v18 = vor.u32 4788187, %v932_v41  ;;  %v941_v1 = vsel %vm856_vm15, %v940_v22, %v8802_v29  ;;  %v758_v16 = vor.u32 8388608, %v8832_v55  ;;  %v8882_v62 = vpop.eup %7579  ;;  %v11196_v58 = vxor.u32 2147483648, %v8869_v9 }
 0x199   : > { %vm8874_vm4 = vcmp.le.f32.partialorder %v11231_v31, 0.7853982  ;;  %v597_v17 = vmul.u32 %v8825_v30, %v581_v45  ;;  %v8886_v28 = vshrl.u32 %v762_v43, 5  ;;  %v765_v19 = vsub.s32 32, %v764_v48 }
 0x19a   : > { %v743_v23 = vxor.u32 2147483648, %v8882_v62  ;;  %v934_v2 = vand.u32 2147483647, %v933_v18  ;;  %v936_v7 = vcvt.s32.f32 %v929_v3  ;;  %vm599_vm7 = vc.u32 %v8861_v39, %v8865_v56 }
 0x19b   : > { %v747_v29 = vsel %vm745_vm3, %v11196_v58, %v8882_v62  ;;  %v600_v55 = vadd.s32 1, %v8866_v60  ;;  %v767_v30 = vshll.u32 %v11223_v20, %v764_v48  ;;  %v768_v22 = vshrl.u32 %v11228_v38, %v765_v19 }
 0x19c   : > { %v744_v5 = vsel %vm742_vm14, %v8869_v9, %v743_v23  ;;  %v937_v34 = vmul.f32 %v936_v7, %v934_v2  ;;  %v770_v45 = vshll.u32 %v11228_v38, %v764_v48  ;;  %v771_v10 = vshrl.u32 %v11229_v24, %v765_v19 }
 0x19d   : > { %v748_v6 = vsel %vm741_vm10, %v744_v5, %v747_v29  ;;  %v601_v43 = vsel %vm599_vm7, %v600_v55, %v8866_v60  ;;  %v773_v3 = vshll.u32 %v11229_v24, %v764_v48  ;;  %v774_v41 = vshrl.u32 %v11230_v59, %v765_v19 }
 0x19e   : > { %v749_v49 = vsel %vm738_vm12, nan, %v748_v6  ;;  %v938_v31 = vxor.u32 2147483648, %v937_v34  ;;  %v602_v18 = vadd.s32 %v601_v43, %v597_v17  ;;  %v769_v58 = vor.u32 %v768_v22, %v767_v30 }
 0x19f   : > { %3137 = vmatprep.subr.mxu0 %v749_v49  ;;  %v772_v2 = vor.u32 %v771_v10, %v770_v45  ;;  %v775_v38 = vor.u32 %v774_v41, %v773_v3  ;;  %v776_v7 = vshll.u32 %v11230_v59, %v764_v48  ;;  %v777_v54 = vshrl.u32 %v11221_v11, %v765_v19 }
 0x1a0   : > { %v939_v60 = vsel %vm856_vm15, %v938_v31, %v937_v34  ;;  %v603_v29 = vadd.s32 536870912, %v602_v18  ;;  %v779_v24 = vshll.u32 %v11221_v11, %v764_v48  ;;  %v780_v55 = vshrl.u32 %v11222_v14, %v765_v19 }
 0x1a1   : > { %v942_v17 = vsel %vm8874_vm4, %v8604_v8, %v939_v60  ;;  %v8924_v30 = vsel %vm8874_vm4, 0, %v941_v1  ;;  %v778_v22 = vor.u32 %v777_v54, %v776_v7  ;;  %v798_v59 = vshll.u32 %v758_v16, 8 }
 0x1a2   : > { %7581 = vcosq.f32 %v942_v17  ;;  %v8926_v5 = vshrl.u32 %v603_v29, 30  ;;  %v781_v45 = vor.u32 %v780_v55, %v779_v24  ;;  %vm782_vm15 = vcmp.lt.s32.totalorder %v8886_v28, 1 }
 0x1a3   : > { %7583 = vsinq.f32 %v942_v17  ;;  %v766_v11 = vshrl.u32 %v11223_v20, %v765_v19  ;;  %vm785_vm8 = vcmp.lt.s32.totalorder %v8886_v28, 4  ;;  %v790_v14 = vsel %vm782_vm15, %v769_v58, %v772_v2 }
 0x1a4   : > { %v605_v48 = vshll.u32 %v8926_v5, 30  ;;  %vm784_vm11 = vcmp.lt.s32.totalorder %v8886_v28, 3  ;;  %v787_v25 = vsel %vm785_vm8, %v775_v38, 2102212464  ;;  %v791_v1 = vsel %vm785_vm8, %v778_v22, 920167782 }
 0x1a5   : > { %vm783_vm0 = vcmp.lt.s32.totalorder %v8886_v28, 2  ;;  %v792_v16 = vsel %vm784_vm11, %v775_v38, %v791_v1  ;;  %v794_v34 = vsel %vm782_vm15, %v772_v2, %v775_v38  ;;  %v795_v10 = vsel %vm785_vm8, %v781_v45, 1326507024 }
 0x1a6   : > { %v606_v6 = vsub.s32 %v602_v18, %v605_v48  ;;  %v786_v43 = vsel %vm782_vm15, %v766_v11, %v769_v58  ;;  %v793_v3 = vsel %vm783_vm0, %v790_v14, %v792_v16  ;;  %v796_v20 = vsel %vm784_vm11, %v778_v22, %v795_v10 }
 0x1a7   : > { %v788_v19 = vsel %vm784_vm11, %v772_v2, %v787_v25  ;;  %v797_v41 = vsel %vm783_vm0, %v794_v34, %v796_v20  ;;  %v8938_v49 = vmul.u32.u64.low %v798_v59, %v793_v3  ;;  %v8939_v31 = vmul.u32.u64.high %v798_v59, %v793_v3, %v8938_v49 }
 0x1a8   : > { %v947_v7 = vadd.s32 3, %v8924_v30  ;;  %v608_v54 = vsub.s32 0, %v606_v6  ;;  %v8943_v60 = vmul.u32.u64.low %v798_v59, %v797_v41  ;;  %v8944_v38 = vmul.u32.u64.high %v798_v59, %v797_v41, %v8943_v60 }
 0x1a9   : > { %v789_v58 = vsel %vm783_vm0, %v786_v43, %v788_v19  ;;  %v808_v29 = vadd.s32 1, %v8939_v31  ;;  %v598_v16 = vadd.s32 %v8865_v56, %v8861_v39  ;;  %vm946_vm7 = vweird.f32 %v8604_v8 }
 0x1aa   : > { %v7072_v18 = vmin.u32 %v608_v54, %v606_v6  ;;  %v948_v2 = vand.u32 3, %v947_v7  ;;  %v805_v55 = vmul.u32 %v798_v59, %v789_v58  ;;  %vm807_vm10 = vc.u32 %v8944_v38, %v8938_v49 }
 0x1ab   : > { %v809_v22 = vsel %vm807_vm10, %v808_v29, %v8939_v31  ;;  %vm544_vm8 = vcmp.lt.s32.totalorder %v8751_v15, 0  ;;  %v11237_v50 = vxor.u32 2147483648, %v8869_v9  ;;  %v3016_v46 = vand.u32 3, %v8032_v32  ;;  %v3045_v32 = vld [vmem:[%s11150_s4 + $0x18] sm:$0xff] }
 0x1ac   : > { %v610_v24 = vclz %v7072_v18  ;;  %v810_v11 = vadd.s32 %v809_v22, %v805_v55  ;;  %vm950_vm14 = vcmp.eq.s32.totalorder %v948_v2, 0  ;;  %vm953_vm4 = vcmp.eq.s32.totalorder %v948_v2, 2 }
 0x1ad   : > { %vm949_vm15 = vcmp.lt.s32.totalorder %v948_v2, 2 }
 0x1ae   : > { %v7073_v17 = vadd.s32 4294967294, %v610_v24  ;;  %v811_v59 = vadd.s32 536870912, %v810_v11  ;;  %v628_v24 = vsub.s32 4, %v8926_v5 }
 0x1af   : > { %v8952_v45 = vpop.eup %7581 }
 0x1b0   : > { %v8954_v14 = vpop.eup %7583  ;;  %v954_v28 = vxor.u32 2147483648, %v8952_v45  ;;  %vm7074_vm3 = vcmp.lt.s32.totalorder %v7073_v17, 0  ;;  %v8967_v3 = vshrl.u32 %v811_v59, 30 }
 0x1b1   : > { %v951_v48 = vxor.u32 2147483648, %v8954_v14  ;;  %v613_v25 = vsel %vm7074_vm3, 0, %v7073_v17 }
 0x1b2   : > { %v955_v1 = vsel %vm953_vm4, %v954_v28, %v8954_v14  ;;  %v614_v34 = vsub.s32 32, %v613_v25  ;;  %v618_v10 = vsub.s32 4294967266, %v613_v25  ;;  %v615_v19 = vshll.u32 %v606_v6, %v613_v25 }
 0x1b3   : > { %v952_v43 = vsel %vm950_vm14, %v8952_v45, %v951_v48  ;;  %v813_v39 = vshll.u32 %v8967_v3, 30  ;;  %v2501_v6 = vand.u32 3, %v8733_v52  ;;  %v11234_v25 = vand.u32 2147483647, %v8751_v15 }
 0x1b4   : > { %v956_v20 = vsel %vm949_vm15, %v952_v43, %v955_v1  ;;  %v616_v41 = vshrl.u32 %v598_v16, %v614_v34  ;;  %v619_v31 = vadd.s32 127, %v618_v10  ;;  %v629_v1 = vsel %vm544_vm8, %v628_v24, %v8926_v5 }
 0x1b5   : > { %v957_v7 = vsel %vm946_vm7, nan, %v956_v20  ;;  %v814_v60 = vsub.s32 %v810_v11, %v813_v39  ;;  %vm543_vm11 = vcmp.le.f32.partialorder %v11234_v25, 0.7853982  ;;  %vm2503_vm0 = vcmp.eq.s32.totalorder %v2501_v6, 0 }
 0x1b6   : > { %3298 = vmatprep.subr.mxu1 %v957_v7  ;;  %v617_v56 = vor.u32 %v616_v41, %v615_v19  ;;  %v620_v54 = vshll.u32 %v619_v31, 23  ;;  %vm2506_vm10 = vcmp.eq.s32.totalorder %v2501_v6, 2  ;;  %v1986_v16 = vand.u32 3, %v8793_v42 }
 0x1b7   : > { %v816_v58 = vsub.s32 0, %v814_v60  ;;  %vm2502_vm14 = vcmp.lt.s32.totalorder %v2501_v6, 2  ;;  %v11235_v10 = vxor.u32 2147483648, %v8804_v61  ;;  %v11236_v43 = vxor.u32 2147483648, %v8799_v26 }
 0x1b8   : > { %v621_v18 = vor.u32 4788187, %v620_v54  ;;  %v624_v2 = vcvt.s32.f32 %v617_v56  ;;  %v631_v41 = vsel %vm543_vm11, 0, %v629_v1  ;;  %v806_v31 = vadd.s32 %v8938_v49, %v8944_v38 }
 0x1b9   : > { %v7080_v55 = vmin.u32 %v816_v58, %v814_v60  ;;  %v2505_v52 = vsel %vm2503_vm0, %v8799_v26, %v11235_v10  ;;  %v2508_v20 = vsel %vm2506_vm10, %v11236_v43, %v8804_v61  ;;  %vm1987_vm4 = vcmp.lt.s32.totalorder %v1986_v16, 2 }
 0x1ba   : > { %v622_v29 = vand.u32 2147483647, %v621_v18  ;;  %v2509_v5 = vsel %vm2502_vm14, %v2505_v52, %v2508_v20  ;;  %vm1988_vm15 = vcmp.eq.s32.totalorder %v1986_v16, 0  ;;  %v2192_v61 = vand.u32 3, %v8924_v30 }
 0x1bb   : > { %v818_v22 = vclz %v7080_v55  ;;  %v8990_v7 = vsel %vm1258_vm13, nan, %v2509_v5  ;;  %v1990_v49 = vsel %vm1988_vm15, %v8869_v9, %v743_v23  ;;  %v635_v24 = vadd.s32 3, %v631_v41 }
 0x1bc   : > { %v625_v17 = vmul.f32 %v624_v2, %v622_v29  ;;  %vm2194_vm13 = vcmp.eq.s32.totalorder %v2192_v61, 0  ;;  %vm2193_vm0 = vcmp.lt.s32.totalorder %v2192_v61, 2  ;;  %v2810_v55 = vand.u32 3, %v8017_v40 }
 0x1bd   : > { %v7081_v11 = vadd.s32 4294967294, %v818_v22  ;;  %v2196_v30 = vsel %vm2194_vm13, %v8952_v45, %v951_v48  ;;  %v636_v48 = vand.u32 3, %v635_v24  ;;  %vm3058_vm10 = vcmask 195584  }
 0x1be   : > { %v626_v59 = vxor.u32 2147483648, %v625_v17  ;;  %v11238_v22 = vand.u32 2147483647, %v8782_v57  ;;  %v1883_v40 = vand.u32 3, %v631_v41  ;;  %vm2815_vm15 = vcmp.eq.s32.totalorder %v2810_v55, 2 }
 0x1bf   : > { %vm7082_vm3 = vcmp.lt.s32.totalorder %v7081_v11, 0  ;;  %v11241_v1 = vxor.u32 2147483648, %v8132_v44  ;;  %vm637_vm13 = vcmp.lt.s32.totalorder %v636_v48, 2  ;;  %v836_v43 = vsub.s32 4, %v8967_v3 }
 0x1c0   : > { %v627_v34 = vsel %vm544_vm8, %v626_v59, %v625_v17  ;;  %v821_v42 = vsel %vm7082_vm3, 0, %v7081_v11  ;;  %vm1991_vm8 = vcmp.eq.s32.totalorder %v1986_v16, 2  ;;  %vm9017_vm14 = vcmp.le.f32.partialorder %v11238_v22, 0.7853982 }
 0x1c1   : > { %v630_v19 = vsel %vm543_vm11, %v8751_v15, %v627_v34  ;;  %v822_v39 = vsub.s32 32, %v821_v42  ;;  %v826_v56 = vsub.s32 4294967266, %v821_v42  ;;  %v823_v26 = vshll.u32 %v814_v60, %v821_v42 }
 0x1c2   : > { %7585 = vcosq.f32 %v630_v19  ;;  %v1993_v38 = vsel %vm1991_vm8, %v11237_v50, %v8882_v62  ;;  %vm2197_vm11 = vcmp.eq.s32.totalorder %v2192_v61, 2  ;;  %vm752_vm3 = vcmp.lt.s32.totalorder %v8782_v57, 0  ;;  %v4267_v61 = vld [vmem:[%s11152_s6 + $0x30] sm:$0xff] }
 0x1c3   : > { %7587 = vsinq.f32 %v630_v19  ;;  %v824_v54 = vshrl.u32 %v806_v31, %v822_v39  ;;  %v827_v18 = vadd.s32 127, %v826_v56  ;;  %v1994_v58 = vsel %vm1987_vm4, %v1990_v49, %v1993_v38  ;;  %v9042_v56 = vld [vmem:[%s11150_s4] sm:$0xff]  ;;  %4309 = vperm.xlu1 %7540, %v4267_v61   ;;  %v7292_v61 = vld [vmem:[%s11154_s8 + $0x48] sm:$0xff] }
 0x1c4   : > { %v9001_v60 = vsel %vm738_vm12, nan, %v1994_v58  ;;  %v2199_v9 = vsel %vm2197_vm11, %v954_v28, %v8954_v14  ;;  %vm634_vm12 = vweird.f32 %v8751_v15  ;;  %v7611_v14 = vld [vmem:[%s7794_s29] sm:$0x77]  ;;  %vm2812_vm4 = vcmp.eq.s32.totalorder %v2810_v55, 0  ;;  %v9066_v15 = vld [vmem:[%s11150_s4 + $0x8] sm:$0xff] }
 0x1c5   : > { %v825_v29 = vor.u32 %v824_v54, %v823_v26  ;;  %v828_v2 = vshll.u32 %v827_v18, 23  ;;  %v2200_v23 = vsel %vm2193_vm0, %v2196_v30, %v2199_v9  ;;  %v3429_v8 = vcombine.high %v7611_v14, %v7611_v14  ;;  %v4266_v58 = vld [vmem:[%s11152_s6 + $0x28] sm:$0xff]  ;;  %v4264_v30 = vld [vmem:[%s11152_s6 + $0x18] sm:$0xff] }
 0x1c6   : > { %v9012_v21 = vsel %vm946_vm7, nan, %v2200_v23  ;;  %vm3480_vm7 = vcmask 1042432   ;;  %vm2811_vm8 = vcmp.lt.s32.totalorder %v2810_v55, 2  ;;  %v2814_v11 = vsel %vm2812_vm4, %v8123_v63, %v11241_v1  ;;  %v4262_v23 = vld [vmem:[%s11152_s6 + $0x8] sm:$0xff]  ;;  %v3046_v1 = vld [vmem:[%s11150_s4 + $0x20] sm:$0xff] }
 0x1c7   : > { %v829_v62 = vor.u32 4788187, %v828_v2  ;;  %v832_v17 = vcvt.s32.f32 %v825_v29  ;;  %v11242_v16 = vxor.u32 2147483648, %v8123_v63  ;;  %vm638_vm11 = vcmp.eq.s32.totalorder %v636_v48, 0  ;;  %4304 = vperm.xlu1 %7540, %v4266_v58   ;;  %v3044_v2 = vld [vmem:[%s11150_s4 + $0x10] sm:$0xff]  ;;  %v7326_v58 = vld [vmem:[%s11154_s8 + $0x98] sm:$0xff] }
 0x1c8   : > { %vm641_vm0 = vcmp.eq.s32.totalorder %v636_v48, 2  ;;  %vm1888_vm6 = vcmp.eq.s32.totalorder %v1883_v40, 2  ;;  %vm1885_vm4 = vcmp.eq.s32.totalorder %v1883_v40, 0  ;;  %v837_v39 = vsel %vm752_vm3, %v836_v43, %v8967_v3  ;;  %v4466_v43 = vld [vmem:[%s11154_s8 + $0x28] sm:$0xff] }
 0x1c9   : > { %v830_v6 = vand.u32 2147483647, %v829_v62  ;;  %v2817_v34 = vsel %vm2815_vm15, %v11242_v16, %v8132_v44  ;;  %vm1884_vm15 = vcmp.lt.s32.totalorder %v1883_v40, 2  ;;  %v839_v3 = vsel %vm9017_vm14, 0, %v837_v39  ;;  %v3052_v39 = vld [vmem:[%s11150_s4 + $0x50] sm:$0xff] }
 0x1ca   : > { %v2818_v18 = vsel %vm2811_vm8, %v2814_v11, %v2817_v34  ;;  %v11243_v38 = vmov 0.0   ;;  %v843_v29 = vadd.s32 3, %v839_v3  ;;  %v2089_v9 = vand.u32 3, %v839_v3  ;;  %v3055_v3 = vld [vmem:[%s11150_s4 + $0x68] sm:$0xff] }
 0x1cb   : > { %v833_v45 = vmul.f32 %v832_v17, %v830_v6  ;;  %v2819_v50 = vsel %vm1570_vm1, nan, %v2818_v18  ;;  %4294 = vperm.xlu1 %7540, %v4264_v30   ;;  %vm3018_vm1 = vcmp.eq.s32.totalorder %v3016_v46, 0  ;;  %v7612_v17 = vld [vmem:[%s7794_s29 + $0x8] sm:$0x77]  ;;  %v11244_v22 = vxor.u32 2147483648, %v8182_v4  ;;  %v7330_v18 = vld [vmem:[%s11154_s8 + $0xb8] sm:$0xff] }
 0x1cc   : > { %v844_v24 = vand.u32 3, %v843_v29  ;;  %v3430_v48 = vcombine.high %v7612_v17, %v7612_v17  ;;  %v11245_v40 = vxor.u32 2147483648, %v8177_v13  ;;  %vm2091_vm8 = vcmp.eq.s32.totalorder %v2089_v9, 0  ;;  %v7324_v30 = vld [vmem:[%s11154_s8 + $0x88] sm:$0xff] }
 0x1cd   : > { %v834_v59 = vxor.u32 2147483648, %v833_v45  ;;  %v3020_v25 = vsel %vm3018_vm1, %v8177_v13, %v11244_v22  ;;  %v4468_v13 = vld [vmem:[%s11154_s8 + $0x38] sm:$0xff]  ;;  %v2398_v29 = vand.u32 3, %v8413_v36  ;;  %v11246_v36 = vxor.u32 2147483648, %v8498_v27 }
 0x1ce   : > { %v4272_v22 = vld [vmem:[%s11152_s6 + $0x58] sm:$0xff] }
 0x1cf   : > { %v7586_v28 = vpop.eup %7585  ;;  %v835_v19 = vsel %vm752_vm3, %v834_v59, %v833_v45  ;;  %4284 = vperm.xlu1 %7540, %v4262_v23   ;;  %vm846_vm3 = vcmp.eq.s32.totalorder %v844_v24, 0  ;;  %v11249_v23 = vxor.u32 2147483648, %v8689_v51 }
 0x1d0   : > { %v7588_v10 = vpop.eup %7587  ;;  %v642_v52 = vxor.u32 2147483648, %v7586_v28  ;;  %v838_v5 = vsel %vm9017_vm14, %v8782_v57, %v835_v19  ;;  %vm2094_vm14 = vcmp.eq.s32.totalorder %v2089_v9, 2  ;;  %v3048_v19 = vld [vmem:[%s11150_s4 + $0x30] sm:$0xff] }
 0x1d1   : > { %v639_v20 = vxor.u32 2147483648, %v7588_v10  ;;  %7589 = vcosq.f32 %v838_v5 }
 0x1d2   : > { %v643_v41 = vsel %vm641_vm0, %v642_v52, %v7588_v10  ;;  %v1890_v63 = vsel %vm1888_vm6, %v642_v52, %v7588_v10  ;;  %7591 = vsinq.f32 %v838_v5  ;;  %vm3021_vm6 = vcmp.eq.s32.totalorder %v3016_v46, 2  ;;  %v4462_v5 = vld [vmem:[%s11154_s8 + $0x8] sm:$0xff] }
 0x1d3   : > { %v640_v44 = vsel %vm638_vm11, %v7586_v28, %v639_v20  ;;  %v1887_v31 = vsel %vm1885_vm4, %v7586_v28, %v639_v20  ;;  %vm2090_vm11 = vcmp.lt.s32.totalorder %v2089_v9, 2  ;;  %vm842_vm0 = vweird.f32 %v8782_v57  ;;  %4506 = vperm.xlu1 %7540, %v4468_v13   ;;  %v3047_v57 = vld [vmem:[%s11150_s4 + $0x28] sm:$0xff]  ;;  %v7386_v13 = vld [vmem:[%s11154_s8 + $0x138] sm:$0xff] }
 0x1d4   : > { %v644_v42 = vsel %vm637_vm13, %v640_v44, %v643_v41  ;;  %v1891_v26 = vsel %vm1884_vm15, %v1887_v31, %v1890_v63  ;;  %vm845_vm13 = vcmp.lt.s32.totalorder %v844_v24, 2  ;;  %vm3017_vm4 = vcmp.lt.s32.totalorder %v3016_v46, 2  ;;  %v3049_v41 = vld [vmem:[%s11150_s4 + $0x38] sm:$0xff]  ;;  %v3050_v63 = vld [vmem:[%s11150_s4 + $0x40] sm:$0xff]  ;;  %v3051_v31 = vld [vmem:[%s11150_s4 + $0x48] sm:$0xff] }
 0x1d5   : > { %v645_v54 = vsel %vm634_vm12, nan, %v644_v42  ;;  %v9052_v49 = vsel %vm634_vm12, nan, %v1891_v26  ;;  %vm849_vm12 = vcmp.eq.s32.totalorder %v844_v24, 2  ;;  %v7298_v44 = vld [vmem:[%s11154_s8 + $0x78] sm:$0xff]  ;;  %v7296_v42 = vld [vmem:[%s11154_s8 + $0x68] sm:$0xff]  ;;  %v2295_v46 = vand.u32 3, %v8596_v33 }
 0x1d6   : > { %3138 = vmatpush1.msra.mxu0 %v645_v54  ;;  %v3053_v26 = vld [vmem:[%s11150_s4 + $0x58] sm:$0xff]  ;;  %v3054_v54 = vld [vmem:[%s11150_s4 + $0x60] sm:$0xff]  ;;  %v11247_v24 = vxor.u32 2147483648, %v8491_v37 }
 0x1d7   : > { %7167 = vmatmul.mubr.msk.f32.vlgmr.msra.gmra.mxu0 %vm3058_vm10, %v9042_v56  ;;  %7199 = vmatprep.subr.msk.mxu0 %vm3480_vm7, %v3429_v8  ;;  %vm2297_vm15 = vcmp.eq.s32.totalorder %v2295_v46, 0  ;;  %vm2300_vm1 = vcmp.eq.s32.totalorder %v2295_v46, 2 }
 0x1d8   : > { %7200 = vmatpush1.msk.msra.mxu0 %vm3480_vm7, %v7611_v14  ;;  %3177 = vmatprep.mubr.f32.mxu0 %v11243_v38  ;;  %v3023_v14 = vsel %vm3021_vm6, %v11245_v40, %v8182_v4  ;;  %vm3431_vm6 = vcmask 23552   ;;  %v11253_v40 = vld [vmem:[#allocation6_spill] sm:$0xff] }
 0x1d9   : > { %3901 = vmatprep.subr.mxu0 %v2819_v50  ;;  %v3024_v10 = vsel %vm3017_vm4, %v3020_v25, %v3023_v14  ;;  %4496 = vperm.xlu1 %7540, %v4466_v43   ;;  %v7328_v50 = vld [vmem:[%s11154_s8 + $0xa8] sm:$0xff]  ;;  %v3032_v43 = vld [vmem:[%s11149_s3 + $0x30] sm:$0xff] }
 0x1da   : > { %v3025_v20 = vsel %vm1778_vm9, nan, %v3024_v10  ;;  %vm2400_vm9 = vcmp.eq.s32.totalorder %v2398_v29, 0  ;;  %v11251_v25 = vld [vmem:[#allocation7_spill] sm:$0xff] }
 0x1db   : > { %7168 = vmatmul.mubr.msk.f32.gmra.mxu0 %vm3058_vm10, %v9066_v15  ;;  %v2402_v33 = vsel %vm2400_vm9, %v8491_v37, %v11246_v36  ;;  %v3026_v37 = vld [vmem:[%s11149_s3] sm:$0xff]  ;;  %v3817_v36 = vld [vmem:[%s11151_s5 + $0x30] sm:$0xff] }
 0x1dc   : > { %3183 = vmatprep.mubr.f32.mxu0 %v11243_v38 }
 0x1dd   : > { %4486 = vperm.xlu1 %7540, %v4464_v47   ;;  %v3035_v47 = vld [vmem:[%s11149_s3 + $0x48] sm:$0xff] }
 0x1de   : > { %v7590_v62 = vpop.eup %7589 }
 0x1df   : > { %7169 = vmatmul.mubr.msk.f32.gmra.mxu0 %vm3058_vm10, %v3044_v2  ;;  %v7592_v55 = vpop.eup %7591  ;;  %v850_v6 = vxor.u32 2147483648, %v7590_v62 }
 0x1e0   : > { %3189 = vmatprep.mubr.f32.mxu0 %v11243_v38  ;;  %v847_v45 = vxor.u32 2147483648, %v7592_v55 }
 0x1e1   : > { %v851_v8 = vsel %vm849_vm12, %v850_v6, %v7592_v55  ;;  %v2096_v28 = vsel %vm2094_vm14, %v850_v6, %v7592_v55  ;;  %4476 = vperm.xlu1 %7540, %v4462_v5   ;;  %v2302_v55 = vsel %vm2300_vm1, %v11249_v23, %v8697_v35  ;;  %vm2399_vm12 = vcmp.lt.s32.totalorder %v2398_v29, 2  ;;  %v3036_v5 = vld [vmem:[%s11149_s3 + $0x50] sm:$0xff]  ;;  %v3823_v23 = vld [vmem:[%s11151_s5 + $0x60] sm:$0xff] }
 0x1e2   : > { %v848_v59 = vsel %vm846_vm3, %v7590_v62, %v847_v45  ;;  %v2093_v11 = vsel %vm2091_vm8, %v7590_v62, %v847_v45  ;;  %v11248_v62 = vxor.u32 2147483648, %v8697_v35  ;;  %vm2296_vm14 = vcmp.lt.s32.totalorder %v2295_v46, 2  ;;  %v3814_v46 = vld [vmem:[%s11151_s5 + $0x18] sm:$0xff] }
 0x1e3   : > { %7170 = vmatmul.mubr.msk.f32.gmra.mxu0 %vm3058_vm10, %v3045_v32  ;;  %v852_v4 = vsel %vm845_vm13, %v848_v59, %v851_v8  ;;  %v2097_v16 = vsel %vm2090_vm11, %v2093_v11, %v2096_v28  ;;  %v11252_v45 = vxor.u32 2147483648, %v11251_v25  ;;  %v11254_v8 = vxor.u32 2147483648, %v11253_v40  ;;  %v4270_v59 = vld [vmem:[%s11152_s6 + $0x48] sm:$0xff] }
 0x1e4   : > { %3195 = vmatprep.mubr.f32.mxu0 %v11243_v38  ;;  %v853_v34 = vsel %vm842_vm0, nan, %v852_v4  ;;  %v9105_v52 = vsel %vm842_vm0, nan, %v2097_v16  ;;  %v3031_v4 = vld [vmem:[%s11149_s3 + $0x28] sm:$0xff]  ;;  %v11255_v16 = vld [vmem:[#allocation4_spill] sm:$0xff] }
 0x1e5   : > { %3299 = vmatpush1.msra.mxu1 %v853_v34  ;;  %4847 = vperm.xlu1 %7540, %v7298_v44   ;;  %v11256_v34 = vld [vmem:[#allocation3_spill] sm:$0xff]  ;;  %v3037_v44 = vld [vmem:[%s11149_s3 + $0x58] sm:$0xff] }
 0x1e6   : > { %7183 = vmatmul.mubr.msk.f32.vlgmr.msra.gmra.mxu1 %vm3058_vm10, %v9042_v56  ;;  %7217 = vmatprep.subr.msk.mxu1 %vm3480_vm7, %v3430_v48  ;;  %v7294_v56 = vld [vmem:[%s11154_s8 + $0x58] sm:$0xff]  ;;  %vm11257_vm8 = vweird.f32 %v11256_v34 }
 0x1e7   : > { %7171 = vmatmul.mubr.msk.f32.gmra.mxu0 %vm3058_vm10, %v3046_v1  ;;  %7218 = vmatpush1.msk.msra.mxu1 %vm3480_vm7, %v7612_v17  ;;  %vm2403_vm7 = vcmp.eq.s32.totalorder %v2398_v29, 2  ;;  %v3027_v17 = vld [vmem:[%s11149_s3 + $0x8] sm:$0xff]  ;;  %v3813_v29 = vld [vmem:[%s11151_s5 + $0x10] sm:$0xff] }
 0x1e8   : > { %3338 = vmatprep.mubr.f32.mxu1 %v11243_v38  ;;  %4062 = vmatprep.subr.mxu1 %v3025_v20  ;;  %v2405_v9 = vsel %vm2403_vm7, %v11247_v24, %v8498_v27  ;;  %v4276_v27 = vld [vmem:[%s11152_s6 + $0x78] sm:$0xff]  ;;  %v3034_v20 = vld [vmem:[%s11149_s3 + $0x40] sm:$0xff] }
 0x1e9   : > { %3201 = vmatprep.mubr.f32.mxu0 %v11243_v38  ;;  %4837 = vperm.xlu1 %7540, %v7296_v42   ;;  %v2406_v6 = vsel %vm2399_vm12, %v2402_v33, %v2405_v9  ;;  %v3038_v42 = vld [vmem:[%s11149_s3 + $0x60] sm:$0xff]  ;;  %v3818_v33 = vld [vmem:[%s11151_s5 + $0x38] sm:$0xff]  ;;  %v3820_v9 = vld [vmem:[%s11151_s5 + $0x48] sm:$0xff] }
 0x1ea   : > { %7184 = vmatmul.mubr.msk.f32.gmra.mxu1 %vm3058_vm10, %v9066_v15  ;;  %v3056_v15 = vld [vmem:[%s11150_s4 + $0x70] sm:$0xff]  ;;  %v2407_v35 = vsel %vm1154_vm5, nan, %v2406_v6  ;;  %v3819_v24 = vld [vmem:[%s11151_s5 + $0x40] sm:$0xff] }
 0x1eb   : > { %7172 = vmatmul.mubr.msk.f32.gmra.mxu0 %vm3058_vm10, %v3047_v57  ;;  %3344 = vmatprep.mubr.f32.mxu1 %v11243_v38 }
 0x1ec   : > { %3207 = vmatprep.mubr.f32.mxu0 %v11243_v38 }
 0x1ed   : > { %4827 = vperm.xlu1 %7540, %v7294_v56   ;;  %v3039_v56 = vld [vmem:[%s11149_s3 + $0x68] sm:$0xff] }
 0x1ee   : > { %7185 = vmatmul.mubr.msk.f32.gmra.mxu1 %vm3058_vm10, %v3044_v2  ;;  %v3057_v2 = vld [vmem:[%s11150_s4 + $0x78] sm:$0xff] }
 0x1ef   : > { %7173 = vmatmul.mubr.msk.f32.gmra.mxu0 %vm3058_vm10, %v3048_v19  ;;  %3350 = vmatprep.mubr.f32.mxu1 %v11243_v38 }
 0x1f0   : > { %3213 = vmatprep.mubr.f32.mxu0 %v11243_v38 }
 0x1f1   : > { %4817 = vperm.xlu1 %7540, %v7292_v61   ;;  %v3040_v61 = vld [vmem:[%s11149_s3 + $0x70] sm:$0xff] }
 0x1f2   : > { %7186 = vmatmul.mubr.msk.f32.gmra.mxu1 %vm3058_vm10, %v3045_v32  ;;  %v2299_v32 = vsel %vm2297_vm15, %v8689_v51, %v11248_v62  ;;  %v3821_v62 = vld [vmem:[%s11151_s5 + $0x50] sm:$0xff] }
 0x1f3   : > { %7174 = vmatmul.mubr.msk.f32.gmra.mxu0 %vm3058_vm10, %v3049_v41  ;;  %3356 = vmatprep.mubr.f32.mxu1 %v11243_v38  ;;  %v2303_v51 = vsel %vm2296_vm14, %v2299_v32, %v2302_v55  ;;  %v3822_v32 = vld [vmem:[%s11151_s5 + $0x58] sm:$0xff]  ;;  %v3824_v55 = vld [vmem:[%s11151_s5 + $0x68] sm:$0xff] }
 0x1f4   : > { %3219 = vmatprep.mubr.f32.mxu0 %v11243_v38  ;;  %v2304_v48 = vsel %vm1050_vm2, nan, %v2303_v51 }
 0x1f5   : > { %5187 = vperm.xlu1 %7540, %v7330_v18   ;;  %v3041_v18 = vld [vmem:[%s11149_s3 + $0x78] sm:$0xff] }
 0x1f6   : > { %7187 = vmatmul.mubr.msk.f32.gmra.mxu1 %vm3058_vm10, %v3046_v1  ;;  %v3030_v1 = vld [vmem:[%s11149_s3 + $0x20] sm:$0xff] }
 0x1f7   : > { %7175 = vmatmul.mubr.msk.f32.gmra.mxu0 %vm3058_vm10, %v3050_v63  ;;  %3362 = vmatprep.mubr.f32.mxu1 %v11243_v38 }
 0x1f8   : > { %3225 = vmatprep.mubr.f32.mxu0 %v11243_v38 }
 0x1f9   : > { %5177 = vperm.xlu1 %7540, %v7328_v50   ;;  %v3811_v50 = vld [vmem:[%s11151_s5] sm:$0xff] }
 0x1fa   : > { %7188 = vmatmul.mubr.msk.f32.gmra.mxu1 %vm3058_vm10, %v3047_v57  ;;  %v7384_v57 = vld [vmem:[%s11154_s8 + $0x128] sm:$0xff] }
 0x1fb   : > { %7176 = vmatmul.mubr.msk.f32.gmra.mxu0 %vm3058_vm10, %v3051_v31  ;;  %3368 = vmatprep.mubr.f32.mxu1 %v11243_v38 }
 0x1fc   : > { %3231 = vmatprep.mubr.f32.mxu0 %v11243_v38 }
 0x1fd   : > { %5167 = vperm.xlu1 %7540, %v7326_v58   ;;  %v3812_v58 = vld [vmem:[%s11151_s5 + $0x8] sm:$0xff] }
 0x1fe   : > { %7189 = vmatmul.mubr.msk.f32.gmra.mxu1 %vm3058_vm10, %v3048_v19  ;;  %v7418_v19 = vld [vmem:[%s11154_s8 + $0x178] sm:$0xff] }
 0x1ff   : > { %7177 = vmatmul.mubr.msk.f32.gmra.mxu0 %vm3058_vm10, %v3052_v39  ;;  %3374 = vmatprep.mubr.f32.mxu1 %v11243_v38 }
 0x200   : > { %3237 = vmatprep.mubr.f32.mxu0 %v11243_v38 }
 0x201   : > { %5157 = vperm.xlu1 %7540, %v7324_v30   ;;  %v3816_v30 = vld [vmem:[%s11151_s5 + $0x28] sm:$0xff] }
 0x202   : > { %7190 = vmatmul.mubr.msk.f32.gmra.mxu1 %vm3058_vm10, %v3049_v41  ;;  %v7416_v41 = vld [vmem:[%s11154_s8 + $0x168] sm:$0xff] }
 0x203   : > { %7178 = vmatmul.mubr.msk.f32.gmra.mxu0 %vm3058_vm10, %v3053_v26  ;;  %3380 = vmatprep.mubr.f32.mxu1 %v11243_v38 }
 0x204   : > { %3243 = vmatprep.mubr.f32.mxu0 %v11243_v38 }
 0x205   : > { %4354 = vperm.xlu1 %7540, %v4276_v27   ;;  %v3826_v27 = vld [vmem:[%s11151_s5 + $0x78] sm:$0xff] }
 0x206   : > { %7191 = vmatmul.mubr.msk.f32.gmra.mxu1 %vm3058_vm10, %v3050_v63  ;;  %v7414_v63 = vld [vmem:[%s11154_s8 + $0x158] sm:$0xff] }
 0x207   : > { %7179 = vmatmul.mubr.msk.f32.gmra.mxu0 %vm3058_vm10, %v3054_v54  ;;  %3386 = vmatprep.mubr.f32.mxu1 %v11243_v38 }
 0x208   : > { %3249 = vmatprep.mubr.f32.mxu0 %v11243_v38 }
 0x209   : > { %4344 = vperm.xlu1 %7540, %v4274_v12  }
 0x20a   : > { %7192 = vmatmul.mubr.msk.f32.gmra.mxu1 %vm3058_vm10, %v3051_v31  ;;  %v7412_v31 = vld [vmem:[%s11154_s8 + $0x148] sm:$0xff] }
 0x20b   : > { %7180 = vmatmul.mubr.msk.f32.gmra.mxu0 %vm3058_vm10, %v3055_v3  ;;  %3392 = vmatprep.mubr.f32.mxu1 %v11243_v38 }
 0x20c   : > { %3255 = vmatprep.mubr.f32.mxu0 %v11243_v38 }
 0x20d   : > { %4334 = vperm.xlu1 %7540, %v4272_v22  }
 0x20e   : > { %7193 = vmatmul.mubr.msk.f32.gmra.mxu1 %vm3058_vm10, %v3052_v39  ;;  %v7450_v39 = vld [vmem:[%s11154_s8 + $0x1b8] sm:$0xff] }
 0x20f   : > { %7181 = vmatmul.mubr.msk.f32.gmra.mxu0 %vm3058_vm10, %v3056_v15  ;;  %3398 = vmatprep.mubr.f32.mxu1 %v11243_v38 }
 0x210   : > { %3261 = vmatprep.mubr.f32.mxu0 %v11243_v38 }
 0x211   : > { %4324 = vperm.xlu1 %7540, %v4270_v59  }
 0x212   : > { %7194 = vmatmul.mubr.msk.f32.gmra.mxu1 %vm3058_vm10, %v3053_v26  ;;  %v7448_v26 = vld [vmem:[%s11154_s8 + $0x1a8] sm:$0xff] }
 0x213   : > { %7182 = vmatmul.mubr.msk.f32.gmra.mxu0 %vm3058_vm10, %v3057_v2  ;;  %3404 = vmatprep.mubr.f32.mxu1 %v11243_v38 }
 0x214   : > { %3553 = vmatprep.mubr.f32.mxu0 %v11243_v38 }
 0x215   : > { %5818 = vperm.xlu1 %7540, %v7386_v13  }
 0x216   : > { %7195 = vmatmul.mubr.msk.f32.gmra.mxu1 %vm3058_vm10, %v3054_v54  ;;  %v7446_v54 = vld [vmem:[%s11154_s8 + $0x198] sm:$0xff] }
 0x217   : > { %7201 = vmatmul.mubr.msk.f32.vlgmr.msra.gmra.mxu0 %vm3431_vm6, %v3026_v37  ;;  %3410 = vmatprep.mubr.f32.mxu1 %v11243_v38 }
 0x218   : > { %3902 = vmatpush1.msra.mxu0 %v8295_v0  ;;  %3559 = vmatprep.mubr.f32.mxu0 %v11243_v38  ;;  %v11250_v0 = vld [vmem:[#allocation5_spill] sm:$0xff] }
 0x219   : > { %3903 = vmatprep.subr.mxu0 %v2407_v35  ;;  %5808 = vperm.xlu1 %7540, %v7384_v57  }
 0x21a   : > { %3904 = vmatpush1.msra.mxu0 %v2304_v48  ;;  %7196 = vmatmul.mubr.msk.f32.gmra.mxu1 %vm3058_vm10, %v3055_v3  ;;  %v7444_v3 = vld [vmem:[%s11154_s8 + $0x188] sm:$0xff] }
 0x21b   : > { %3905 = vmatprep.subr.mxu0 %v9001_v60  ;;  %7202 = vmatmul.mubr.msk.f32.gmra.mxu0 %vm3431_vm6, %v3027_v17  ;;  %v2604_v60 = vand.u32 3, %v11250_v0 }
 0x21c   : > { %3906 = vmatpush1.msra.mxu0 %v9052_v49  ;;  %3416 = vmatprep.mubr.f32.mxu1 %v11243_v38  ;;  %v3029_v49 = vld [vmem:[%s11149_s3 + $0x18] sm:$0xff] }
 0x21d   : > { %3565 = vmatprep.mubr.f32.mxu0 %v11243_v38  ;;  %vm2606_vm5 = vcmp.eq.s32.totalorder %v2604_v60, 0  ;;  %vm2609_vm2 = vcmp.eq.s32.totalorder %v2604_v60, 2  ;;  %vm2605_vm3 = vcmp.lt.s32.totalorder %v2604_v60, 2 }
 0x21e   : > { %7197 = vmatmul.mubr.msk.f32.gmra.mxu1 %vm3058_vm10, %v3056_v15  ;;  %v2608_v14 = vsel %vm2606_vm5, %v11253_v40, %v11252_v45  ;;  %v2611_v28 = vsel %vm2609_vm2, %v11254_v8, %v11251_v25  ;;  %v6784_v15 = vld [vmem:[%s11156_s10] sm:$0xf] }
 0x21f   : > { %7203 = vmatmul.mubr.msk.f32.gmra.mxu0 %vm3431_vm6, %v3028_v53  ;;  %3422 = vmatprep.mubr.f32.mxu1 %v11243_v38  ;;  %v2612_v11 = vsel %vm2605_vm3, %v2608_v14, %v2611_v28 }
 0x220   : > { %3571 = vmatprep.mubr.f32.mxu0 %v11243_v38  ;;  %v2613_v10 = vsel %vm11257_vm8, nan, %v2612_v11 }
 0x222   : > { %7198 = vmatmul.mubr.msk.f32.gmra.mxu1 %vm3058_vm10, %v3057_v2  ;;  %v3815_v2 = vld [vmem:[%s11151_s5 + $0x20] sm:$0xff] }
 0x223   : > { %7204 = vmatmul.mubr.msk.f32.gmra.mxu0 %vm3431_vm6, %v3029_v49  ;;  %3714 = vmatprep.mubr.f32.mxu1 %v11243_v38 }
 0x224   : > { %3577 = vmatprep.mubr.f32.mxu0 %v11243_v38 }
 0x226   : > { %7219 = vmatmul.mubr.msk.f32.vlgmr.msra.gmra.mxu1 %vm3431_vm6, %v3026_v37  ;;  %v3825_v37 = vld [vmem:[%s11151_s5 + $0x70] sm:$0xff] }
 0x227   : > { %7205 = vmatmul.mubr.msk.f32.gmra.mxu0 %vm3431_vm6, %v3030_v1  ;;  %4063 = vmatpush1.msra.mxu1 %v11255_v16 }
 0x228   : > { %3583 = vmatprep.mubr.f32.mxu0 %v11243_v38  ;;  %3720 = vmatprep.mubr.f32.mxu1 %v11243_v38 }
 0x229   : > { %4064 = vmatprep.subr.mxu1 %v2613_v10 }
 0x22a   : > { %4065 = vmatpush1.msra.mxu1 %v8990_v7  ;;  %v7382_v7 = vld [vmem:[%s11154_s8 + $0x118] sm:$0xff] }
 0x22b   : > { %7206 = vmatmul.mubr.msk.f32.gmra.mxu0 %vm3431_vm6, %v3031_v4  ;;  %4066 = vmatprep.subr.mxu1 %v9012_v21  ;;  %v3033_v21 = vld [vmem:[%s11149_s3 + $0x38] sm:$0xff] }
 0x22c   : > { %7220 = vmatmul.mubr.msk.f32.gmra.mxu1 %vm3431_vm6, %v3027_v17  ;;  %3589 = vmatprep.mubr.f32.mxu0 %v11243_v38 }
 0x22d   : > { %4067 = vmatpush1.msra.mxu1 %v9105_v52  ;;  %3726 = vmatprep.mubr.f32.mxu1 %v11243_v38  ;;  %v7380_v52 = vld [vmem:[%s11154_s8 + $0x108] sm:$0xff] }
 0x22e   : > { %5798 = vperm.xlu1 %7540, %v7382_v7  }
 0x22f   : > { %7207 = vmatmul.mubr.msk.f32.gmra.mxu0 %vm3431_vm6, %v3032_v43 }
 0x230   : > { %7221 = vmatmul.mubr.msk.f32.gmra.mxu1 %vm3431_vm6, %v3028_v53  ;;  %3595 = vmatprep.mubr.f32.mxu0 %v11243_v38 }
 0x231   : > { %3732 = vmatprep.mubr.f32.mxu1 %v11243_v38 }
 0x232   : > { %5788 = vperm.xlu1 %7540, %v7380_v52  }
 0x233   : > { %7208 = vmatmul.mubr.msk.f32.gmra.mxu0 %vm3431_vm6, %v3033_v21 }
 0x234   : > { %7222 = vmatmul.mubr.msk.f32.gmra.mxu1 %vm3431_vm6, %v3029_v49  ;;  %3601 = vmatprep.mubr.f32.mxu0 %v11243_v38 }
 0x235   : > { %3738 = vmatprep.mubr.f32.mxu1 %v11243_v38 }
 0x236   : > { %6158 = vperm.xlu1 %7540, %v7418_v19  }
 0x237   : > { %7209 = vmatmul.mubr.msk.f32.gmra.mxu0 %vm3431_vm6, %v3034_v20 }
 0x238   : > { %7223 = vmatmul.mubr.msk.f32.gmra.mxu1 %vm3431_vm6, %v3030_v1  ;;  %3607 = vmatprep.mubr.f32.mxu0 %v11243_v38 }
 0x239   : > { %3744 = vmatprep.mubr.f32.mxu1 %v11243_v38 }
 0x23a   : > { %6148 = vperm.xlu1 %7540, %v7416_v41  }
 0x23b   : > { %7210 = vmatmul.mubr.msk.f32.gmra.mxu0 %vm3431_vm6, %v3035_v47 }
 0x23c   : > { %7224 = vmatmul.mubr.msk.f32.gmra.mxu1 %vm3431_vm6, %v3031_v4  ;;  %3613 = vmatprep.mubr.f32.mxu0 %v11243_v38 }
 0x23d   : > { %3750 = vmatprep.mubr.f32.mxu1 %v11243_v38 }
 0x23e   : > { %6138 = vperm.xlu1 %7540, %v7414_v63  }
 0x23f   : > { %7211 = vmatmul.mubr.msk.f32.gmra.mxu0 %vm3431_vm6, %v3036_v5 }
 0x240   : > { %7225 = vmatmul.mubr.msk.f32.gmra.mxu1 %vm3431_vm6, %v3032_v43  ;;  %3619 = vmatprep.mubr.f32.mxu0 %v11243_v38 }
 0x241   : > { %3756 = vmatprep.mubr.f32.mxu1 %v11243_v38 }
 0x242   : > { %6128 = vperm.xlu1 %7540, %v7412_v31  }
 0x243   : > { %7212 = vmatmul.mubr.msk.f32.gmra.mxu0 %vm3431_vm6, %v3037_v44 }
 0x244   : > { %7226 = vmatmul.mubr.msk.f32.gmra.mxu1 %vm3431_vm6, %v3033_v21  ;;  %3625 = vmatprep.mubr.f32.mxu0 %v11243_v38 }
 0x245   : > { %3762 = vmatprep.mubr.f32.mxu1 %v11243_v38 }
 0x246   : > { %6498 = vperm.xlu1 %7540, %v7450_v39  }
 0x247   : > { %7213 = vmatmul.mubr.msk.f32.gmra.mxu0 %vm3431_vm6, %v3038_v42 }
 0x248   : > { %7227 = vmatmul.mubr.msk.f32.gmra.mxu1 %vm3431_vm6, %v3034_v20  ;;  %3631 = vmatprep.mubr.f32.mxu0 %v11243_v38 }
 0x249   : > { %3768 = vmatprep.mubr.f32.mxu1 %v11243_v38 }
 0x24a   : > { %6488 = vperm.xlu1 %7540, %v7448_v26  }
 0x24b   : > { %7214 = vmatmul.mubr.msk.f32.gmra.mxu0 %vm3431_vm6, %v3039_v56 }
 0x24c   : > { %7228 = vmatmul.mubr.msk.f32.gmra.mxu1 %vm3431_vm6, %v3035_v47  ;;  %3637 = vmatprep.mubr.f32.mxu0 %v11243_v38 }
 0x24d   : > { %3774 = vmatprep.mubr.f32.mxu1 %v11243_v38 }
 0x24e   : > { %6478 = vperm.xlu1 %7540, %v7446_v54  }
 0x24f   : > { %7215 = vmatmul.mubr.msk.f32.gmra.mxu0 %vm3431_vm6, %v3040_v61 }
 0x250   : > { %7229 = vmatmul.mubr.msk.f32.gmra.mxu1 %vm3431_vm6, %v3036_v5  ;;  %3643 = vmatprep.mubr.f32.mxu0 %v11243_v38 }
 0x251   : > { %3780 = vmatprep.mubr.f32.mxu1 %v11243_v38 }
 0x252   : > { %6468 = vperm.xlu1 %7540, %v7444_v3  }
 0x253   : > { %7216 = vmatmul.mubr.msk.f32.gmra.mxu0 %vm3431_vm6, %v3041_v18 }
 0x254   : > { %7230 = vmatmul.mubr.msk.f32.gmra.mxu1 %vm3431_vm6, %v3037_v44  ;;  %3939 = vmatprep.mubr.f32.mxu0 %v11243_v38 }
 0x255   : > { %3786 = vmatprep.mubr.f32.mxu1 %v11243_v38 }
 0x256   : > { %6787 = vperm.xlu1 %7540, %v6784_v15  }
 0x257   : > { %7235 = vmatmul.mubr.msk.f32.vlgmr.msra.gmra.mxu0 %vm3058_vm10, %v3811_v50 }
 0x258   : > { %7231 = vmatmul.mubr.msk.f32.gmra.mxu1 %vm3431_vm6, %v3038_v42  ;;  %3945 = vmatprep.mubr.f32.mxu0 %v11243_v38 }
 0x259   : > { %3792 = vmatprep.mubr.f32.mxu1 %v11243_v38 }
 0x25b   : > { %7236 = vmatmul.mubr.msk.f32.gmra.mxu0 %vm3058_vm10, %v3812_v58 }
 0x25c   : > { %7232 = vmatmul.mubr.msk.f32.gmra.mxu1 %vm3431_vm6, %v3039_v56  ;;  %3951 = vmatprep.mubr.f32.mxu0 %v11243_v38 }
 0x25d   : > { %3798 = vmatprep.mubr.f32.mxu1 %v11243_v38 }
 0x25f   : > { %7237 = vmatmul.mubr.msk.f32.gmra.mxu0 %vm3058_vm10, %v3813_v29 }
 0x260   : > { %7233 = vmatmul.mubr.msk.f32.gmra.mxu1 %vm3431_vm6, %v3040_v61  ;;  %3957 = vmatprep.mubr.f32.mxu0 %v11243_v38 }
 0x261   : > { %3804 = vmatprep.mubr.f32.mxu1 %v11243_v38 }
 0x263   : > { %7238 = vmatmul.mubr.msk.f32.gmra.mxu0 %vm3058_vm10, %v3814_v46 }
 0x264   : > { %7234 = vmatmul.mubr.msk.f32.gmra.mxu1 %vm3431_vm6, %v3041_v18  ;;  %3963 = vmatprep.mubr.f32.mxu0 %v11243_v38 }
 0x265   : > { %4100 = vmatprep.mubr.f32.mxu1 %v11243_v38 }
 0x267   : > { %7239 = vmatmul.mubr.msk.f32.gmra.mxu0 %vm3058_vm10, %v3815_v2 }
 0x268   : > { %7251 = vmatmul.mubr.msk.f32.vlgmr.msra.gmra.mxu1 %vm3058_vm10, %v3811_v50  ;;  %3969 = vmatprep.mubr.f32.mxu0 %v11243_v38 }
 0x269   : > { %4106 = vmatprep.mubr.f32.mxu1 %v11243_v38 }
 0x26b   : > { %7240 = vmatmul.mubr.msk.f32.gmra.mxu0 %vm3058_vm10, %v3816_v30 }
 0x26c   : > { %7252 = vmatmul.mubr.msk.f32.gmra.mxu1 %vm3058_vm10, %v3812_v58  ;;  %3975 = vmatprep.mubr.f32.mxu0 %v11243_v38 }
 0x26d   : > { %4112 = vmatprep.mubr.f32.mxu1 %v11243_v38 }
 0x26f   : > { %7241 = vmatmul.mubr.msk.f32.gmra.mxu0 %vm3058_vm10, %v3817_v36 }
 0x270   : > { %7253 = vmatmul.mubr.msk.f32.gmra.mxu1 %vm3058_vm10, %v3813_v29  ;;  %3981 = vmatprep.mubr.f32.mxu0 %v11243_v38 }
 0x271   : > { %4118 = vmatprep.mubr.f32.mxu1 %v11243_v38 }
 0x273   : > { %7242 = vmatmul.mubr.msk.f32.gmra.mxu0 %vm3058_vm10, %v3818_v33 }
 0x274   : > { %7254 = vmatmul.mubr.msk.f32.gmra.mxu1 %vm3058_vm10, %v3814_v46  ;;  %3987 = vmatprep.mubr.f32.mxu0 %v11243_v38 }
 0x275   : > { %4124 = vmatprep.mubr.f32.mxu1 %v11243_v38 }
 0x277   : > { %7243 = vmatmul.mubr.msk.f32.gmra.mxu0 %vm3058_vm10, %v3819_v24 }
 0x278   : > { %7255 = vmatmul.mubr.msk.f32.gmra.mxu1 %vm3058_vm10, %v3815_v2  ;;  %3993 = vmatprep.mubr.f32.mxu0 %v11243_v38 }
 0x279   : > { %4130 = vmatprep.mubr.f32.mxu1 %v11243_v38 }
 0x27b   : > { %7244 = vmatmul.mubr.msk.f32.gmra.mxu0 %vm3058_vm10, %v3820_v9 }
 0x27c   : > { %7256 = vmatmul.mubr.msk.f32.gmra.mxu1 %vm3058_vm10, %v3816_v30  ;;  %3999 = vmatprep.mubr.f32.mxu0 %v11243_v38 }
 0x27d   : > { %4136 = vmatprep.mubr.f32.mxu1 %v11243_v38 }
 0x27f   : > { %7245 = vmatmul.mubr.msk.f32.gmra.mxu0 %vm3058_vm10, %v3821_v62 }
 0x280   : > { %7257 = vmatmul.mubr.msk.f32.gmra.mxu1 %vm3058_vm10, %v3817_v36  ;;  %4005 = vmatprep.mubr.f32.mxu0 %v11243_v38 }
 0x281   : > { %4142 = vmatprep.mubr.f32.mxu1 %v11243_v38 }
 0x283   : > { %7246 = vmatmul.mubr.msk.f32.gmra.mxu0 %vm3058_vm10, %v3822_v32 }
 0x284   : > { %7258 = vmatmul.mubr.msk.f32.gmra.mxu1 %vm3058_vm10, %v3818_v33  ;;  %4011 = vmatprep.mubr.f32.mxu0 %v11243_v38 }
 0x285   : > { %4148 = vmatprep.mubr.f32.mxu1 %v11243_v38 }
 0x287   : > { %7247 = vmatmul.mubr.msk.f32.gmra.mxu0 %vm3058_vm10, %v3823_v23 }
 0x288   : > { %7259 = vmatmul.mubr.msk.f32.gmra.mxu1 %vm3058_vm10, %v3819_v24  ;;  %4017 = vmatprep.mubr.f32.mxu0 %v11243_v38 }
 0x289   : > { %4154 = vmatprep.mubr.f32.mxu1 %v11243_v38 }
 0x28b   : > { %7248 = vmatmul.mubr.msk.f32.gmra.mxu0 %vm3058_vm10, %v3824_v55 }
 0x28c   : > { %7260 = vmatmul.mubr.msk.f32.gmra.mxu1 %vm3058_vm10, %v3820_v9  ;;  %4023 = vmatprep.mubr.f32.mxu0 %v11243_v38 }
 0x28d   : > { %4160 = vmatprep.mubr.f32.mxu1 %v11243_v38 }
 0x28f   : > { %7249 = vmatmul.mubr.msk.f32.gmra.mxu0 %vm3058_vm10, %v3825_v37 }
 0x290   : > { %7261 = vmatmul.mubr.msk.f32.gmra.mxu1 %vm3058_vm10, %v3821_v62  ;;  %4029 = vmatprep.mubr.f32.mxu0 %v11243_v38 }
 0x291   : > { %4166 = vmatprep.mubr.f32.mxu1 %v11243_v38 }
 0x293   : > { %7250 = vmatmul.mubr.msk.f32.gmra.mxu0 %vm3058_vm10, %v3826_v27 }
 0x294   : > { %7262 = vmatmul.mubr.msk.f32.gmra.mxu1 %vm3058_vm10, %v3822_v32  ;;  %4598 = vmatprep.mubr.f32.mxu0 %v11243_v38 }
 0x295   : > { %4172 = vmatprep.mubr.f32.mxu1 %v11243_v38 }
 0x297   : > { %v9536_v6 = vpop.f32.mrf.mxu0 }
 0x298   : > { %7263 = vmatmul.mubr.msk.f32.gmra.mxu1 %vm3058_vm10, %v3823_v23 }
 0x299   : > { %4178 = vmatprep.mubr.f32.mxu1 %v11243_v38  ;;  %v9540_v51 = vpop.f32.mrf.mxu0 }
 0x29b   : > { %v9542_v35 = vpop.f32.mrf.mxu0 }
 0x29c   : > { %7264 = vmatmul.mubr.msk.f32.gmra.mxu1 %vm3058_vm10, %v3824_v55 }
 0x29d   : > { %4184 = vmatprep.mubr.f32.mxu1 %v11243_v38  ;;  %v9546_v17 = vpop.f32.mrf.mxu0 }
 0x29f   : > { %v9548_v48 = vpop.f32.mrf.mxu0 }
 0x2a0   : > { %7265 = vmatmul.mubr.msk.f32.gmra.mxu1 %vm3058_vm10, %v3825_v37 }
 0x2a1   : > { %4190 = vmatprep.mubr.f32.mxu1 %v11243_v38  ;;  %v9552_v12 = vpop.f32.mrf.mxu0 }
 0x2a3   : > { %v9554_v53 = vpop.f32.mrf.mxu0 }
 0x2a4   : > { %7266 = vmatmul.mubr.msk.f32.gmra.mxu1 %vm3058_vm10, %v3826_v27  ;;  %vm4509_vm10 = vcmask 523264  }
 0x2a5   : > { %v9557_v0 = vpop.f32.mrf.mxu0  ;;  %4711 = vmatprep.mubr.f32.mxu1 %v11243_v38 }
 0x2a6   : > { %v9562_v22 = vpop.f32.mrf.mxu1 }
 0x2a7   : > { %v9560_v60 = vpop.f32.mrf.mxu0 }
 0x2a8   : > { %v9566_v25 = vpop.f32.mrf.mxu1 }
 0x2a9   : > { %v9564_v49 = vpop.f32.mrf.mxu0  ;;  %11258 = vst [vmem:[#allocation5_spill] sm:$0xff] %v9566_v25 }
 0x2aa   : > { %v9570_v40 = vpop.f32.mrf.mxu1 }
 0x2ab   : > { %v9568_v45 = vpop.f32.mrf.mxu0 }
 0x2ac   : > { %v9574_v8 = vpop.f32.mrf.mxu1 }
 0x2ad   : > { %v9572_v14 = vpop.f32.mrf.mxu0  ;;  %11259 = vst [vmem:[#allocation7_spill] sm:$0xff] %v9574_v8 }
 0x2ae   : > { %v9578_v59 = vpop.f32.mrf.mxu1 }
 0x2af   : > { %v9576_v28 = vpop.f32.mrf.mxu0 }
 0x2b0   : > { %v9582_v11 = vpop.f32.mrf.mxu1 }
 0x2b1   : > { %v9580_v1 = vpop.f32.mrf.mxu0  ;;  %11260 = vst [vmem:[#allocation6_spill] sm:$0xff] %v9582_v11 }
 0x2b2   : > { %v9586_v4 = vpop.f32.mrf.mxu1 }
 0x2b3   : > { %v9584_v13 = vpop.f32.mrf.mxu0 }
 0x2b4   : > { %v9590_v34 = vpop.f32.mrf.mxu1 }
 0x2b5   : > { %v9588_v16 = vpop.f32.mrf.mxu0 }
 0x2b6   : > { %v9594_v57 = vpop.f32.mrf.mxu1 }
 0x2b7   : > { %v9592_v10 = vpop.f32.mrf.mxu0 }
 0x2b8   : > { %v9598_v7 = vpop.f32.mrf.mxu1 }
 0x2b9   : > { %v9596_v43 = vpop.f32.mrf.mxu0  ;;  %11262 = vst [vmem:[#allocation3_spill] sm:$0xff] %v9598_v7 }
 0x2ba   : > { %11261 = vst [vmem:[#allocation4_spill] sm:$0xff] %v9596_v43  ;;  %v9602_v52 = vpop.f32.mrf.mxu1 }
 0x2bb   : > { %v9600_v21 = vpop.f32.mrf.mxu0 }
 0x2bc   : > { %v9606_v19 = vpop.f32.mrf.mxu1 }
 0x2bd   : > { %v9604_v20 = vpop.f32.mrf.mxu0 }
 0x2be   : > { %11263 = vst [vmem:[#allocation8_spill] sm:$0xff] %v9604_v20  ;;  %v9610_v41 = vpop.f32.mrf.mxu1 }
 0x2bf   : > { %v9608_v47 = vpop.f32.mrf.mxu0 }
 0x2c0   : > { %v9614_v63 = vpop.f32.mrf.mxu1 }
 0x2c1   : > { %v9612_v5 = vpop.f32.mrf.mxu0 }
 0x2c2   : > { %11264 = vst [vmem:[#allocation9_spill] sm:$0xff] %v9612_v5  ;;  %v9618_v31 = vpop.f32.mrf.mxu1 }
 0x2c3   : > { %v9616_v44 = vpop.f32.mrf.mxu0 }
 0x2c4   : > { %v9622_v39 = vpop.f32.mrf.mxu1 }
 0x2c5   : > { %v9620_v42 = vpop.f32.mrf.mxu0 }
 0x2c6   : > { %11265 = vst [vmem:[#allocation10_spill] sm:$0xff] %v9620_v42  ;;  %v9626_v26 = vpop.f32.mrf.mxu1 }
 0x2c7   : > { %v9624_v56 = vpop.f32.mrf.mxu0 }
 0x2c8   : > { %v9630_v54 = vpop.f32.mrf.mxu1 }
 0x2c9   : > { %v9628_v61 = vpop.f32.mrf.mxu0  ;;  %11267 = vst [vmem:[#allocation12_spill] sm:$0xff] %v9630_v54 }
 0x2ca   : > { %11266 = vst [vmem:[#allocation11_spill] sm:$0xff] %v9628_v61  ;;  %v9634_v3 = vpop.f32.mrf.mxu1 }
 0x2cb   : > { %v9632_v18 = vpop.f32.mrf.mxu0 }
 0x2cc   : > { %v9638_v15 = vpop.f32.mrf.mxu1 }
 0x2cd   : > { %v9636_v50 = vpop.f32.mrf.mxu0  ;;  %11269 = vst [vmem:[#allocation14_spill] sm:$0xff] %v9638_v15 }
 0x2ce   : > { %11268 = vst [vmem:[#allocation13_spill] sm:$0xff] %v9636_v50  ;;  %v9642_v29 = vpop.f32.mrf.mxu1 }
 0x2cf   : > { %v9640_v58 = vpop.f32.mrf.mxu0 }
 0x2d0   : > { %v9646_v2 = vpop.f32.mrf.mxu1 }
 0x2d1   : > { %v9644_v46 = vpop.f32.mrf.mxu0  ;;  %11271 = vst [vmem:[#allocation16_spill] sm:$0xff] %v9646_v2 }
 0x2d2   : > { %11270 = vst [vmem:[#allocation15_spill] sm:$0xff] %v9644_v46  ;;  %v9650_v36 = vpop.f32.mrf.mxu1 }
 0x2d3   : > { %v9648_v30 = vpop.f32.mrf.mxu0 }
 0x2d4   : > { %v9654_v24 = vpop.f32.mrf.mxu1 }
 0x2d5   : > { %v9652_v33 = vpop.f32.mrf.mxu0  ;;  %11273 = vst [vmem:[#allocation18_spill] sm:$0xff] %v9654_v24 }
 0x2d6   : > { %11272 = vst [vmem:[#allocation17_spill] sm:$0xff] %v9652_v33  ;;  %v9656_v62 = vpop.f32.mrf.mxu1 }
 0x2d7   : > { %v3555_v9 = vpop.f32.mrf.mxu0 }
 0x2d8   : > { %v9659_v32 = vadd.f32 %v3555_v9, %v9536_v6  ;;  %v9663_v55 = vpop.f32.mrf.mxu1 }
 0x2d9   : > { %v9661_v23 = vpop.f32.mrf.mxu0  ;;  %11274 = vst [vmem:[#allocation19_spill] sm:$0xff] %v9663_v55 }
 0x2da   : > { %v9665_v27 = vpop.f32.mrf.mxu1 }
 0x2db   : > { %v3561_v37 = vpop.f32.mrf.mxu0 }
 0x2dc   : > { %v9668_v54 = vadd.f32 %v3561_v37, %v9542_v35  ;;  %v9672_v2 = vpop.f32.mrf.mxu1 }
 0x2dd   : > { %v9670_v15 = vpop.f32.mrf.mxu0  ;;  %11275 = vst [vmem:[#allocation20_spill] sm:$0xff] %v9672_v2 }
 0x2de   : > { %v9674_v43 = vpop.f32.mrf.mxu1 }
 0x2df   : > { %v3567_v24 = vpop.f32.mrf.mxu0 }
 0x2e0   : > { %v9677_v6 = vadd.f32 %v3567_v24, %v9548_v48  ;;  %v9681_v20 = vpop.f32.mrf.mxu1 }
 0x2e1   : > { %v9679_v9 = vpop.f32.mrf.mxu0  ;;  %11276 = vst [vmem:[#allocation21_spill] sm:$0xff] %v9681_v20 }
 0x2e2   : > { %v9683_v5 = vpop.f32.mrf.mxu1 }
 0x2e3   : > { %v3573_v55 = vpop.f32.mrf.mxu0 }
 0x2e4   : > { %v9686_v35 = vadd.f32 %v3573_v55, %v9554_v53  ;;  %v9690_v42 = vpop.f32.mrf.mxu1 }
 0x2e5   : > { %v9688_v37 = vpop.f32.mrf.mxu0  ;;  %11277 = vst [vmem:[#allocation22_spill] sm:$0xff] %v9690_v42 }
 0x2e6   : > { %v3716_v61 = vpop.f32.mrf.mxu1 }
 0x2e7   : > { %v3579_v2 = vpop.f32.mrf.mxu0  ;;  %v9696_v48 = vadd.f32 %v3716_v61, %v9562_v22 }
 0x2e8   : > { %v9693_v50 = vadd.f32 %v3579_v2, %v9560_v60  ;;  %v9700_v20 = vpop.f32.mrf.mxu1 }
 0x2e9   : > { %11278 = vst [vmem:[#allocation23_spill] sm:$0xff] %v9696_v48  ;;  %v9698_v24 = vpop.f32.mrf.mxu0  ;;  %11279 = vst [vmem:[#allocation24_spill] sm:$0xff] %v9700_v20 }
 0x2eb   : > { %v3585_v33 = vpop.f32.mrf.mxu0 }
 0x2ec   : > { %v3722_v46 = vpop.f32.mrf.mxu1  ;;  %v9703_v53 = vadd.f32 %v3585_v33, %v9568_v45 }
 0x2ed   : > { %v9706_v55 = vadd.f32 %v3722_v46, %v9570_v40  ;;  %v9708_v42 = vpop.f32.mrf.mxu0 }
 0x2ee   : > { %v9710_v25 = vpop.f32.mrf.mxu1 }
 0x2ef   : > { %11280 = vst [vmem:[#allocation25_spill] sm:$0xff] %v9706_v55  ;;  %11281 = vst [vmem:[#allocation26_spill] sm:$0xff] %v9710_v25  ;;  %v3591_v60 = vpop.f32.mrf.mxu0 }
 0x2f0   : > { %v3728_v2 = vpop.f32.mrf.mxu1  ;;  %v9713_v22 = vadd.f32 %v3591_v60, %v9576_v28 }
 0x2f1   : > { %v9716_v61 = vadd.f32 %v3728_v2, %v9578_v59  ;;  %v9718_v48 = vpop.f32.mrf.mxu0 }
 0x2f2   : > { %v9720_v20 = vpop.f32.mrf.mxu1 }
 0x2f3   : > { %11282 = vst [vmem:[#allocation27_spill] sm:$0xff] %v9716_v61  ;;  %11283 = vst [vmem:[#allocation28_spill] sm:$0xff] %v9720_v20  ;;  %v3597_v45 = vpop.f32.mrf.mxu0 }
 0x2f4   : > { %v3734_v33 = vpop.f32.mrf.mxu1  ;;  %v9723_v40 = vadd.f32 %v3597_v45, %v9584_v13 }
 0x2f5   : > { %v9726_v46 = vadd.f32 %v3734_v33, %v9586_v4  ;;  %v9728_v55 = vpop.f32.mrf.mxu0 }
 0x2f6   : > { %v9730_v38 = vpop.f32.mrf.mxu1 }
 0x2f7   : > { %11284 = vst [vmem:[#allocation29_spill] sm:$0xff] %v9726_v46  ;;  %v3603_v28 = vpop.f32.mrf.mxu0 }
 0x2f8   : > { %v3740_v60 = vpop.f32.mrf.mxu1  ;;  %v9733_v59 = vadd.f32 %v3603_v28, %v9592_v10 }
 0x2f9   : > { %v9736_v2 = vadd.f32 %v3740_v60, %v9594_v57  ;;  %v9738_v61 = vpop.f32.mrf.mxu0 }
 0x2fa   : > { %11286 = vst [vmem:[#allocation31_spill] sm:$0xff] %v9738_v61  ;;  %v9740_v20 = vpop.f32.mrf.mxu1 }
 0x2fb   : > { %11285 = vst [vmem:[#allocation30_spill] sm:$0xff] %v9736_v2  ;;  %11287 = vst [vmem:[#allocation32_spill] sm:$0xff] %v9740_v20  ;;  %v3609_v13 = vpop.f32.mrf.mxu0 }
 0x2fc   : > { %v3746_v45 = vpop.f32.mrf.mxu1  ;;  %v9743_v4 = vadd.f32 %v3609_v13, %v9600_v21 }
 0x2fd   : > { %v9746_v33 = vadd.f32 %v3746_v45, %v9602_v52  ;;  %v9748_v46 = vpop.f32.mrf.mxu0 }
 0x2fe   : > { %11289 = vst [vmem:[#allocation34_spill] sm:$0xff] %v9748_v46  ;;  %v9750_v11 = vpop.f32.mrf.mxu1 }
 0x2ff   : > { %11288 = vst [vmem:[#allocation33_spill] sm:$0xff] %v9746_v33  ;;  %v3615_v10 = vpop.f32.mrf.mxu0 }
 0x300   : > { %v3752_v28 = vpop.f32.mrf.mxu1  ;;  %v9753_v57 = vadd.f32 %v3615_v10, %v9608_v47 }
 0x301   : > { %v9756_v60 = vadd.f32 %v3752_v28, %v9610_v41  ;;  %v9758_v61 = vpop.f32.mrf.mxu0 }
 0x302   : > { %11291 = vst [vmem:[#allocation36_spill] sm:$0xff] %v9758_v61  ;;  %v9760_v2 = vpop.f32.mrf.mxu1 }
 0x303   : > { %11290 = vst [vmem:[#allocation35_spill] sm:$0xff] %v9756_v60  ;;  %v3621_v21 = vpop.f32.mrf.mxu0 }
 0x304   : > { %v3758_v13 = vpop.f32.mrf.mxu1  ;;  %v9763_v52 = vadd.f32 %v3621_v21, %v9616_v44 }
 0x305   : > { %v9766_v45 = vadd.f32 %v3758_v13, %v9618_v31  ;;  %v9768_v46 = vpop.f32.mrf.mxu0 }
 0x306   : > { %11292 = vst [vmem:[#allocation37_spill] sm:$0xff] %v9768_v46  ;;  %v9770_v25 = vpop.f32.mrf.mxu1 }
 0x307   : > { %v3627_v47 = vpop.f32.mrf.mxu0 }
 0x308   : > { %v3764_v10 = vpop.f32.mrf.mxu1  ;;  %v9773_v41 = vadd.f32 %v3627_v47, %v9624_v56 }
 0x309   : > { %v9776_v28 = vadd.f32 %v3764_v10, %v9626_v26  ;;  %v9778_v61 = vpop.f32.mrf.mxu0 }
 0x30a   : > { %11293 = vst [vmem:[#allocation38_spill] sm:$0xff] %v9773_v41  ;;  %11295 = vst [vmem:[#allocation40_spill] sm:$0xff] %v9778_v61  ;;  %v9780_v8 = vpop.f32.mrf.mxu1 }
 0x30b   : > { %11294 = vst [vmem:[#allocation39_spill] sm:$0xff] %v9776_v28  ;;  %11296 = vst [vmem:[#allocation41_spill] sm:$0xff] %v9780_v8  ;;  %v3633_v44 = vpop.f32.mrf.mxu0 }
 0x30c   : > { %v3770_v21 = vpop.f32.mrf.mxu1  ;;  %v9783_v31 = vadd.f32 %v3633_v44, %v9632_v18 }
 0x30d   : > { %v9786_v13 = vadd.f32 %v3770_v21, %v9634_v3  ;;  %v9788_v46 = vpop.f32.mrf.mxu0 }
 0x30e   : > { %11297 = vst [vmem:[#allocation42_spill] sm:$0xff] %v9783_v31  ;;  %11299 = vst [vmem:[#allocation44_spill] sm:$0xff] %v9788_v46  ;;  %v9790_v33 = vpop.f32.mrf.mxu1 }
 0x30f   : > { %11298 = vst [vmem:[#allocation43_spill] sm:$0xff] %v9786_v13  ;;  %11300 = vst [vmem:[#allocation45_spill] sm:$0xff] %v9790_v33  ;;  %v3639_v56 = vpop.f32.mrf.mxu0 }
 0x310   : > { %v3776_v47 = vpop.f32.mrf.mxu1  ;;  %v9793_v26 = vadd.f32 %v3639_v56, %v9640_v58 }
 0x311   : > { %v9796_v10 = vadd.f32 %v3776_v47, %v9642_v29  ;;  %v9798_v8 = vpop.f32.mrf.mxu0 }
 0x312   : > { %11301 = vst [vmem:[#allocation46_spill] sm:$0xff] %v9793_v26  ;;  %11303 = vst [vmem:[#allocation48_spill] sm:$0xff] %v9798_v8  ;;  %v9800_v61 = vpop.f32.mrf.mxu1 }
 0x313   : > { %11302 = vst [vmem:[#allocation47_spill] sm:$0xff] %v9796_v10  ;;  %11304 = vst [vmem:[#allocation49_spill] sm:$0xff] %v9800_v61  ;;  %v3645_v18 = vpop.f32.mrf.mxu0 }
 0x314   : > { %v3782_v44 = vpop.f32.mrf.mxu1  ;;  %v9803_v3 = vadd.f32 %v3645_v18, %v9648_v30 }
 0x315   : > { %v9806_v21 = vadd.f32 %v3782_v44, %v9650_v36  ;;  %v9808_v33 = vpop.f32.mrf.mxu0 }
 0x316   : > { %11305 = vst [vmem:[#allocation50_spill] sm:$0xff] %v9803_v3  ;;  %11307 = vst [vmem:[#allocation52_spill] sm:$0xff] %v9808_v33  ;;  %v9810_v46 = vpop.f32.mrf.mxu1 }
 0x317   : > { %11306 = vst [vmem:[#allocation51_spill] sm:$0xff] %v9806_v21  ;;  %11308 = vst [vmem:[#allocation53_spill] sm:$0xff] %v9810_v46  ;;  %v9812_v58 = vpop.f32.mrf.mxu0 }
 0x318   : > { %v3788_v29 = vpop.f32.mrf.mxu1 }
 0x319   : > { %v9815_v56 = vadd.f32 %v3788_v29, %v9656_v62  ;;  %v9817_v47 = vpop.f32.mrf.mxu0 }
 0x31a   : > { %v9819_v61 = vpop.f32.mrf.mxu1 }
 0x31b   : > { %11309 = vst [vmem:[#allocation54_spill] sm:$0xff] %v9815_v56  ;;  %11310 = vst [vmem:[#allocation55_spill] sm:$0xff] %v9819_v61  ;;  %v9821_v8 = vpop.f32.mrf.mxu0 }
 0x31c   : > { %v3794_v30 = vpop.f32.mrf.mxu1 }
 0x31d   : > { %v9824_v36 = vadd.f32 %v3794_v30, %v9665_v27  ;;  %v9826_v18 = vpop.f32.mrf.mxu0 }
 0x31e   : > { %v9828_v44 = vpop.f32.mrf.mxu1 }
 0x31f   : > { %11311 = vst [vmem:[#allocation56_spill] sm:$0xff] %v9824_v36  ;;  %11312 = vst [vmem:[#allocation57_spill] sm:$0xff] %v9828_v44  ;;  %v9830_v46 = vpop.f32.mrf.mxu0 }
 0x320   : > { %v3800_v33 = vpop.f32.mrf.mxu1 }
 0x321   : > { %v9833_v62 = vadd.f32 %v3800_v33, %v9674_v43  ;;  %v3955_v29 = vpop.f32.mrf.mxu0 }
 0x322   : > { %v9835_v56 = vpop.f32.mrf.mxu1 }
 0x323   : > { %11313 = vst [vmem:[#allocation58_spill] sm:$0xff] %v9833_v62  ;;  %11314 = vst [vmem:[#allocation59_spill] sm:$0xff] %v9835_v56  ;;  %v3959_v61 = vpop.f32.mrf.mxu0  ;;  %v9850_v56 = vpop.permute.xlu1 %4309 }
 0x324   : > { %v3806_v21 = vpop.f32.mrf.mxu1 }
 0x325   : > { %v9838_v3 = vadd.f32 %v3806_v21, %v9683_v5  ;;  %v3961_v27 = vpop.f32.mrf.mxu0  ;;  %v9852_v5 = vpop.permute.xlu0 %4314 }
 0x326   : > { %v9840_v30 = vpop.f32.mrf.mxu1 }
 0x327   : > { %11315 = vst [vmem:[#allocation60_spill] sm:$0xff] %v9838_v3  ;;  %11316 = vst [vmem:[#allocation61_spill] sm:$0xff] %v9840_v30  ;;  %v3965_v36 = vpop.f32.mrf.mxu0  ;;  %v3594_v3 = vadd.f32 %v9718_v48, %v9580_v1  ;;  %v9867_v20 = vpop.permute.xlu1 %4304  ;;  %v3582_v48 = vadd.f32 %v9698_v24, %v9564_v49 }
 0x328   : > { %v9842_v10 = vpop.f32.mrf.mxu1 }
 0x329   : > { %11317 = vst [vmem:[#allocation62_spill] sm:$0xff] %v9842_v10  ;;  %v3967_v44 = vpop.f32.mrf.mxu0  ;;  %v9870_v1 = vpop.permute.xlu0 %4299 }
 0x32a   : > { %v9844_v26 = vpop.f32.mrf.mxu1 }
 0x32b   : > { %11318 = vst [vmem:[#allocation63_spill] sm:$0xff] %v9844_v26  ;;  %v3971_v13 = vpop.f32.mrf.mxu0 }
 0x32c   : > { %v9846_v43 = vpop.f32.mrf.mxu1 }
 0x32d   : > { %11319 = vst [vmem:[#allocation64_spill] sm:$0xff] %v9846_v43  ;;  %v3973_v33 = vpop.f32.mrf.mxu0  ;;  %v3588_v43 = vadd.f32 %v9708_v42, %v9572_v14 }
 0x32e   : > { %v9848_v62 = vpop.f32.mrf.mxu1 }
 0x32f   : > { %11320 = vst [vmem:[#allocation65_spill] sm:$0xff] %v9848_v62  ;;  %v3977_v31 = vpop.f32.mrf.mxu0  ;;  %v3600_v62 = vadd.f32 %v9728_v55, %v9588_v16  ;;  %v4218_v14 = vadd.f32 %v3973_v33, %v3588_v43  ;;  %v3576_v16 = vadd.f32 %v9688_v37, %v9557_v0  ;;  %v4217_v55 = vadd.f32 %v3971_v13, %v9703_v53  ;;  %v9902_v33 = vpop.permute.xlu0 %4289 }
 0x330   : > { %v9854_v21 = vpop.f32.mrf.mxu1  ;;  %v3570_v37 = vadd.f32 %v9679_v9, %v9552_v12 }
 0x331   : > { %11321 = vst [vmem:[#allocation66_spill] sm:$0xff] %v9854_v21  ;;  %v3979_v30 = vpop.f32.mrf.mxu0  ;;  %v4221_v21 = vadd.f32 %v3977_v31, %v9713_v22  ;;  %v4214_v22 = vadd.f32 %v3967_v44, %v3582_v48  ;;  %v4210_v53 = vadd.f32 %v3961_v27, %v3576_v16  ;;  %v4378_v13 = vadd.f32 %v9867_v20, %v4218_v14  ;;  %v9896_v44 = vpop.permute.xlu1 %4294 }
 0x332   : > { %v9858_v10 = vpop.f32.mrf.mxu1  ;;  %v4222_v41 = vadd.f32 %v3979_v30, %v3594_v3  ;;  %v4206_v12 = vadd.f32 %v3955_v29, %v3570_v37  ;;  %v3558_v29 = vadd.f32 %v9661_v23, %v9540_v51 }
 0x333   : > { %11322 = vst [vmem:[#allocation67_spill] sm:$0xff] %v9858_v10  ;;  %v3983_v26 = vpop.f32.mrf.mxu0  ;;  %v4381_v24 = vadd.f32 %v9850_v56, %v4221_v21  ;;  %v4374_v9 = vadd.f32 %v9870_v1, %v4214_v22  ;;  %v4442_v16 = vmax.f32 %v4378_v13, 0.0 }
 0x334   : > { %v9864_v28 = vpop.f32.mrf.mxu1  ;;  %v4225_v60 = vadd.f32 %v3983_v26, %v9723_v40  ;;  %v4382_v31 = vadd.f32 %v9850_v56, %v4222_v41  ;;  %v4198_v51 = vadd.f32 %v9817_v47, %v3558_v29  ;;  %v4366_v23 = vadd.f32 %v9902_v33, %v4206_v12 }
 0x335   : > { %v3985_v7 = vpop.f32.mrf.mxu0 }
 0x336   : > { %v9874_v10 = vpop.f32.mrf.mxu1  ;;  %v4226_v42 = vadd.f32 %v3985_v7, %v3600_v62  ;;  %v4385_v40 = vadd.f32 %v9852_v5, %v4225_v60  ;;  %v4213_v7 = vadd.f32 %v3965_v36, %v9693_v50  ;;  %v4209_v50 = vadd.f32 %v3959_v61, %v9686_v35 }
 0x337   : > { %v3989_v26 = vpop.f32.mrf.mxu0  ;;  %v4377_v36 = vadd.f32 %v9867_v20, %v4217_v55  ;;  %v4446_v48 = vmax.f32 %v4382_v31, 0.0  ;;  %v4445_v35 = vmax.f32 %v4381_v24, 0.0  ;;  %v4197_v55 = vadd.f32 %v9812_v58, %v9659_v32  ;;  %v9934_v58 = vpop.permute.xlu0 %4279 }
 0x338   : > { %v9880_v3 = vpop.f32.mrf.mxu1  ;;  %v4386_v30 = vadd.f32 %v9852_v5, %v4226_v42  ;;  %v9885_v49 = vadd.f32 %v3989_v26, %v9733_v59  ;;  %v3564_v59 = vadd.f32 %v9670_v15, %v9546_v17  ;;  %v4449_v62 = vmax.f32 %v4385_v40, 0.0 }
 0x339   : > { %v9889_v0 = vpop.f32.mrf.mxu0  ;;  %v4205_v17 = vadd.f32 %v9830_v46, %v9677_v6  ;;  %v4373_v15 = vadd.f32 %v9870_v1, %v4213_v7  ;;  %v4370_v42 = vadd.f32 %v9896_v44, %v4210_v53  ;;  %v4201_v6 = vadd.f32 %v9821_v8, %v9668_v54 }
 0x33a   : > { %v9893_v60 = vpop.f32.mrf.mxu1  ;;  %v4450_v41 = vmax.f32 %v4386_v30, 0.0  ;;  %v4202_v14 = vadd.f32 %v9826_v18, %v3564_v59  ;;  %v4369_v46 = vadd.f32 %v9896_v44, %v4209_v50  ;;  %v4441_v40 = vmax.f32 %v4377_v36, 0.0  ;;  %v9929_v30 = vpop.permute.xlu1 %4284 }
 0x33b   : > { %v3995_v43 = vpop.f32.mrf.mxu0  ;;  %v4438_v31 = vmax.f32 %v4374_v9, 0.0  ;;  %v4365_v32 = vadd.f32 %v9902_v33, %v4205_v17  ;;  %v4437_v8 = vmax.f32 %v4373_v15, 0.0  ;;  %v4434_v24 = vmax.f32 %v4370_v42, 0.0  ;;  %v11324_v17 = vld [vmem:[#allocation32_spill] sm:$0xff] }
 0x33c   : > { %v9905_v27 = vpop.f32.mrf.mxu1  ;;  %v9908_v21 = vadd.f32 %v3995_v43, %v9743_v4  ;;  %4550 = vmatprep.subr.mxu0 %v4450_v41  ;;  %v4362_v47 = vadd.f32 %v9929_v30, %v4202_v14  ;;  %v4357_v37 = vadd.f32 %v9934_v58, %v4197_v55  ;;  %v4361_v53 = vadd.f32 %v9929_v30, %v4201_v6 }
 0x33d   : > { %v9913_v61 = vpop.f32.mrf.mxu0  ;;  %4551 = vmatpush1.msra.mxu0 %v4449_v62  ;;  %v4433_v13 = vmax.f32 %v4369_v46, 0.0  ;;  %v3749_v59 = vadd.f32 %v9750_v11, %v9606_v19  ;;  %v4358_v50 = vadd.f32 %v9934_v58, %v4198_v51  ;;  %v4430_v43 = vmax.f32 %v4366_v23, 0.0  ;;  %v11323_v19 = vld [vmem:[#allocation3_spill] sm:$0xff] }
 0x33e   : > { %v4134_v4 = vpop.f32.mrf.mxu1  ;;  %4552 = vmatprep.subr.mxu0 %v4446_v48  ;;  %v3737_v11 = vadd.f32 %v9730_v38, %v9590_v34  ;;  %v3743_v15 = vadd.f32 %v11324_v17, %v11323_v19  ;;  %v4426_v14 = vmax.f32 %v4362_v47, 0.0  ;;  %v4421_v42 = vmax.f32 %v4357_v37, 0.0  ;;  %v11327_v34 = vld [vmem:[#allocation38_spill] sm:$0xff]  ;;  %v11338_v19 = vld [vmem:[#allocation67_spill] sm:$0xff] }
 0x33f   : > { %v4001_v26 = vpop.f32.mrf.mxu0  ;;  %4553 = vmatpush1.msra.mxu0 %v4445_v35  ;;  %v11331_v47 = vld [vmem:[#allocation26_spill] sm:$0xff]  ;;  %v11339_v17 = vld [vmem:[#allocation43_spill] sm:$0xff] }
 0x340   : > { %v4138_v18 = vpop.f32.mrf.mxu1  ;;  %v9927_v22 = vadd.f32 %v4001_v26, %v9753_v57  ;;  %4554 = vmatprep.subr.mxu0 %v4442_v16  ;;  %v3755_v57 = vadd.f32 %v9760_v2, %v9614_v63  ;;  %v3761_v63 = vadd.f32 %v9770_v25, %v9622_v39  ;;  %v4429_v2 = vmax.f32 %v4365_v32, 0.0  ;;  %v11334_v37 = vld [vmem:[#allocation6_spill] sm:$0xff] }
 0x341   : > { %v9932_v54 = vpop.f32.mrf.mxu0  ;;  %4555 = vmatpush1.msra.mxu0 %v4441_v40  ;;  %v4425_v25 = vmax.f32 %v4361_v53, 0.0  ;;  %v4220_v39 = vadd.f32 %v4134_v4, %v3749_v59  ;;  %v4422_v26 = vmax.f32 %v4358_v50, 0.0  ;;  %v4216_v51 = vadd.f32 %v9893_v60, %v3743_v15  ;;  %v11335_v53 = vld [vmem:[#allocation28_spill] sm:$0xff] }
 0x342   : > { %v4140_v7 = vpop.f32.mrf.mxu1  ;;  %4556 = vmatprep.subr.mxu0 %v4438_v31 }
 0x343   : > { %v4007_v41 = vpop.f32.mrf.mxu0  ;;  %4557 = vmatpush1.msra.mxu0 %v4437_v8  ;;  %v4224_v12 = vadd.f32 %v4140_v7, %v3755_v57  ;;  %v11330_v8 = vld [vmem:[#allocation7_spill] sm:$0xff]  ;;  %v4380_v59 = vadd.f32 %v9867_v20, %v4220_v39 }
 0x344   : > { %v4144_v36 = vpop.f32.mrf.mxu1  ;;  %v9945_v62 = vadd.f32 %v4007_v41, %v9763_v52  ;;  %4558 = vmatprep.subr.mxu0 %v4434_v24  ;;  %v11325_v52 = vld [vmem:[#allocation35_spill] sm:$0xff]  ;;  %v3725_v7 = vadd.f32 %v11331_v47, %v11330_v8  ;;  %v11332_v24 = vld [vmem:[#allocation30_spill] sm:$0xff]  ;;  %v4212_v41 = vadd.f32 %v9874_v10, %v3737_v11  ;;  %v4376_v11 = vadd.f32 %v9870_v1, %v4216_v51 }
 0x345   : > { %v4227_v9 = vadd.f32 %v4144_v36, %v9766_v45  ;;  %v9950_v48 = vpop.f32.mrf.mxu0  ;;  %4559 = vmatpush1.msra.mxu0 %v4433_v13  ;;  %v4223_v35 = vadd.f32 %v4138_v18, %v11325_v52  ;;  %v11326_v45 = vld [vmem:[#allocation33_spill] sm:$0xff]  ;;  %v4384_v23 = vadd.f32 %v9850_v56, %v4224_v12  ;;  %v11328_v18 = vld [vmem:[#allocation39_spill] sm:$0xff]  ;;  %v4215_v60 = vadd.f32 %v9880_v3, %v11332_v24  ;;  %v11337_v12 = vld [vmem:[#allocation42_spill] sm:$0xff] }
 0x346   : > { %v4146_v29 = vpop.f32.mrf.mxu1  ;;  %4560 = vmatprep.subr.mxu0 %v4430_v43  ;;  %v4219_v6 = vadd.f32 %v9905_v27, %v11326_v45  ;;  %v9974_v27 = vld [vmem:[%s11153_s7] sm:$0xff]  ;;  %v3731_v13 = vadd.f32 %v11335_v53, %v11334_v37  ;;  %v11336_v43 = vld [vmem:[#allocation29_spill] sm:$0xff]  ;;  %v11346_v45 = vld [vmem:[#allocation24_spill] sm:$0xff] }
 0x347   : > { %v4228_v16 = vadd.f32 %v4146_v29, %v3761_v63  ;;  %v4013_v55 = vpop.f32.mrf.mxu0  ;;  %4561 = vmatpush1.msra.mxu0 %v4429_v2  ;;  %v4387_v46 = vadd.f32 %v9852_v5, %v4227_v9  ;;  %v4383_v57 = vadd.f32 %v9850_v56, %v4223_v35  ;;  %v4211_v63 = vadd.f32 %v9864_v28, %v11336_v43  ;;  %v10006_v35 = vld [vmem:[%s11153_s7 + $0x8] sm:$0xff]  ;;  %v11350_v24 = vld [vmem:[#allocation46_spill] sm:$0xff] }
 0x348   : > { %v4150_v38 = vpop.f32.mrf.mxu1  ;;  %v9961_v40 = vadd.f32 %v4013_v55, %v11327_v34  ;;  %4562 = vmatprep.subr.mxu0 %v4426_v14  ;;  %v4379_v3 = vadd.f32 %v9867_v20, %v4219_v6  ;;  %v4208_v10 = vadd.f32 %v11338_v19, %v3731_v13  ;;  %v4448_v52 = vmax.f32 %v4384_v23, 0.0  ;;  %v11342_v29 = vld [vmem:[#allocation27_spill] sm:$0xff]  ;;  %v11343_v14 = vld [vmem:[#allocation66_spill] sm:$0xff]  ;;  %v11345_v55 = vld [vmem:[#allocation5_spill] sm:$0xff] }
 0x349   : > { %v4388_v4 = vadd.f32 %v9852_v5, %v4228_v16  ;;  %v9967_v31 = vadd.f32 %v4150_v38, %v11328_v18  ;;  %v9969_v32 = vpop.f32.mrf.mxu0  ;;  %4563 = vmatpush1.msra.mxu0 %v4425_v25  ;;  %v4451_v2 = vmax.f32 %v4387_v46, 0.0  ;;  %v11341_v20 = vmov 0.0   ;;  %v11347_v46 = vld [vmem:[#allocation65_spill] sm:$0xff]  ;;  %v11352_v53 = vld [vmem:[#allocation47_spill] sm:$0xff] }
 0x34a   : > { %v9981_v5 = vpop.f32.mrf.mxu1  ;;  %4564 = vmatprep.subr.mxu0 %v4422_v26  ;;  %v4375_v25 = vadd.f32 %v9870_v1, %v4215_v60  ;;  %v4447_v39 = vmax.f32 %v4383_v57, 0.0  ;;  %v3719_v6 = vadd.f32 %v11346_v45, %v11345_v55  ;;  %v4204_v38 = vadd.f32 %v11347_v46, %v3725_v7  ;;  %v11348_v23 = vld [vmem:[#allocation25_spill] sm:$0xff]  ;;  %v11351_v7 = vld [vmem:[#allocation63_spill] sm:$0xff] }
 0x34b   : > { %11329 = vst [vmem:[#allocation3_spill] sm:$0xff] %v9967_v31  ;;  %11333 = vst [vmem:[#allocation32_spill] sm:$0xff] %v9981_v5  ;;  %v4452_v50 = vmax.f32 %v4388_v4, 0.0  ;;  %v4019_v36 = vpop.f32.mrf.mxu0  ;;  %4565 = vmatpush1.msra.mxu0 %v4421_v42  ;;  %v4207_v42 = vadd.f32 %v11343_v14, %v11342_v29  ;;  %v4372_v34 = vadd.f32 %v9896_v44, %v4212_v41  ;;  %v4444_v26 = vmax.f32 %v4380_v59, 0.0  ;;  %v11349_v4 = vld [vmem:[#allocation64_spill] sm:$0xff]  ;;  %v11358_v14 = vld [vmem:[#allocation51_spill] sm:$0xff] }
 0x34c   : > { %v4156_v56 = vpop.f32.mrf.mxu1  ;;  %v9991_v9 = vadd.f32 %v4019_v36, %v11337_v12  ;;  %7267 = vmatmul.mubr.msk.f32.vlgmr.msra.gmra.mxu0 %vm4509_vm10, %v9974_v27  ;;  %v4203_v18 = vadd.f32 %v11349_v4, %v11348_v23  ;;  %v4371_v8 = vadd.f32 %v9896_v44, %v4211_v63  ;;  %v4443_v1 = vmax.f32 %v4379_v3, 0.0  ;;  %v4455_v44 = vld [vmem:[%s11153_s7 + $0x10] sm:$0xff]  ;;  %v11355_v36 = vld [vmem:[#allocation62_spill] sm:$0xff] }
 0x34d   : > { %v9998_v15 = vadd.f32 %v4156_v56, %v11339_v17  ;;  %4663 = vmatprep.subr.mxu1 %v4452_v50  ;;  %v10000_v28 = vpop.f32.mrf.mxu0  ;;  %4604 = vmatprep.mubr.f32.mxu0 %v11341_v20  ;;  %v4200_v57 = vadd.f32 %v11351_v7, %v3719_v6  ;;  %v4368_v37 = vadd.f32 %v9902_v33, %v4208_v10  ;;  %v4440_v41 = vmax.f32 %v4376_v11, 0.0  ;;  %v11354_v50 = vld [vmem:[#allocation23_spill] sm:$0xff] }
 0x34e   : > { %v10011_v16 = vpop.f32.mrf.mxu1  ;;  %4664 = vmatpush1.msra.mxu1 %v4451_v2  ;;  %v4199_v43 = vadd.f32 %v11355_v36, %v11354_v50  ;;  %v4367_v63 = vadd.f32 %v9902_v33, %v4207_v42  ;;  %v4439_v3 = vmax.f32 %v4375_v25, 0.0  ;;  %v4364_v56 = vadd.f32 %v9929_v30, %v4204_v38  ;;  %v11367_v50 = vld [vmem:[#allocation60_spill] sm:$0xff] }
 0x34f   : > { %11340 = vst [vmem:[#allocation35_spill] sm:$0xff] %v9998_v15  ;;  %11344 = vst [vmem:[#allocation33_spill] sm:$0xff] %v10011_v16  ;;  %4665 = vmatprep.subr.mxu1 %v4448_v52  ;;  %v4025_v51 = vpop.f32.mrf.mxu0  ;;  %v4436_v12 = vmax.f32 %v4372_v34, 0.0  ;;  %v4363_v10 = vadd.f32 %v9929_v30, %v4203_v18  ;;  %v4435_v11 = vmax.f32 %v4371_v8, 0.0  ;;  %v11357_v52 = vld [vmem:[#allocation50_spill] sm:$0xff]  ;;  %v4360_v33 = vadd.f32 %v9934_v58, %v4200_v57  ;;  %v4456_v30 = vld [vmem:[%s11153_s7 + $0x18] sm:$0xff] }
 0x350   : > { %v4162_v47 = vpop.f32.mrf.mxu1  ;;  %4666 = vmatpush1.msra.mxu1 %v4447_v39  ;;  %v10021_v60 = vadd.f32 %v4025_v51, %v11350_v24  ;;  %7268 = vmatmul.mubr.msk.f32.gmra.mxu0 %vm4509_vm10, %v10006_v35  ;;  %v4432_v25 = vmax.f32 %v4368_v37, 0.0  ;;  %v4359_v39 = vadd.f32 %v9934_v58, %v4199_v43  ;;  %v4431_v55 = vmax.f32 %v4367_v63, 0.0  ;;  %v11361_v34 = vld [vmem:[#allocation54_spill] sm:$0xff]  ;;  %v11363_v8 = vld [vmem:[#allocation56_spill] sm:$0xff] }
 0x351   : > { %v10028_v13 = vadd.f32 %v4162_v47, %v11352_v53  ;;  %4667 = vmatprep.subr.mxu1 %v4444_v26  ;;  %v10030_v59 = vpop.f32.mrf.mxu0  ;;  %4610 = vmatprep.mubr.f32.mxu0 %v11341_v20  ;;  %v4428_v6 = vmax.f32 %v4364_v56, 0.0  ;;  %v4427_v46 = vmax.f32 %v4363_v10, 0.0  ;;  %v4424_v51 = vmax.f32 %v4360_v33, 0.0  ;;  %v4457_v58 = vld [vmem:[%s11153_s7 + $0x20] sm:$0xff]  ;;  %v4458_v47 = vld [vmem:[%s11153_s7 + $0x28] sm:$0xff] }
 0x352   : > { %v10039_v2 = vpop.f32.mrf.mxu1  ;;  %4668 = vmatpush1.msra.mxu1 %v4443_v1  ;;  %v4423_v23 = vmax.f32 %v4359_v39, 0.0  ;;  %v11365_v57 = vld [vmem:[#allocation58_spill] sm:$0xff] }
 0x353   : > { %11353 = vst [vmem:[#allocation38_spill] sm:$0xff] %v10028_v13  ;;  %11356 = vst [vmem:[#allocation39_spill] sm:$0xff] %v10039_v2  ;;  %4669 = vmatprep.subr.mxu1 %v4440_v41  ;;  %v4031_v19 = vpop.f32.mrf.mxu0 }
 0x354   : > { %v4168_v17 = vpop.f32.mrf.mxu1  ;;  %4670 = vmatpush1.msra.mxu1 %v4439_v3  ;;  %v10044_v29 = vadd.f32 %v4031_v19, %v11357_v52  ;;  %7269 = vmatmul.mubr.msk.f32.gmra.mxu0 %vm4509_vm10, %v4455_v44 }
 0x355   : > { %v10049_v42 = vadd.f32 %v4168_v17, %v11358_v14  ;;  %4671 = vmatprep.subr.mxu1 %v4436_v12  ;;  %4616 = vmatprep.mubr.f32.mxu0 %v11341_v20 }
 0x356   : > { %v10056_v45 = vpop.f32.mrf.mxu1  ;;  %4672 = vmatpush1.msra.mxu1 %v4435_v11 }
 0x357   : > { %11359 = vst [vmem:[#allocation7_spill] sm:$0xff] %v10049_v42  ;;  %11360 = vst [vmem:[#allocation26_spill] sm:$0xff] %v10056_v45  ;;  %4673 = vmatprep.subr.mxu1 %v4432_v25 }
 0x358   : > { %v4174_v38 = vpop.f32.mrf.mxu1  ;;  %4674 = vmatpush1.msra.mxu1 %v4431_v55  ;;  %7270 = vmatmul.mubr.msk.f32.gmra.mxu0 %vm4509_vm10, %v4456_v30  ;;  %v10132_v55 = vpop.permute.xlu1 %4506 }
 0x359   : > { %v10060_v26 = vadd.f32 %v4174_v38, %v11361_v34  ;;  %4675 = vmatprep.subr.mxu1 %v4428_v6  ;;  %4622 = vmatprep.mubr.f32.mxu0 %v11341_v20  ;;  %v10136_v38 = vpop.permute.xlu0 %4501 }
 0x35a   : > { %v10066_v4 = vpop.f32.mrf.mxu1  ;;  %4676 = vmatpush1.msra.mxu1 %v4427_v46 }
 0x35b   : > { %11362 = vst [vmem:[#allocation30_spill] sm:$0xff] %v10060_v26  ;;  %4677 = vmatprep.subr.mxu1 %v4424_v51 }
 0x35c   : > { %v4180_v18 = vpop.f32.mrf.mxu1  ;;  %4678 = vmatpush1.msra.mxu1 %v4423_v23  ;;  %7271 = vmatmul.mubr.msk.f32.gmra.mxu0 %vm4509_vm10, %v4457_v58 }
 0x35d   : > { %v10070_v1 = vadd.f32 %v4180_v18, %v11363_v8  ;;  %7275 = vmatmul.mubr.msk.f32.vlgmr.msra.gmra.mxu1 %vm4509_vm10, %v9974_v27  ;;  %4628 = vmatprep.mubr.f32.mxu0 %v11341_v20  ;;  %v4459_v27 = vld [vmem:[%s11153_s7 + $0x30] sm:$0xff]  ;;  %v10142_v18 = vpop.permute.xlu1 %4496 }
 0x35e   : > { %v10078_v24 = vpop.f32.mrf.mxu1  ;;  %4717 = vmatprep.mubr.f32.mxu1 %v11341_v20 }
 0x35f   : > { %11364 = vst [vmem:[#allocation6_spill] sm:$0xff] %v10070_v1 }
 0x360   : > { %v4186_v7 = vpop.f32.mrf.mxu1  ;;  %7272 = vmatmul.mubr.msk.f32.gmra.mxu0 %vm4509_vm10, %v4458_v47 }
 0x361   : > { %v10083_v37 = vadd.f32 %v4186_v7, %v11365_v57  ;;  %7276 = vmatmul.mubr.msk.f32.gmra.mxu1 %vm4509_vm10, %v10006_v35  ;;  %4634 = vmatprep.mubr.f32.mxu0 %v11341_v20  ;;  %v4460_v35 = vld [vmem:[%s11153_s7 + $0x38] sm:$0xff]  ;;  %v10146_v7 = vpop.permute.xlu0 %4491  ;;  %v10157_v42 = vpop.permute.xlu1 %4486 }
 0x362   : > { %v10091_v53 = vpop.f32.mrf.mxu1  ;;  %4723 = vmatprep.mubr.f32.mxu1 %v11341_v20 }
 0x363   : > { %11366 = vst [vmem:[#allocation28_spill] sm:$0xff] %v10083_v37 }
 0x364   : > { %v4192_v41 = vpop.f32.mrf.mxu1  ;;  %7273 = vmatmul.mubr.msk.f32.gmra.mxu0 %vm4509_vm10, %v4459_v27 }
 0x365   : > { %v10096_v36 = vadd.f32 %v4192_v41, %v11367_v50  ;;  %7277 = vmatmul.mubr.msk.f32.gmra.mxu1 %vm4509_vm10, %v4455_v44  ;;  %4640 = vmatprep.mubr.f32.mxu0 %v11341_v20  ;;  %v10116_v44 = vpop.f32.mrf.mxu0 }
 0x366   : > { %4729 = vmatprep.mubr.f32.mxu1 %v11341_v20  ;;  %v10124_v17 = vpop.f32.mrf.mxu1 }
 0x368   : > { %7274 = vmatmul.mubr.msk.f32.gmra.mxu0 %vm4509_vm10, %v4460_v35 }
 0x369   : > { %7278 = vmatmul.mubr.msk.f32.gmra.mxu1 %vm4509_vm10, %v4456_v30  ;;  %4938 = vmatprep.mubr.f32.mxu0 %v11341_v20 }
 0x36a   : > { %4735 = vmatprep.mubr.f32.mxu1 %v11341_v20 }
 0x36d   : > { %7279 = vmatmul.mubr.msk.f32.gmra.mxu1 %vm4509_vm10, %v4457_v58 }
 0x36e   : > { %4741 = vmatprep.mubr.f32.mxu1 %v11341_v20 }
 0x371   : > { %7280 = vmatmul.mubr.msk.f32.gmra.mxu1 %vm4509_vm10, %v4458_v47 }
 0x372   : > { %4747 = vmatprep.mubr.f32.mxu1 %v11341_v20 }
 0x375   : > { %7281 = vmatmul.mubr.msk.f32.gmra.mxu1 %vm4509_vm10, %v4459_v27 }
 0x376   : > { %4753 = vmatprep.mubr.f32.mxu1 %v11341_v20 }
 0x379   : > { %7282 = vmatmul.mubr.msk.f32.gmra.mxu1 %vm4509_vm10, %v4460_v35 }
 0x37a   : > { %5051 = vmatprep.mubr.f32.mxu1 %v11341_v20 }
 0x40c   : > { %v10118_v43 = vpop.f32.mrf.mxu0 }
 0x40e   : > { %v10120_v63 = vpop.f32.mrf.mxu0 }
 0x410   : > { %v10122_v3 = vpop.f32.mrf.mxu0 }
 0x412   : > { %v4608_v56 = vpop.f32.mrf.mxu0 }
 0x414   : > { %v4612_v12 = vpop.f32.mrf.mxu0 }
 0x416   : > { %v4614_v19 = vpop.f32.mrf.mxu0 }
 0x418   : > { %v4618_v10 = vpop.f32.mrf.mxu0 }
 0x419   : > { %v4619_v45 = vadd.f32 %v4618_v10, %v10157_v42 }
 0x41a   : > { %v4620_v11 = vpop.f32.mrf.mxu0 }
 0x41b   : > { %v4621_v37 = vadd.f32 %v4620_v11, %v10157_v42 }
 0x41c   : > { %v4624_v52 = vpop.f32.mrf.mxu0 }
 0x41d   : > { %v10126_v33 = vpop.f32.mrf.mxu1  ;;  %v4773_v11 = vmax.f32 %v4621_v37, 0.0 }
 0x41e   : > { %v4626_v14 = vpop.f32.mrf.mxu0 }
 0x41f   : > { %v10128_v25 = vpop.f32.mrf.mxu1 }
 0x420   : > { %v4630_v30 = vpop.f32.mrf.mxu0 }
 0x421   : > { %v10130_v39 = vpop.f32.mrf.mxu1  ;;  %v4631_v16 = vadd.f32 %v4630_v30, %v10142_v18 }
 0x422   : > { %v4632_v6 = vpop.f32.mrf.mxu0 }
 0x423   : > { %v10134_v46 = vpop.f32.mrf.mxu1  ;;  %v4633_v13 = vadd.f32 %v4632_v6, %v10142_v18  ;;  %v4780_v30 = vmax.f32 %v4631_v16, 0.0 }
 0x424   : > { %v4636_v34 = vpop.f32.mrf.mxu0 }
 0x425   : > { %v10138_v51 = vpop.f32.mrf.mxu1  ;;  %v4637_v31 = vadd.f32 %v4636_v34, %v10136_v38 }
 0x426   : > { %v4638_v58 = vpop.f32.mrf.mxu0 }
 0x427   : > { %v10140_v23 = vpop.f32.mrf.mxu1  ;;  %v4639_v50 = vadd.f32 %v4638_v58, %v10136_v38  ;;  %v10161_v58 = vpop.permute.xlu0 %4481  ;;  %v4784_v34 = vmax.f32 %v4637_v31, 0.0 }
 0x428   : > { %v4642_v8 = vpop.f32.mrf.mxu0 }
 0x429   : > { %v10144_v47 = vpop.f32.mrf.mxu1  ;;  %v4643_v57 = vadd.f32 %v4642_v8, %v10132_v55  ;;  %v4627_v8 = vadd.f32 %v4626_v14, %v10146_v7  ;;  %v4785_v1 = vmax.f32 %v4639_v50, 0.0  ;;  %v4615_v14 = vadd.f32 %v4614_v19, %v10161_v58 }
 0x42a   : > { %v4644_v27 = vpop.f32.mrf.mxu0  ;;  %v4772_v19 = vmax.f32 %v4619_v45, 0.0 }
 0x42b   : > { %v10149_v41 = vpop.f32.mrf.mxu1  ;;  %v4645_v35 = vadd.f32 %v4644_v27, %v10132_v55  ;;  %v4788_v26 = vmax.f32 %v4643_v57, 0.0  ;;  %v4625_v27 = vadd.f32 %v4624_v52, %v10146_v7  ;;  %v4777_v57 = vmax.f32 %v4627_v8, 0.0 }
 0x42c   : > { %v4613_v52 = vadd.f32 %v4612_v12, %v10161_v58  ;;  %v4769_v8 = vmax.f32 %v4615_v14, 0.0 }
 0x42d   : > { %v10154_v15 = vpop.f32.mrf.mxu1  ;;  %v4789_v5 = vmax.f32 %v4645_v35, 0.0  ;;  %v4781_v35 = vmax.f32 %v4633_v13, 0.0  ;;  %v4776_v31 = vmax.f32 %v4625_v27, 0.0 }
 0x42f   : > { %v4739_v2 = vpop.f32.mrf.mxu1  ;;  %4890 = vmatprep.subr.mxu0 %v4789_v5  ;;  %v10167_v5 = vpop.permute.xlu1 %4476 }
 0x430   : > { %4891 = vmatpush1.msra.mxu0 %v4788_v26  ;;  %v4609_v26 = vadd.f32 %v4608_v56, %v10167_v5  ;;  %v4607_v16 = vadd.f32 %v10122_v3, %v10167_v5  ;;  %v4768_v56 = vmax.f32 %v4613_v52, 0.0 }
 0x431   : > { %v4743_v6 = vpop.f32.mrf.mxu1  ;;  %4892 = vmatprep.subr.mxu0 %v4785_v1  ;;  %v10171_v1 = vpop.permute.xlu0 %4471 }
 0x432   : > { %4893 = vmatpush1.msra.mxu0 %v4784_v34  ;;  %v4603_v10 = vadd.f32 %v10120_v63, %v10171_v1  ;;  %v4601_v12 = vadd.f32 %v10118_v43, %v10171_v1  ;;  %v4765_v37 = vmax.f32 %v4609_v26, 0.0  ;;  %v7283_v43 = vld [vmem:[%s11153_s7 + $0x40] sm:$0xff] }
 0x433   : > { %v4745_v50 = vpop.f32.mrf.mxu1  ;;  %4894 = vmatprep.subr.mxu0 %v4781_v35  ;;  %v4764_v35 = vmax.f32 %v4607_v16, 0.0 }
 0x434   : > { %4895 = vmatpush1.msra.mxu0 %v4780_v30  ;;  %v4761_v30 = vmax.f32 %v4603_v10, 0.0 }
 0x435   : > { %v4749_v13 = vpop.f32.mrf.mxu1  ;;  %4896 = vmatprep.subr.mxu0 %v4777_v57  ;;  %v4760_v57 = vmax.f32 %v4601_v12, 0.0 }
 0x436   : > { %4897 = vmatpush1.msra.mxu0 %v4776_v31  ;;  %v4750_v52 = vadd.f32 %v4749_v13, %v10136_v38  ;;  %v4746_v31 = vadd.f32 %v4745_v50, %v10142_v18  ;;  %v4738_v50 = vadd.f32 %v10154_v15, %v10146_v7  ;;  %v7285_v15 = vld [vmem:[%s11153_s7 + $0x50] sm:$0xff] }
 0x437   : > { %v4751_v34 = vpop.f32.mrf.mxu1  ;;  %4898 = vmatprep.subr.mxu0 %v4773_v11  ;;  %v4744_v11 = vadd.f32 %v4743_v6, %v10142_v18  ;;  %v4734_v18 = vadd.f32 %v10149_v41, %v10157_v42 }
 0x438   : > { %4899 = vmatpush1.msra.mxu0 %v4772_v19  ;;  %v4752_v63 = vadd.f32 %v4751_v34, %v10136_v38  ;;  %v4740_v19 = vadd.f32 %v4739_v2, %v10146_v7  ;;  %v7284_v38 = vld [vmem:[%s11153_s7 + $0x48] sm:$0xff]  ;;  %v4786_v13 = vmax.f32 %v4750_v52, 0.0  ;;  %v4783_v6 = vmax.f32 %v4746_v31, 0.0 }
 0x439   : > { %v4755_v27 = vpop.f32.mrf.mxu1  ;;  %4900 = vmatprep.subr.mxu0 %v4769_v8  ;;  %v4732_v2 = vadd.f32 %v10144_v47, %v10157_v42  ;;  %v4782_v10 = vmax.f32 %v4744_v11, 0.0  ;;  %v4728_v8 = vadd.f32 %v10140_v23, %v10161_v58  ;;  %v4726_v7 = vadd.f32 %v10138_v51, %v10161_v58 }
 0x43a   : > { %4901 = vmatpush1.msra.mxu0 %v4768_v56  ;;  %v4756_v45 = vadd.f32 %v4755_v27, %v10132_v55  ;;  %v4779_v34 = vmax.f32 %v4740_v19, 0.0  ;;  %v4778_v41 = vmax.f32 %v4738_v50, 0.0  ;;  %v4722_v42 = vadd.f32 %v10134_v46, %v10167_v5  ;;  %v7286_v46 = vld [vmem:[%s11153_s7 + $0x58] sm:$0xff]  ;;  %v7287_v27 = vld [vmem:[%s11153_s7 + $0x60] sm:$0xff]  ;;  %v10272_v50 = vpop.permute.xlu1 %4847 }
 0x43b   : > { %v4757_v3 = vpop.f32.mrf.mxu1  ;;  %4902 = vmatprep.subr.mxu0 %v4765_v37  ;;  %v4775_v47 = vmax.f32 %v4734_v18, 0.0  ;;  %v4720_v23 = vadd.f32 %v10130_v39, %v10167_v5  ;;  %v4774_v12 = vmax.f32 %v4732_v2, 0.0  ;;  %v4716_v56 = vadd.f32 %v10128_v25, %v10171_v1 }
 0x43c   : > { %v4758_v14 = vadd.f32 %v4757_v3, %v10132_v55  ;;  %4903 = vmatpush1.msra.mxu0 %v4764_v35  ;;  %v4790_v16 = vmax.f32 %v4756_v45, 0.0  ;;  %v4787_v55 = vmax.f32 %v4752_v63, 0.0  ;;  %v4771_v37 = vmax.f32 %v4728_v8, 0.0 }
 0x43d   : > { %4904 = vmatprep.subr.mxu0 %v4761_v30  ;;  %v4714_v51 = vadd.f32 %v10126_v33, %v10171_v1  ;;  %v4770_v58 = vmax.f32 %v4726_v7, 0.0  ;;  %v4767_v39 = vmax.f32 %v4722_v42, 0.0  ;;  %v4766_v5 = vmax.f32 %v4720_v23, 0.0  ;;  %v7288_v33 = vld [vmem:[%s11153_s7 + $0x68] sm:$0xff]  ;;  %v7289_v1 = vld [vmem:[%s11153_s7 + $0x70] sm:$0xff]  ;;  %v7290_v30 = vld [vmem:[%s11153_s7 + $0x78] sm:$0xff] }
 0x43e   : > { %v4791_v26 = vmax.f32 %v4758_v14, 0.0  ;;  %4905 = vmatpush1.msra.mxu0 %v4760_v57  ;;  %v4763_v25 = vmax.f32 %v4716_v56, 0.0 }
 0x43f   : > { %7299 = vmatmul.mubr.msk.f32.vlgmr.msra.gmra.mxu0 %vm4509_vm10, %v7283_v43  ;;  %v4762_v35 = vmax.f32 %v4714_v51, 0.0 }
 0x440   : > { %5003 = vmatprep.subr.mxu1 %v4791_v26  ;;  %4944 = vmatprep.mubr.f32.mxu0 %v11341_v20 }
 0x441   : > { %5004 = vmatpush1.msra.mxu1 %v4790_v16 }
 0x442   : > { %5005 = vmatprep.subr.mxu1 %v4787_v55 }
 0x443   : > { %5006 = vmatpush1.msra.mxu1 %v4786_v13  ;;  %7300 = vmatmul.mubr.msk.f32.gmra.mxu0 %vm4509_vm10, %v7284_v38 }
 0x444   : > { %5007 = vmatprep.subr.mxu1 %v4783_v6  ;;  %4950 = vmatprep.mubr.f32.mxu0 %v11341_v20  ;;  %v10276_v6 = vpop.permute.xlu0 %4842 }
 0x445   : > { %5008 = vmatpush1.msra.mxu1 %v4782_v10 }
 0x446   : > { %5009 = vmatprep.subr.mxu1 %v4779_v34 }
 0x447   : > { %5010 = vmatpush1.msra.mxu1 %v4778_v41  ;;  %7301 = vmatmul.mubr.msk.f32.gmra.mxu0 %vm4509_vm10, %v7285_v15 }
 0x448   : > { %5011 = vmatprep.subr.mxu1 %v4775_v47  ;;  %4956 = vmatprep.mubr.f32.mxu0 %v11341_v20  ;;  %v10286_v42 = vpop.permute.xlu0 %4832 }
 0x449   : > { %5012 = vmatpush1.msra.mxu1 %v4774_v12 }
 0x44a   : > { %5013 = vmatprep.subr.mxu1 %v4771_v37 }
 0x44b   : > { %5014 = vmatpush1.msra.mxu1 %v4770_v58  ;;  %7302 = vmatmul.mubr.msk.f32.gmra.mxu0 %vm4509_vm10, %v7286_v46 }
 0x44c   : > { %5015 = vmatprep.subr.mxu1 %v4767_v39  ;;  %4962 = vmatprep.mubr.f32.mxu0 %v11341_v20 }
 0x44d   : > { %5016 = vmatpush1.msra.mxu1 %v4766_v5 }
 0x44e   : > { %5017 = vmatprep.subr.mxu1 %v4763_v25 }
 0x44f   : > { %5018 = vmatpush1.msra.mxu1 %v4762_v35  ;;  %7303 = vmatmul.mubr.msk.f32.gmra.mxu0 %vm4509_vm10, %v7287_v27 }
 0x450   : > { %7307 = vmatmul.mubr.msk.f32.vlgmr.msra.gmra.mxu1 %vm4509_vm10, %v7283_v43  ;;  %4968 = vmatprep.mubr.f32.mxu0 %v11341_v20 }
 0x451   : > { %5057 = vmatprep.mubr.f32.mxu1 %v11341_v20 }
 0x453   : > { %7304 = vmatmul.mubr.msk.f32.gmra.mxu0 %vm4509_vm10, %v7288_v33 }
 0x454   : > { %7308 = vmatmul.mubr.msk.f32.gmra.mxu1 %vm4509_vm10, %v7284_v38  ;;  %4974 = vmatprep.mubr.f32.mxu0 %v11341_v20 }
 0x455   : > { %5063 = vmatprep.mubr.f32.mxu1 %v11341_v20 }
 0x457   : > { %7305 = vmatmul.mubr.msk.f32.gmra.mxu0 %vm4509_vm10, %v7289_v1 }
 0x458   : > { %7309 = vmatmul.mubr.msk.f32.gmra.mxu1 %vm4509_vm10, %v7285_v15  ;;  %4980 = vmatprep.mubr.f32.mxu0 %v11341_v20  ;;  %v10282_v15 = vpop.permute.xlu1 %4837 }
 0x459   : > { %5069 = vmatprep.mubr.f32.mxu1 %v11341_v20 }
 0x45b   : > { %7306 = vmatmul.mubr.msk.f32.gmra.mxu0 %vm4509_vm10, %v7290_v30 }
 0x45c   : > { %7310 = vmatmul.mubr.msk.f32.gmra.mxu1 %vm4509_vm10, %v7286_v46  ;;  %5278 = vmatprep.mubr.f32.mxu0 %v11341_v20  ;;  %v10297_v5 = vpop.permute.xlu1 %4827 }
 0x45d   : > { %5075 = vmatprep.mubr.f32.mxu1 %v11341_v20 }
 0x460   : > { %7311 = vmatmul.mubr.msk.f32.gmra.mxu1 %vm4509_vm10, %v7287_v27 }
 0x461   : > { %5081 = vmatprep.mubr.f32.mxu1 %v11341_v20 }
 0x464   : > { %7312 = vmatmul.mubr.msk.f32.gmra.mxu1 %vm4509_vm10, %v7288_v33 }
 0x465   : > { %5087 = vmatprep.mubr.f32.mxu1 %v11341_v20 }
 0x468   : > { %7313 = vmatmul.mubr.msk.f32.gmra.mxu1 %vm4509_vm10, %v7289_v1 }
 0x469   : > { %5093 = vmatprep.mubr.f32.mxu1 %v11341_v20 }
 0x46c   : > { %7314 = vmatmul.mubr.msk.f32.gmra.mxu1 %vm4509_vm10, %v7290_v30  ;;  %v10301_v30 = vpop.permute.xlu0 %4822 }
 0x46d   : > { %5391 = vmatprep.mubr.f32.mxu1 %v11341_v20 }
 0x4ff   : > { %v10260_v45 = vpop.f32.mrf.mxu0 }
 0x501   : > { %v10262_v3 = vpop.f32.mrf.mxu0 }
 0x503   : > { %v10264_v57 = vpop.f32.mrf.mxu0 }
 0x505   : > { %v4948_v63 = vpop.f32.mrf.mxu0 }
 0x507   : > { %v4952_v14 = vpop.f32.mrf.mxu0 }
 0x509   : > { %v4954_v43 = vpop.f32.mrf.mxu0 }
 0x50b   : > { %v4958_v52 = vpop.f32.mrf.mxu0 }
 0x50d   : > { %v4960_v31 = vpop.f32.mrf.mxu0 }
 0x50f   : > { %v4964_v26 = vpop.f32.mrf.mxu0 }
 0x510   : > { %v10266_v11 = vpop.f32.mrf.mxu1 }
 0x511   : > { %v4966_v16 = vpop.f32.mrf.mxu0 }
 0x512   : > { %v10268_v19 = vpop.f32.mrf.mxu1  ;;  %v4967_v35 = vadd.f32 %v4966_v16, %v10286_v42  ;;  %v4955_v16 = vadd.f32 %v4954_v43, %v10301_v30 }
 0x513   : > { %v4970_v55 = vpop.f32.mrf.mxu0 }
 0x514   : > { %v10270_v38 = vpop.f32.mrf.mxu1  ;;  %v4971_v25 = vadd.f32 %v4970_v55, %v10282_v15 }
 0x515   : > { %v4972_v13 = vpop.f32.mrf.mxu0 }
 0x516   : > { %v10274_v18 = vpop.f32.mrf.mxu1  ;;  %v4973_v58 = vadd.f32 %v4972_v13, %v10282_v15  ;;  %v5120_v55 = vmax.f32 %v4971_v25, 0.0 }
 0x517   : > { %v4976_v2 = vpop.f32.mrf.mxu0 }
 0x518   : > { %v10278_v10 = vpop.f32.mrf.mxu1  ;;  %v4977_v46 = vadd.f32 %v4976_v2, %v10276_v6 }
 0x519   : > { %v4978_v8 = vpop.f32.mrf.mxu0 }
 0x51a   : > { %v10280_v34 = vpop.f32.mrf.mxu1  ;;  %v4979_v56 = vadd.f32 %v4978_v8, %v10276_v6  ;;  %v4965_v8 = vadd.f32 %v4964_v26, %v10286_v42  ;;  %v5124_v2 = vmax.f32 %v4977_v46, 0.0  ;;  %v4953_v26 = vadd.f32 %v4952_v14, %v10301_v30 }
 0x51b   : > { %v4982_v7 = vpop.f32.mrf.mxu0 }
 0x51c   : > { %v10284_v41 = vpop.f32.mrf.mxu1  ;;  %v4983_v47 = vadd.f32 %v4982_v7, %v10272_v50  ;;  %v5125_v1 = vmax.f32 %v4979_v56, 0.0  ;;  %v4961_v7 = vadd.f32 %v4960_v31, %v10297_v5  ;;  %v5116_v46 = vmax.f32 %v4965_v8, 0.0 }
 0x51d   : > { %v4984_v23 = vpop.f32.mrf.mxu0 }
 0x51e   : > { %v10289_v12 = vpop.f32.mrf.mxu1  ;;  %v4985_v37 = vadd.f32 %v4984_v23, %v10272_v50  ;;  %v5128_v27 = vmax.f32 %v4983_v47, 0.0  ;;  %v5121_v23 = vmax.f32 %v4973_v58, 0.0  ;;  %v5117_v47 = vmax.f32 %v4967_v35, 0.0 }
 0x51f   : > { %v5109_v35 = vmax.f32 %v4955_v16, 0.0 }
 0x520   : > { %v10294_v51 = vpop.f32.mrf.mxu1  ;;  %v5129_v39 = vmax.f32 %v4985_v37, 0.0  ;;  %v4959_v37 = vadd.f32 %v4958_v52, %v10297_v5 }
 0x522   : > { %v5079_v33 = vpop.f32.mrf.mxu1  ;;  %5230 = vmatprep.subr.mxu0 %v5129_v39  ;;  %v10307_v39 = vpop.permute.xlu1 %4817  ;;  %v5112_v43 = vmax.f32 %v4959_v37, 0.0 }
 0x523   : > { %5231 = vmatpush1.msra.mxu0 %v5128_v27  ;;  %v4949_v31 = vadd.f32 %v4948_v63, %v10307_v39  ;;  %v5113_v27 = vmax.f32 %v4961_v7, 0.0  ;;  %v4947_v52 = vadd.f32 %v10264_v57, %v10307_v39  ;;  %v5108_v63 = vmax.f32 %v4953_v26, 0.0 }
 0x524   : > { %v5083_v13 = vpop.f32.mrf.mxu1  ;;  %5232 = vmatprep.subr.mxu0 %v5125_v1  ;;  %v10311_v1 = vpop.permute.xlu0 %4812 }
 0x525   : > { %5233 = vmatpush1.msra.mxu0 %v5124_v2  ;;  %v4943_v25 = vadd.f32 %v10262_v3, %v10311_v1  ;;  %v4941_v14 = vadd.f32 %v10260_v45, %v10311_v1  ;;  %v5105_v8 = vmax.f32 %v4949_v31, 0.0  ;;  %v7315_v45 = vld [vmem:[%s11153_s7 + $0x80] sm:$0xff] }
 0x526   : > { %v5085_v56 = vpop.f32.mrf.mxu1  ;;  %5234 = vmatprep.subr.mxu0 %v5121_v23  ;;  %v5104_v23 = vmax.f32 %v4947_v52, 0.0 }
 0x527   : > { %5235 = vmatpush1.msra.mxu0 %v5120_v55  ;;  %v5101_v55 = vmax.f32 %v4943_v25, 0.0 }
 0x528   : > { %v5089_v58 = vpop.f32.mrf.mxu1  ;;  %5236 = vmatprep.subr.mxu0 %v5117_v47  ;;  %v5100_v47 = vmax.f32 %v4941_v14, 0.0 }
 0x529   : > { %5237 = vmatpush1.msra.mxu0 %v5116_v46  ;;  %v5090_v26 = vadd.f32 %v5089_v58, %v10276_v6  ;;  %v5086_v46 = vadd.f32 %v5085_v56, %v10282_v15  ;;  %v5078_v56 = vadd.f32 %v10294_v51, %v10286_v42 }
 0x52a   : > { %v5091_v2 = vpop.f32.mrf.mxu1  ;;  %5238 = vmatprep.subr.mxu0 %v5113_v27  ;;  %v5084_v27 = vadd.f32 %v5083_v13, %v10282_v15  ;;  %v5074_v15 = vadd.f32 %v10289_v12, %v10297_v5  ;;  %v5066_v12 = vadd.f32 %v10278_v10, %v10301_v30  ;;  %v5054_v10 = vadd.f32 %v10266_v11, %v10311_v1  ;;  %v7320_v11 = vld [vmem:[%s11153_s7 + $0xa8] sm:$0xff] }
 0x52b   : > { %5239 = vmatpush1.msra.mxu0 %v5112_v43  ;;  %v5092_v3 = vadd.f32 %v5091_v2, %v10276_v6  ;;  %v5080_v43 = vadd.f32 %v5079_v33, %v10286_v42  ;;  %v7316_v6 = vld [vmem:[%s11153_s7 + $0x88] sm:$0xff]  ;;  %v5126_v58 = vmax.f32 %v5090_v26, 0.0  ;;  %v5123_v13 = vmax.f32 %v5086_v46, 0.0  ;;  %v7317_v42 = vld [vmem:[%s11153_s7 + $0x90] sm:$0xff] }
 0x52c   : > { %v5095_v7 = vpop.f32.mrf.mxu1  ;;  %5240 = vmatprep.subr.mxu0 %v5109_v35  ;;  %v5072_v33 = vadd.f32 %v10284_v41, %v10297_v5  ;;  %v5122_v25 = vmax.f32 %v5084_v27, 0.0  ;;  %v5068_v35 = vadd.f32 %v10280_v34, %v10301_v30  ;;  %v5118_v51 = vmax.f32 %v5078_v56, 0.0  ;;  %v10412_v56 = vpop.permute.xlu1 %5187 }
 0x52d   : > { %5241 = vmatpush1.msra.mxu0 %v5108_v63  ;;  %v5096_v57 = vadd.f32 %v5095_v7, %v10272_v50  ;;  %v5119_v2 = vmax.f32 %v5080_v43, 0.0  ;;  %v5062_v41 = vadd.f32 %v10274_v18, %v10307_v39  ;;  %v5115_v5 = vmax.f32 %v5074_v15, 0.0  ;;  %v7318_v18 = vld [vmem:[%s11153_s7 + $0x98] sm:$0xff]  ;;  %v7319_v7 = vld [vmem:[%s11153_s7 + $0xa0] sm:$0xff] }
 0x52e   : > { %v5097_v37 = vpop.f32.mrf.mxu1  ;;  %5242 = vmatprep.subr.mxu0 %v5105_v8  ;;  %v5060_v34 = vadd.f32 %v10270_v38, %v10307_v39  ;;  %v5114_v14 = vmax.f32 %v5072_v33, 0.0  ;;  %v5056_v63 = vadd.f32 %v10268_v19, %v10311_v1  ;;  %v5111_v8 = vmax.f32 %v5068_v35, 0.0  ;;  %v7321_v1 = vld [vmem:[%s11153_s7 + $0xb0] sm:$0xff] }
 0x52f   : > { %v5098_v16 = vadd.f32 %v5097_v37, %v10272_v50  ;;  %5243 = vmatpush1.msra.mxu0 %v5104_v23  ;;  %v5130_v52 = vmax.f32 %v5096_v57, 0.0  ;;  %v5127_v50 = vmax.f32 %v5092_v3, 0.0  ;;  %v5110_v30 = vmax.f32 %v5066_v12, 0.0 }
 0x530   : > { %5244 = vmatprep.subr.mxu0 %v5101_v55  ;;  %v5107_v38 = vmax.f32 %v5062_v41, 0.0  ;;  %v5106_v39 = vmax.f32 %v5060_v34, 0.0  ;;  %v5103_v19 = vmax.f32 %v5056_v63, 0.0  ;;  %v5102_v23 = vmax.f32 %v5054_v10, 0.0  ;;  %v7322_v55 = vld [vmem:[%s11153_s7 + $0xb8] sm:$0xff] }
 0x531   : > { %v5131_v31 = vmax.f32 %v5098_v16, 0.0  ;;  %5245 = vmatpush1.msra.mxu0 %v5100_v47 }
 0x532   : > { %7331 = vmatmul.mubr.msk.f32.vlgmr.msra.gmra.mxu0 %vm4509_vm10, %v7315_v45 }
 0x533   : > { %5343 = vmatprep.subr.mxu1 %v5131_v31  ;;  %5284 = vmatprep.mubr.f32.mxu0 %v11341_v20 }
 0x534   : > { %5344 = vmatpush1.msra.mxu1 %v5130_v52 }
 0x535   : > { %5345 = vmatprep.subr.mxu1 %v5127_v50 }
 0x536   : > { %5346 = vmatpush1.msra.mxu1 %v5126_v58  ;;  %7332 = vmatmul.mubr.msk.f32.gmra.mxu0 %vm4509_vm10, %v7316_v6 }
 0x537   : > { %5347 = vmatprep.subr.mxu1 %v5123_v13  ;;  %5290 = vmatprep.mubr.f32.mxu0 %v11341_v20  ;;  %v10416_v13 = vpop.permute.xlu0 %5182 }
 0x538   : > { %5348 = vmatpush1.msra.mxu1 %v5122_v25 }
 0x539   : > { %5349 = vmatprep.subr.mxu1 %v5119_v2 }
 0x53a   : > { %5350 = vmatpush1.msra.mxu1 %v5118_v51  ;;  %7333 = vmatmul.mubr.msk.f32.gmra.mxu0 %vm4509_vm10, %v7317_v42 }
 0x53b   : > { %5351 = vmatprep.subr.mxu1 %v5115_v5  ;;  %5296 = vmatprep.mubr.f32.mxu0 %v11341_v20  ;;  %v10426_v41 = vpop.permute.xlu0 %5172 }
 0x53c   : > { %5352 = vmatpush1.msra.mxu1 %v5114_v14 }
 0x53d   : > { %5353 = vmatprep.subr.mxu1 %v5111_v8 }
 0x53e   : > { %5354 = vmatpush1.msra.mxu1 %v5110_v30  ;;  %7334 = vmatmul.mubr.msk.f32.gmra.mxu0 %vm4509_vm10, %v7318_v18 }
 0x53f   : > { %5355 = vmatprep.subr.mxu1 %v5107_v38  ;;  %5302 = vmatprep.mubr.f32.mxu0 %v11341_v20 }
 0x540   : > { %5356 = vmatpush1.msra.mxu1 %v5106_v39 }
 0x541   : > { %5357 = vmatprep.subr.mxu1 %v5103_v19 }
 0x542   : > { %5358 = vmatpush1.msra.mxu1 %v5102_v23  ;;  %7335 = vmatmul.mubr.msk.f32.gmra.mxu0 %vm4509_vm10, %v7319_v7 }
 0x543   : > { %7339 = vmatmul.mubr.msk.f32.vlgmr.msra.gmra.mxu1 %vm4509_vm10, %v7315_v45  ;;  %5308 = vmatprep.mubr.f32.mxu0 %v11341_v20 }
 0x544   : > { %5397 = vmatprep.mubr.f32.mxu1 %v11341_v20 }
 0x546   : > { %7336 = vmatmul.mubr.msk.f32.gmra.mxu0 %vm4509_vm10, %v7320_v11 }
 0x547   : > { %7340 = vmatmul.mubr.msk.f32.gmra.mxu1 %vm4509_vm10, %v7316_v6  ;;  %5314 = vmatprep.mubr.f32.mxu0 %v11341_v20 }
 0x548   : > { %5403 = vmatprep.mubr.f32.mxu1 %v11341_v20 }
 0x54a   : > { %7337 = vmatmul.mubr.msk.f32.gmra.mxu0 %vm4509_vm10, %v7321_v1 }
 0x54b   : > { %7341 = vmatmul.mubr.msk.f32.gmra.mxu1 %vm4509_vm10, %v7317_v42  ;;  %5320 = vmatprep.mubr.f32.mxu0 %v11341_v20  ;;  %v10422_v42 = vpop.permute.xlu1 %5177 }
 0x54c   : > { %5409 = vmatprep.mubr.f32.mxu1 %v11341_v20 }
 0x54e   : > { %7338 = vmatmul.mubr.msk.f32.gmra.mxu0 %vm4509_vm10, %v7322_v55 }
 0x54f   : > { %7342 = vmatmul.mubr.msk.f32.gmra.mxu1 %vm4509_vm10, %v7318_v18  ;;  %5569 = vmatprep.mubr.f32.mxu0 %v11341_v20  ;;  %v10437_v39 = vpop.permute.xlu1 %5167 }
 0x550   : > { %5415 = vmatprep.mubr.f32.mxu1 %v11341_v20 }
 0x553   : > { %7343 = vmatmul.mubr.msk.f32.gmra.mxu1 %vm4509_vm10, %v7319_v7 }
 0x554   : > { %5421 = vmatprep.mubr.f32.mxu1 %v11341_v20 }
 0x557   : > { %7344 = vmatmul.mubr.msk.f32.gmra.mxu1 %vm4509_vm10, %v7320_v11 }
 0x558   : > { %5427 = vmatprep.mubr.f32.mxu1 %v11341_v20 }
 0x55b   : > { %7345 = vmatmul.mubr.msk.f32.gmra.mxu1 %vm4509_vm10, %v7321_v1 }
 0x55c   : > { %5433 = vmatprep.mubr.f32.mxu1 %v11341_v20 }
 0x55f   : > { %7346 = vmatmul.mubr.msk.f32.gmra.mxu1 %vm4509_vm10, %v7322_v55  ;;  %v10441_v55 = vpop.permute.xlu0 %5162 }
 0x560   : > { %5682 = vmatprep.mubr.f32.mxu1 %v11341_v20 }
 0x5f2   : > { %v10400_v57 = vpop.f32.mrf.mxu0 }
 0x5f4   : > { %v10402_v37 = vpop.f32.mrf.mxu0 }
 0x5f6   : > { %v10404_v47 = vpop.f32.mrf.mxu0 }
 0x5f8   : > { %v5288_v3 = vpop.f32.mrf.mxu0 }
 0x5fa   : > { %v5292_v16 = vpop.f32.mrf.mxu0 }
 0x5fc   : > { %v5294_v45 = vpop.f32.mrf.mxu0 }
 0x5fe   : > { %v5298_v26 = vpop.f32.mrf.mxu0 }
 0x600   : > { %v5300_v46 = vpop.f32.mrf.mxu0 }
 0x602   : > { %v5304_v31 = vpop.f32.mrf.mxu0 }
 0x603   : > { %v10406_v27 = vpop.f32.mrf.mxu1 }
 0x604   : > { %v5306_v52 = vpop.f32.mrf.mxu0 }
 0x605   : > { %v10408_v43 = vpop.f32.mrf.mxu1  ;;  %v5307_v23 = vadd.f32 %v5306_v52, %v10426_v41  ;;  %v5295_v52 = vadd.f32 %v5294_v45, %v10441_v55 }
 0x606   : > { %v5310_v50 = vpop.f32.mrf.mxu0 }
 0x607   : > { %v10410_v6 = vpop.f32.mrf.mxu1  ;;  %v5311_v19 = vadd.f32 %v5310_v50, %v10422_v42 }
 0x608   : > { %v5312_v58 = vpop.f32.mrf.mxu0 }
 0x609   : > { %v10414_v15 = vpop.f32.mrf.mxu1  ;;  %v5313_v30 = vadd.f32 %v5312_v58, %v10422_v42  ;;  %v5460_v50 = vmax.f32 %v5311_v19, 0.0 }
 0x60a   : > { %v5316_v33 = vpop.f32.mrf.mxu0 }
 0x60b   : > { %v10418_v25 = vpop.f32.mrf.mxu1  ;;  %v5317_v18 = vadd.f32 %v5316_v33, %v10416_v13 }
 0x60c   : > { %v5318_v35 = vpop.f32.mrf.mxu0 }
 0x60d   : > { %v10420_v2 = vpop.f32.mrf.mxu1  ;;  %v5319_v63 = vadd.f32 %v5318_v35, %v10416_v13  ;;  %v5305_v35 = vadd.f32 %v5304_v31, %v10426_v41  ;;  %v5464_v33 = vmax.f32 %v5317_v18, 0.0  ;;  %v5293_v31 = vadd.f32 %v5292_v16, %v10441_v55 }
 0x60e   : > { %v5322_v12 = vpop.f32.mrf.mxu0 }
 0x60f   : > { %v10424_v51 = vpop.f32.mrf.mxu1  ;;  %v5323_v5 = vadd.f32 %v5322_v12, %v10412_v56  ;;  %v5465_v1 = vmax.f32 %v5319_v63, 0.0  ;;  %v5301_v12 = vadd.f32 %v5300_v46, %v10437_v39  ;;  %v5456_v18 = vmax.f32 %v5305_v35, 0.0 }
 0x610   : > { %v5324_v34 = vpop.f32.mrf.mxu0 }
 0x611   : > { %v10429_v14 = vpop.f32.mrf.mxu1  ;;  %v5325_v8 = vadd.f32 %v5324_v34, %v10412_v56  ;;  %v5468_v7 = vmax.f32 %v5323_v5, 0.0  ;;  %v5461_v34 = vmax.f32 %v5313_v30, 0.0  ;;  %v5457_v5 = vmax.f32 %v5307_v23, 0.0 }
 0x612   : > { %v5449_v23 = vmax.f32 %v5295_v52, 0.0 }
 0x613   : > { %v10434_v10 = vpop.f32.mrf.mxu1  ;;  %v5469_v38 = vmax.f32 %v5325_v8, 0.0  ;;  %v5299_v8 = vadd.f32 %v5298_v26, %v10437_v39 }
 0x615   : > { %v5419_v11 = vpop.f32.mrf.mxu1  ;;  %5521 = vmatprep.subr.mxu0 %v5469_v38  ;;  %v10447_v38 = vpop.permute.xlu1 %5157  ;;  %v5452_v45 = vmax.f32 %v5299_v8, 0.0 }
 0x616   : > { %5522 = vmatpush1.msra.mxu0 %v5468_v7  ;;  %v5289_v46 = vadd.f32 %v5288_v3, %v10447_v38  ;;  %v5453_v7 = vmax.f32 %v5301_v12, 0.0  ;;  %v5287_v26 = vadd.f32 %v10404_v47, %v10447_v38  ;;  %v5448_v3 = vmax.f32 %v5293_v31, 0.0 }
 0x617   : > { %v5423_v58 = vpop.f32.mrf.mxu1  ;;  %5523 = vmatprep.subr.mxu0 %v5465_v1  ;;  %v10451_v1 = vpop.permute.xlu0 %5152 }
 0x618   : > { %5524 = vmatpush1.msra.mxu0 %v5464_v33  ;;  %v5283_v19 = vadd.f32 %v10402_v37, %v10451_v1  ;;  %v5281_v16 = vadd.f32 %v10400_v57, %v10451_v1  ;;  %v5445_v35 = vmax.f32 %v5289_v46, 0.0  ;;  %v7347_v57 = vld [vmem:[%s11153_s7 + $0xc0] sm:$0xff] }
 0x619   : > { %v5425_v63 = vpop.f32.mrf.mxu1  ;;  %5525 = vmatprep.subr.mxu0 %v5461_v34  ;;  %v5444_v34 = vmax.f32 %v5287_v26, 0.0 }
 0x61a   : > { %5526 = vmatpush1.msra.mxu0 %v5460_v50  ;;  %v5441_v50 = vmax.f32 %v5283_v19, 0.0 }
 0x61b   : > { %v5429_v30 = vpop.f32.mrf.mxu1  ;;  %5527 = vmatprep.subr.mxu0 %v5457_v5  ;;  %v5440_v5 = vmax.f32 %v5281_v16, 0.0 }
 0x61c   : > { %5528 = vmatpush1.msra.mxu0 %v5456_v18  ;;  %v5430_v31 = vadd.f32 %v5429_v30, %v10416_v13  ;;  %v5426_v18 = vadd.f32 %v5425_v63, %v10422_v42  ;;  %v5418_v63 = vadd.f32 %v10434_v10, %v10426_v41 }
 0x61d   : > { %v5431_v33 = vpop.f32.mrf.mxu1  ;;  %5529 = vmatprep.subr.mxu0 %v5453_v7  ;;  %v5424_v7 = vadd.f32 %v5423_v58, %v10422_v42  ;;  %v5414_v42 = vadd.f32 %v10429_v14, %v10437_v39  ;;  %v5406_v14 = vadd.f32 %v10418_v25, %v10441_v55  ;;  %v5394_v25 = vadd.f32 %v10406_v27, %v10451_v1  ;;  %v7352_v27 = vld [vmem:[%s11153_s7 + $0xe8] sm:$0xff] }
 0x61e   : > { %5530 = vmatpush1.msra.mxu0 %v5452_v45  ;;  %v5432_v37 = vadd.f32 %v5431_v33, %v10416_v13  ;;  %v5420_v45 = vadd.f32 %v5419_v11, %v10426_v41  ;;  %v7348_v13 = vld [vmem:[%s11153_s7 + $0xc8] sm:$0xff]  ;;  %v5466_v30 = vmax.f32 %v5430_v31, 0.0  ;;  %v5463_v58 = vmax.f32 %v5426_v18, 0.0  ;;  %v7349_v41 = vld [vmem:[%s11153_s7 + $0xd0] sm:$0xff] }
 0x61f   : > { %v5435_v12 = vpop.f32.mrf.mxu1  ;;  %5531 = vmatprep.subr.mxu0 %v5449_v23  ;;  %v5412_v11 = vadd.f32 %v10424_v51, %v10437_v39  ;;  %v5462_v19 = vmax.f32 %v5424_v7, 0.0  ;;  %v5408_v23 = vadd.f32 %v10420_v2, %v10441_v55  ;;  %v5458_v10 = vmax.f32 %v5418_v63, 0.0 }
 0x620   : > { %5532 = vmatpush1.msra.mxu0 %v5448_v3  ;;  %v5436_v47 = vadd.f32 %v5435_v12, %v10412_v56  ;;  %v5459_v33 = vmax.f32 %v5420_v45, 0.0  ;;  %v5402_v51 = vadd.f32 %v10414_v15, %v10447_v38  ;;  %v5455_v39 = vmax.f32 %v5414_v42, 0.0  ;;  %v7350_v15 = vld [vmem:[%s11153_s7 + $0xd8] sm:$0xff]  ;;  %v7351_v12 = vld [vmem:[%s11153_s7 + $0xe0] sm:$0xff] }
 0x621   : > { %v5437_v8 = vpop.f32.mrf.mxu1  ;;  %5533 = vmatprep.subr.mxu0 %v5445_v35  ;;  %v5400_v2 = vadd.f32 %v10410_v6, %v10447_v38  ;;  %v5454_v16 = vmax.f32 %v5412_v11, 0.0  ;;  %v5396_v3 = vadd.f32 %v10408_v43, %v10451_v1  ;;  %v5451_v35 = vmax.f32 %v5408_v23, 0.0  ;;  %v7353_v1 = vld [vmem:[%s11153_s7 + $0xf0] sm:$0xff]  ;;  %v11370_v23 = vld [vmem:[#allocation17_spill] sm:$0xff] }
 0x622   : > { %v5438_v52 = vadd.f32 %v5437_v8, %v10412_v56  ;;  %5534 = vmatpush1.msra.mxu0 %v5444_v34  ;;  %v5470_v26 = vmax.f32 %v5436_v47, 0.0  ;;  %v5467_v56 = vmax.f32 %v5432_v37, 0.0  ;;  %v5450_v55 = vmax.f32 %v5406_v14, 0.0  ;;  %v11369_v11 = vld [vmem:[#allocation48_spill] sm:$0xff] }
 0x623   : > { %5535 = vmatprep.subr.mxu0 %v5441_v50  ;;  %v5447_v6 = vmax.f32 %v5402_v51, 0.0  ;;  %v5446_v38 = vmax.f32 %v5400_v2, 0.0  ;;  %v5443_v43 = vmax.f32 %v5396_v3, 0.0  ;;  %v5442_v34 = vmax.f32 %v5394_v25, 0.0  ;;  %v7354_v50 = vld [vmem:[%s11153_s7 + $0xf8] sm:$0xff] }
 0x624   : > { %v5471_v46 = vmax.f32 %v5438_v52, 0.0  ;;  %5536 = vmatpush1.msra.mxu0 %v5440_v5  ;;  %v11372_v51 = vld [vmem:[#allocation13_spill] sm:$0xff] }
 0x625   : > { %7355 = vmatmul.mubr.msk.f32.vlgmr.msra.gmra.mxu0 %vm4509_vm10, %v7347_v57 }
 0x626   : > { %5634 = vmatprep.subr.mxu1 %v5471_v46  ;;  %5575 = vmatprep.mubr.f32.mxu0 %v11341_v20 }
 0x627   : > { %5635 = vmatpush1.msra.mxu1 %v5470_v26 }
 0x628   : > { %5636 = vmatprep.subr.mxu1 %v5467_v56  ;;  %v10560_v56 = vpop.permute.xlu1 %4354 }
 0x629   : > { %5637 = vmatpush1.msra.mxu1 %v5466_v30  ;;  %7356 = vmatmul.mubr.msk.f32.gmra.mxu0 %vm4509_vm10, %v7348_v13  ;;  %v10564_v30 = vpop.permute.xlu0 %4349 }
 0x62a   : > { %5638 = vmatprep.subr.mxu1 %v5463_v58  ;;  %5581 = vmatprep.mubr.f32.mxu0 %v11341_v20  ;;  %v11368_v58 = vld [vmem:[#allocation15_spill] sm:$0xff] }
 0x62b   : > { %5639 = vmatpush1.msra.mxu1 %v5462_v19  ;;  %v3642_v19 = vadd.f32 %v11369_v11, %v11368_v58 }
 0x62c   : > { %5640 = vmatprep.subr.mxu1 %v5459_v33  ;;  %v11371_v33 = vld [vmem:[#allocation52_spill] sm:$0xff] }
 0x62d   : > { %5641 = vmatpush1.msra.mxu1 %v5458_v10  ;;  %7357 = vmatmul.mubr.msk.f32.gmra.mxu0 %vm4509_vm10, %v7349_v41 }
 0x62e   : > { %5642 = vmatprep.subr.mxu1 %v5455_v39  ;;  %5587 = vmatprep.mubr.f32.mxu0 %v11341_v20  ;;  %v11373_v39 = vld [vmem:[#allocation44_spill] sm:$0xff] }
 0x62f   : > { %5643 = vmatpush1.msra.mxu1 %v5454_v16  ;;  %v3636_v2 = vadd.f32 %v11373_v39, %v11372_v51  ;;  %v4254_v16 = vadd.f32 %v10030_v59, %v3642_v19  ;;  %v4413_v51 = vadd.f32 %v10564_v30, %v10021_v60 }
 0x630   : > { %5644 = vmatprep.subr.mxu1 %v5451_v35 }
 0x631   : > { %5645 = vmatpush1.msra.mxu1 %v5450_v55  ;;  %7358 = vmatmul.mubr.msk.f32.gmra.mxu0 %vm4509_vm10, %v7350_v15  ;;  %v11374_v55 = vld [vmem:[#allocation11_spill] sm:$0xff]  ;;  %v4414_v19 = vadd.f32 %v10564_v30, %v4254_v16  ;;  %v11381_v16 = vld [vmem:[#allocation34_spill] sm:$0xff] }
 0x632   : > { %5646 = vmatprep.subr.mxu1 %v5447_v6  ;;  %5593 = vmatprep.mubr.f32.mxu0 %v11341_v20  ;;  %v11375_v6 = vld [vmem:[#allocation40_spill] sm:$0xff] }
 0x633   : > { %5647 = vmatpush1.msra.mxu1 %v5446_v38  ;;  %v3630_v38 = vadd.f32 %v11375_v6, %v11374_v55 }
 0x634   : > { %5648 = vmatprep.subr.mxu1 %v5443_v43  ;;  %v4250_v43 = vadd.f32 %v10000_v28, %v3636_v2  ;;  %v11378_v28 = vld [vmem:[#allocation9_spill] sm:$0xff] }
 0x635   : > { %5649 = vmatpush1.msra.mxu1 %v5442_v34  ;;  %7359 = vmatmul.mubr.msk.f32.gmra.mxu0 %vm4509_vm10, %v7351_v12  ;;  %v10585_v34 = vpop.permute.xlu0 %4339  ;;  %v4246_v58 = vadd.f32 %v9969_v32, %v3630_v38 }
 0x636   : > { %7363 = vmatmul.mubr.msk.f32.vlgmr.msra.gmra.mxu1 %vm4509_vm10, %v7347_v57  ;;  %5599 = vmatprep.mubr.f32.mxu0 %v11341_v20 }
 0x637   : > { %5688 = vmatprep.mubr.f32.mxu1 %v11341_v20 }
 0x639   : > { %7360 = vmatmul.mubr.msk.f32.gmra.mxu0 %vm4509_vm10, %v7352_v27 }
 0x63a   : > { %7364 = vmatmul.mubr.msk.f32.gmra.mxu1 %vm4509_vm10, %v7348_v13  ;;  %5605 = vmatprep.mubr.f32.mxu0 %v11341_v20 }
 0x63b   : > { %5694 = vmatprep.mubr.f32.mxu1 %v11341_v20 }
 0x63d   : > { %7361 = vmatmul.mubr.msk.f32.gmra.mxu0 %vm4509_vm10, %v7353_v1 }
 0x63e   : > { %7365 = vmatmul.mubr.msk.f32.gmra.mxu1 %vm4509_vm10, %v7349_v41  ;;  %5611 = vmatprep.mubr.f32.mxu0 %v11341_v20  ;;  %v3648_v41 = vadd.f32 %v11371_v33, %v11370_v23  ;;  %v11379_v33 = vld [vmem:[#allocation36_spill] sm:$0xff] }
 0x63f   : > { %5700 = vmatprep.mubr.f32.mxu1 %v11341_v20 }
 0x640   : > { %v4258_v3 = vadd.f32 %v10116_v44, %v3648_v41  ;;  %v11377_v44 = vld [vmem:[#allocation37_spill] sm:$0xff]  ;;  %v3618_v41 = vadd.f32 %v11379_v33, %v11378_v28 }
 0x641   : > { %7362 = vmatmul.mubr.msk.f32.gmra.mxu0 %vm4509_vm10, %v7354_v50 }
 0x642   : > { %7366 = vmatmul.mubr.msk.f32.gmra.mxu1 %vm4509_vm10, %v7350_v15  ;;  %5909 = vmatprep.mubr.f32.mxu0 %v11341_v20  ;;  %v10578_v15 = vpop.permute.xlu1 %4344  ;;  %v4418_v23 = vadd.f32 %v10560_v56, %v4258_v3  ;;  %v4238_v60 = vadd.f32 %v9932_v54, %v3618_v41 }
 0x643   : > { %5706 = vmatprep.mubr.f32.mxu1 %v11341_v20  ;;  %v4410_v32 = vadd.f32 %v10578_v15, %v4250_v43  ;;  %v4409_v28 = vadd.f32 %v10578_v15, %v9991_v9  ;;  %v10614_v43 = vpop.permute.xlu0 %4329 }
 0x646   : > { %7367 = vmatmul.mubr.msk.f32.gmra.mxu1 %vm4509_vm10, %v7351_v12  ;;  %v10606_v3 = vpop.permute.xlu1 %4334 }
 0x647   : > { %5712 = vmatprep.mubr.f32.mxu1 %v11341_v20 }
 0x64a   : > { %7368 = vmatmul.mubr.msk.f32.gmra.mxu1 %vm4509_vm10, %v7352_v27  ;;  %v4417_v27 = vadd.f32 %v10560_v56, %v10044_v29 }
 0x64b   : > { %5718 = vmatprep.mubr.f32.mxu1 %v11341_v20 }
 0x64e   : > { %7369 = vmatmul.mubr.msk.f32.gmra.mxu1 %vm4509_vm10, %v7353_v1  ;;  %v11376_v1 = vld [vmem:[#allocation10_spill] sm:$0xff] }
 0x64f   : > { %5724 = vmatprep.mubr.f32.mxu1 %v11341_v20 }
 0x652   : > { %7370 = vmatmul.mubr.msk.f32.gmra.mxu1 %vm4509_vm10, %v7354_v50  ;;  %v3624_v50 = vadd.f32 %v11377_v44, %v11376_v1  ;;  %v11380_v1 = vld [vmem:[#allocation8_spill] sm:$0xff] }
 0x653   : > { %6022 = vmatprep.mubr.f32.mxu1 %v11341_v20  ;;  %v3612_v44 = vadd.f32 %v11381_v16, %v11380_v1 }
 0x654   : > { %v4242_v2 = vadd.f32 %v9950_v48, %v3624_v50  ;;  %v4406_v48 = vadd.f32 %v10585_v34, %v4246_v58 }
 0x655   : > { %v4234_v9 = vadd.f32 %v9913_v61, %v3612_v44 }
 0x656   : > { %v4402_v54 = vadd.f32 %v10606_v3, %v4242_v2  ;;  %v11384_v2 = vld [vmem:[#allocation20_spill] sm:$0xff] }
 0x6e5   : > { %v10540_v47 = vpop.f32.mrf.mxu0 }
 0x6e7   : > { %v10542_v8 = vpop.f32.mrf.mxu0 }
 0x6e9   : > { %v10544_v5 = vpop.f32.mrf.mxu0 }
 0x6eb   : > { %v10546_v37 = vpop.f32.mrf.mxu0 }
 0x6ed   : > { %v10548_v52 = vpop.f32.mrf.mxu0 }
 0x6ef   : > { %v10550_v57 = vpop.f32.mrf.mxu0 }
 0x6f1   : > { %v10552_v31 = vpop.f32.mrf.mxu0 }
 0x6f3   : > { %v10554_v18 = vpop.f32.mrf.mxu0 }
 0x6f5   : > { %v5595_v46 = vpop.f32.mrf.mxu0 }
 0x6f6   : > { %v10556_v7 = vpop.f32.mrf.mxu1 }
 0x6f7   : > { %v5597_v26 = vpop.f32.mrf.mxu0 }
 0x6f8   : > { %v10558_v45 = vpop.f32.mrf.mxu1 }
 0x6f9   : > { %v5601_v13 = vpop.f32.mrf.mxu0 }
 0x6fa   : > { %v10562_v63 = vpop.f32.mrf.mxu1  ;;  %v5602_v1 = vadd.f32 %v5601_v13, %v4409_v28  ;;  %v5592_v13 = vadd.f32 %v10554_v18, %v4402_v54 }
 0x6fb   : > { %v5603_v42 = vpop.f32.mrf.mxu0 }
 0x6fc   : > { %v10570_v14 = vpop.f32.mrf.mxu1  ;;  %v5751_v28 = vmax.f32 %v5602_v1, 0.0  ;;  %v5744_v54 = vmax.f32 %v5592_v13, 0.0 }
 0x6fd   : > { %v5607_v10 = vpop.f32.mrf.mxu0 }
 0x6fe   : > { %v10576_v35 = vpop.f32.mrf.mxu1  ;;  %v5608_v33 = vadd.f32 %v5607_v10, %v4413_v51  ;;  %v5598_v10 = vadd.f32 %v5597_v26, %v4406_v48  ;;  %v10631_v26 = vpop.permute.xlu1 %4324 }
 0x6ff   : > { %v5609_v25 = vpop.f32.mrf.mxu0  ;;  %v4394_v18 = vadd.f32 %v10631_v26, %v4234_v9 }
 0x700   : > { %v10583_v12 = vpop.f32.mrf.mxu1  ;;  %v5610_v6 = vadd.f32 %v5609_v25, %v4414_v19  ;;  %v11382_v25 = vld [vmem:[#allocation4_spill] sm:$0xff]  ;;  %v11383_v19 = vld [vmem:[#allocation31_spill] sm:$0xff] }
 0x701   : > { %v5613_v59 = vpop.f32.mrf.mxu0  ;;  %v5580_v9 = vadd.f32 %v10546_v37, %v4394_v18 }
 0x702   : > { %v10592_v11 = vpop.f32.mrf.mxu1  ;;  %v5614_v39 = vadd.f32 %v5613_v59, %v4417_v27  ;;  %v5604_v59 = vadd.f32 %v5603_v42, %v4410_v32  ;;  %v5756_v58 = vmax.f32 %v5610_v6, 0.0  ;;  %v4401_v42 = vadd.f32 %v10606_v3, %v9945_v62  ;;  %v11385_v6 = vld [vmem:[#allocation57_spill] sm:$0xff] }
 0x703   : > { %v5615_v29 = vpop.f32.mrf.mxu0  ;;  %v5755_v32 = vmax.f32 %v5608_v33, 0.0  ;;  %v3797_v44 = vadd.f32 %v11385_v6, %v11384_v2  ;;  %v4397_v62 = vadd.f32 %v10614_v43, %v9927_v22  ;;  %v11387_v33 = vld [vmem:[#allocation59_spill] sm:$0xff]  ;;  %v4393_v22 = vadd.f32 %v10631_v26, %v9908_v21 }
 0x704   : > { %v10601_v55 = vpop.f32.mrf.mxu1  ;;  %v5616_v38 = vadd.f32 %v5615_v29, %v4418_v23  ;;  %v3606_v23 = vadd.f32 %v11383_v19, %v11382_v25  ;;  %v4405_v29 = vadd.f32 %v10585_v34, %v9961_v40  ;;  %v5759_v16 = vmax.f32 %v5614_v39, 0.0  ;;  %v10642_v25 = vpop.permute.xlu0 %4319  ;;  %v11388_v19 = vld [vmem:[#allocation22_spill] sm:$0xff] }
 0x705   : > { %v4398_v40 = vadd.f32 %v10614_v43, %v4238_v60  ;;  %v5752_v39 = vmax.f32 %v5604_v59, 0.0  ;;  %v5748_v59 = vmax.f32 %v5598_v10, 0.0  ;;  %v5578_v21 = vadd.f32 %v10544_v5, %v4393_v22  ;;  %v11394_v5 = vld [vmem:[#allocation18_spill] sm:$0xff] }
 0x706   : > { %v10611_v27 = vpop.f32.mrf.mxu1  ;;  %v5760_v50 = vmax.f32 %v5616_v38, 0.0  ;;  %v5596_v51 = vadd.f32 %v5595_v46, %v4405_v29  ;;  %v4230_v38 = vadd.f32 %v9889_v0, %v3606_v23  ;;  %v5590_v46 = vadd.f32 %v10552_v31, %v4401_v42  ;;  %v11386_v0 = vld [vmem:[#allocation21_spill] sm:$0xff] }
 0x707   : > { %v3803_v60 = vadd.f32 %v11387_v33, %v11386_v0  ;;  %v5586_v48 = vadd.f32 %v10550_v57, %v4398_v40  ;;  %v11389_v23 = vld [vmem:[#allocation61_spill] sm:$0xff]  ;;  %v5584_v31 = vadd.f32 %v10548_v52, %v4397_v62  ;;  %v4252_v37 = vadd.f32 %v10078_v24, %v3797_v44  ;;  %v11396_v44 = vld [vmem:[#allocation26_spill] sm:$0xff] }
 0x708   : > { %v10622_v41 = vpop.f32.mrf.mxu1  ;;  %5861 = vmatprep.subr.mxu0 %v5760_v50  ;;  %v3809_v29 = vadd.f32 %v11389_v23, %v11388_v19  ;;  %v5747_v1 = vmax.f32 %v5596_v51, 0.0  ;;  %v4390_v57 = vadd.f32 %v10642_v25, %v4230_v38  ;;  %v11391_v38 = vld [vmem:[#allocation55_spill] sm:$0xff]  ;;  %v11395_v62 = vld [vmem:[#allocation53_spill] sm:$0xff] }
 0x709   : > { %5862 = vmatpush1.msra.mxu0 %v5759_v16  ;;  %v4389_v16 = vadd.f32 %v10642_v25, %v9885_v49  ;;  %v5740_v51 = vmax.f32 %v5586_v48, 0.0  ;;  %v11390_v49 = vld [vmem:[#allocation19_spill] sm:$0xff]  ;;  %v5739_v2 = vmax.f32 %v5584_v31, 0.0  ;;  %v4412_v22 = vadd.f32 %v10578_v15, %v4252_v37 }
 0x70a   : > { %v10629_v61 = vpop.f32.mrf.mxu1  ;;  %5863 = vmatprep.subr.mxu0 %v5756_v58  ;;  %v4256_v58 = vadd.f32 %v10091_v53, %v3803_v60  ;;  %v4260_v42 = vadd.f32 %v10124_v17, %v3809_v29  ;;  %v5574_v52 = vadd.f32 %v10542_v8, %v4390_v57  ;;  %v11392_v53 = vld [vmem:[#allocation16_spill] sm:$0xff]  ;;  %v11393_v17 = vld [vmem:[#allocation49_spill] sm:$0xff]  ;;  %v4419_v8 = vadd.f32 %v10560_v56, %v10096_v36 }
 0x70b   : > { %5864 = vmatpush1.msra.mxu0 %v5755_v32  ;;  %v5743_v32 = vmax.f32 %v5590_v46, 0.0  ;;  %v5572_v13 = vadd.f32 %v10540_v47, %v4389_v16  ;;  %v3779_v6 = vadd.f32 %v11393_v17, %v11392_v53  ;;  %v3785_v46 = vadd.f32 %v11395_v62, %v11394_v5  ;;  %v11399_v16 = vld [vmem:[#allocation45_spill] sm:$0xff]  ;;  %v11406_v17 = vld [vmem:[#allocation7_spill] sm:$0xff]  ;;  %v11407_v62 = vld [vmem:[#allocation32_spill] sm:$0xff] }
 0x70c   : > { %v5716_v50 = vpop.f32.mrf.mxu1  ;;  %5865 = vmatprep.subr.mxu0 %v5752_v39  ;;  %v3791_v39 = vadd.f32 %v11391_v38, %v11390_v49  ;;  %v5735_v60 = vmax.f32 %v5578_v21, 0.0  ;;  %v4416_v24 = vadd.f32 %v10564_v30, %v4256_v58  ;;  %v4420_v47 = vadd.f32 %v10560_v56, %v4260_v42  ;;  %v10677_v56 = vld [vmem:[%s11153_s7 + $0x100] sm:$0xff]  ;;  %v11401_v58 = vld [vmem:[#allocation39_spill] sm:$0xff] }
 0x70d   : > { %5866 = vmatpush1.msra.mxu0 %v5751_v28  ;;  %v5736_v28 = vmax.f32 %v5580_v9, 0.0  ;;  %v4244_v18 = vadd.f32 %v11396_v44, %v3785_v46  ;;  %v5732_v48 = vmax.f32 %v5574_v52, 0.0  ;;  %v5731_v36 = vmax.f32 %v5572_v13, 0.0  ;;  %v11400_v9 = vld [vmem:[#allocation6_spill] sm:$0xff]  ;;  %v11409_v44 = vld [vmem:[#allocation35_spill] sm:$0xff] }
 0x70e   : > { %v5720_v10 = vpop.f32.mrf.mxu1  ;;  %5867 = vmatprep.subr.mxu0 %v5748_v59  ;;  %v4248_v33 = vadd.f32 %v10066_v4, %v3791_v39  ;;  %v11397_v59 = vld [vmem:[#allocation28_spill] sm:$0xff]  ;;  %v4240_v42 = vadd.f32 %v11401_v58, %v3779_v6  ;;  %v11404_v38 = vld [vmem:[#allocation30_spill] sm:$0xff] }
 0x70f   : > { %5868 = vmatpush1.msra.mxu0 %v5747_v1  ;;  %v4415_v19 = vadd.f32 %v10564_v30, %v11397_v59  ;;  %v11398_v1 = vld [vmem:[#allocation14_spill] sm:$0xff]  ;;  %v4411_v30 = vadd.f32 %v10578_v15, %v11400_v9  ;;  %v4407_v39 = vadd.f32 %v10585_v34, %v11404_v38  ;;  %v11405_v15 = vld [vmem:[#allocation33_spill] sm:$0xff] }
 0x710   : > { %v5722_v40 = vpop.f32.mrf.mxu1  ;;  %5869 = vmatprep.subr.mxu0 %v5744_v54  ;;  %v3773_v57 = vadd.f32 %v11399_v16, %v11398_v1  ;;  %v4408_v21 = vadd.f32 %v10585_v34, %v4248_v33  ;;  %v7372_v34 = vld [vmem:[%s11153_s7 + $0x108] sm:$0xff]  ;;  %v7377_v16 = vld [vmem:[%s11153_s7 + $0x130] sm:$0xff] }
 0x711   : > { %5870 = vmatpush1.msra.mxu0 %v5743_v32  ;;  %v5723_v31 = vadd.f32 %v5722_v40, %v4416_v24  ;;  %v5721_v54 = vadd.f32 %v5720_v10, %v4415_v19  ;;  %v5717_v32 = vadd.f32 %v5716_v50, %v4412_v22  ;;  %v11403_v40 = vld [vmem:[#allocation41_spill] sm:$0xff]  ;;  %v5715_v37 = vadd.f32 %v10629_v61, %v4411_v30  ;;  %v11410_v19 = vld [vmem:[#allocation3_spill] sm:$0xff] }
 0x712   : > { %v5726_v0 = vpop.f32.mrf.mxu1  ;;  %5871 = vmatprep.subr.mxu0 %v5740_v51  ;;  %v11402_v51 = vld [vmem:[#allocation12_spill] sm:$0xff]  ;;  %v4236_v10 = vadd.f32 %v11405_v15, %v3773_v57  ;;  %v5711_v50 = vadd.f32 %v10622_v41, %v4408_v21  ;;  %v4403_v61 = vadd.f32 %v10606_v3, %v11406_v17  ;;  %v5709_v6 = vadd.f32 %v10611_v27, %v4407_v39 }
 0x713   : > { %5872 = vmatpush1.msra.mxu0 %v5739_v2  ;;  %v5727_v23 = vadd.f32 %v5726_v0, %v4419_v8  ;;  %v3767_v49 = vadd.f32 %v11403_v40, %v11402_v51  ;;  %v4404_v2 = vadd.f32 %v10606_v3, %v4244_v18  ;;  %v5758_v53 = vmax.f32 %v5723_v31, 0.0  ;;  %v11408_v0 = vld [vmem:[#allocation38_spill] sm:$0xff] }
 0x714   : > { %v5728_v29 = vpop.f32.mrf.mxu1  ;;  %5873 = vmatprep.subr.mxu0 %v5736_v28  ;;  %v5757_v5 = vmax.f32 %v5721_v54, 0.0  ;;  %v4400_v28 = vadd.f32 %v10614_v43, %v4240_v42  ;;  %v5754_v8 = vmax.f32 %v5717_v32, 0.0  ;;  %v4399_v33 = vadd.f32 %v10614_v43, %v11408_v0 }
 0x715   : > { %v5729_v4 = vadd.f32 %v5728_v29, %v4420_v47  ;;  %5874 = vmatpush1.msra.mxu0 %v5735_v60  ;;  %v5761_v13 = vmax.f32 %v5727_v23, 0.0  ;;  %v4232_v46 = vadd.f32 %v11407_v62, %v3767_v49  ;;  %v5705_v41 = vadd.f32 %v10601_v55, %v4404_v2  ;;  %v7373_v55 = vld [vmem:[%s11153_s7 + $0x110] sm:$0xff] }
 0x716   : > { %5875 = vmatprep.subr.mxu0 %v5732_v48  ;;  %v5703_v60 = vadd.f32 %v10592_v11, %v4403_v61  ;;  %v5753_v24 = vmax.f32 %v5715_v37, 0.0  ;;  %v4396_v3 = vadd.f32 %v10631_v26, %v4236_v10  ;;  %v5699_v27 = vadd.f32 %v10583_v12, %v4400_v28  ;;  %v10781_v37 = vpop.permute.xlu1 %5818  ;;  %v10785_v10 = vpop.permute.xlu0 %5813 }
 0x717   : > { %v5762_v52 = vmax.f32 %v5729_v4, 0.0  ;;  %5876 = vmatpush1.msra.mxu0 %v5731_v36  ;;  %v5750_v47 = vmax.f32 %v5711_v50, 0.0  ;;  %v4395_v43 = vadd.f32 %v10631_v26, %v11409_v44  ;;  %v5697_v11 = vadd.f32 %v10576_v35, %v4399_v33 }
 0x718   : > { %7387 = vmatmul.mubr.msk.f32.vlgmr.msra.gmra.mxu0 %vm4509_vm10, %v10677_v56  ;;  %v5749_v18 = vmax.f32 %v5709_v6, 0.0  ;;  %v4392_v48 = vadd.f32 %v10642_v25, %v4232_v46  ;;  %v5693_v59 = vadd.f32 %v10570_v14, %v4396_v3  ;;  %v5746_v12 = vmax.f32 %v5705_v41, 0.0  ;;  %v7374_v14 = vld [vmem:[%s11153_s7 + $0x118] sm:$0xff] }
 0x719   : > { %5974 = vmatprep.subr.mxu1 %v5762_v52  ;;  %5915 = vmatprep.mubr.f32.mxu0 %v11341_v20  ;;  %v4391_v23 = vadd.f32 %v10642_v25, %v11410_v19  ;;  %v5691_v29 = vadd.f32 %v10562_v63, %v4395_v43  ;;  %v5745_v36 = vmax.f32 %v5703_v60, 0.0  ;;  %v5742_v35 = vmax.f32 %v5699_v27, 0.0 }
 0x71a   : > { %5975 = vmatpush1.msra.mxu1 %v5761_v13  ;;  %v5687_v26 = vadd.f32 %v10558_v45, %v4392_v48  ;;  %v5741_v31 = vmax.f32 %v5697_v11, 0.0  ;;  %v5738_v25 = vmax.f32 %v5693_v59, 0.0  ;;  %v7375_v45 = vld [vmem:[%s11153_s7 + $0x120] sm:$0xff]  ;;  %v10791_v17 = vpop.permute.xlu1 %5808 }
 0x71b   : > { %5976 = vmatprep.subr.mxu1 %v5758_v53  ;;  %v5685_v22 = vadd.f32 %v10556_v7, %v4391_v23  ;;  %v5737_v63 = vmax.f32 %v5691_v29, 0.0  ;;  %v7376_v7 = vld [vmem:[%s11153_s7 + $0x128] sm:$0xff] }
 0x71c   : > { %5977 = vmatpush1.msra.mxu1 %v5757_v5  ;;  %7388 = vmatmul.mubr.msk.f32.gmra.mxu0 %vm4509_vm10, %v7372_v34  ;;  %v5734_v4 = vmax.f32 %v5687_v26, 0.0  ;;  %v10795_v5 = vpop.permute.xlu0 %5803 }
 0x71d   : > { %5978 = vmatprep.subr.mxu1 %v5754_v8  ;;  %5921 = vmatprep.mubr.f32.mxu0 %v11341_v20  ;;  %v5733_v1 = vmax.f32 %v5685_v22, 0.0 }
 0x71e   : > { %5979 = vmatpush1.msra.mxu1 %v5753_v24  ;;  %v10806_v3 = vpop.permute.xlu1 %5798 }
 0x71f   : > { %5980 = vmatprep.subr.mxu1 %v5750_v47 }
 0x720   : > { %5981 = vmatpush1.msra.mxu1 %v5749_v18  ;;  %7389 = vmatmul.mubr.msk.f32.gmra.mxu0 %vm4509_vm10, %v7373_v55  ;;  %v10810_v11 = vpop.permute.xlu0 %5793 }
 0x721   : > { %5982 = vmatprep.subr.mxu1 %v5746_v12  ;;  %5927 = vmatprep.mubr.f32.mxu0 %v11341_v20 }
 0x722   : > { %5983 = vmatpush1.msra.mxu1 %v5745_v36 }
 0x723   : > { %5984 = vmatprep.subr.mxu1 %v5742_v35 }
 0x724   : > { %5985 = vmatpush1.msra.mxu1 %v5741_v31  ;;  %7390 = vmatmul.mubr.msk.f32.gmra.mxu0 %vm4509_vm10, %v7374_v14 }
 0x725   : > { %5986 = vmatprep.subr.mxu1 %v5738_v25  ;;  %5933 = vmatprep.mubr.f32.mxu0 %v11341_v20 }
 0x726   : > { %5987 = vmatpush1.msra.mxu1 %v5737_v63 }
 0x727   : > { %5988 = vmatprep.subr.mxu1 %v5734_v4 }
 0x728   : > { %5989 = vmatpush1.msra.mxu1 %v5733_v1  ;;  %7391 = vmatmul.mubr.msk.f32.gmra.mxu0 %vm4509_vm10, %v7375_v45 }
 0x729   : > { %7395 = vmatmul.mubr.msk.f32.vlgmr.msra.gmra.mxu1 %vm4509_vm10, %v10677_v56  ;;  %5939 = vmatprep.mubr.f32.mxu0 %v11341_v20  ;;  %v7378_v56 = vld [vmem:[%s11153_s7 + $0x138] sm:$0xff] }
 0x72a   : > { %6028 = vmatprep.mubr.f32.mxu1 %v11341_v20 }
 0x72c   : > { %7392 = vmatmul.mubr.msk.f32.gmra.mxu0 %vm4509_vm10, %v7376_v7 }
 0x72d   : > { %7396 = vmatmul.mubr.msk.f32.gmra.mxu1 %vm4509_vm10, %v7372_v34  ;;  %5945 = vmatprep.mubr.f32.mxu0 %v11341_v20 }
 0x72e   : > { %6034 = vmatprep.mubr.f32.mxu1 %v11341_v20 }
 0x730   : > { %7393 = vmatmul.mubr.msk.f32.gmra.mxu0 %vm4509_vm10, %v7377_v16 }
 0x731   : > { %7397 = vmatmul.mubr.msk.f32.gmra.mxu1 %vm4509_vm10, %v7373_v55  ;;  %5951 = vmatprep.mubr.f32.mxu0 %v11341_v20 }
 0x732   : > { %6040 = vmatprep.mubr.f32.mxu1 %v11341_v20 }
 0x734   : > { %7394 = vmatmul.mubr.msk.f32.gmra.mxu0 %vm4509_vm10, %v7378_v56 }
 0x735   : > { %7398 = vmatmul.mubr.msk.f32.gmra.mxu1 %vm4509_vm10, %v7374_v14  ;;  %6249 = vmatprep.mubr.f32.mxu0 %v11341_v20  ;;  %v10816_v14 = vpop.permute.xlu1 %5788 }
 0x736   : > { %6046 = vmatprep.mubr.f32.mxu1 %v11341_v20 }
 0x739   : > { %7399 = vmatmul.mubr.msk.f32.gmra.mxu1 %vm4509_vm10, %v7375_v45  ;;  %v10820_v45 = vpop.permute.xlu0 %5783 }
 0x73a   : > { %6052 = vmatprep.mubr.f32.mxu1 %v11341_v20 }
 0x73d   : > { %7400 = vmatmul.mubr.msk.f32.gmra.mxu1 %vm4509_vm10, %v7376_v7 }
 0x73e   : > { %6058 = vmatprep.mubr.f32.mxu1 %v11341_v20 }
 0x741   : > { %7401 = vmatmul.mubr.msk.f32.gmra.mxu1 %vm4509_vm10, %v7377_v16 }
 0x742   : > { %6064 = vmatprep.mubr.f32.mxu1 %v11341_v20 }
 0x745   : > { %7402 = vmatmul.mubr.msk.f32.gmra.mxu1 %vm4509_vm10, %v7378_v56 }
 0x746   : > { %6362 = vmatprep.mubr.f32.mxu1 %v11341_v20 }
 0x7d8   : > { %v10769_v57 = vpop.f32.mrf.mxu0 }
 0x7da   : > { %v10771_v9 = vpop.f32.mrf.mxu0 }
 0x7db   : > { %v5914_v16 = vadd.f32 %v10771_v9, %v10820_v45 }
 0x7dc   : > { %v10773_v30 = vpop.f32.mrf.mxu0 }
 0x7dd   : > { %v5918_v1 = vadd.f32 %v10773_v30, %v10816_v14 }
 0x7de   : > { %v5919_v54 = vpop.f32.mrf.mxu0 }
 0x7df   : > { %v5920_v25 = vadd.f32 %v5919_v54, %v10816_v14 }
 0x7e0   : > { %v5923_v58 = vpop.f32.mrf.mxu0 }
 0x7e1   : > { %v5924_v22 = vadd.f32 %v5923_v58, %v10810_v11  ;;  %v5912_v58 = vadd.f32 %v10769_v57, %v10820_v45  ;;  %v7403_v57 = vld [vmem:[%s11153_s7 + $0x140] sm:$0xff] }
 0x7e2   : > { %v5925_v42 = vpop.f32.mrf.mxu0 }
 0x7e3   : > { %v5926_v36 = vadd.f32 %v5925_v42, %v10810_v11  ;;  %v6079_v54 = vmax.f32 %v5924_v22, 0.0 }
 0x7e4   : > { %v5929_v21 = vpop.f32.mrf.mxu0 }
 0x7e5   : > { %v5930_v23 = vadd.f32 %v5929_v21, %v10806_v3  ;;  %v6080_v56 = vmax.f32 %v5926_v36, 0.0  ;;  %v6076_v21 = vmax.f32 %v5920_v25, 0.0 }
 0x7e6   : > { %v5931_v32 = vpop.f32.mrf.mxu0 }
 0x7e7   : > { %v5932_v59 = vadd.f32 %v5931_v32, %v10806_v3  ;;  %v6083_v7 = vmax.f32 %v5930_v23, 0.0  ;;  %v7409_v23 = vld [vmem:[%s11153_s7 + $0x170] sm:$0xff] }
 0x7e8   : > { %v5935_v52 = vpop.f32.mrf.mxu0 }
 0x7e9   : > { %v10775_v51 = vpop.f32.mrf.mxu1  ;;  %v5936_v18 = vadd.f32 %v5935_v52, %v10795_v5  ;;  %v6084_v63 = vmax.f32 %v5932_v59, 0.0  ;;  %v6075_v52 = vmax.f32 %v5918_v1, 0.0 }
 0x7ea   : > { %v5937_v40 = vpop.f32.mrf.mxu0 }
 0x7eb   : > { %v10777_v49 = vpop.f32.mrf.mxu1  ;;  %v5938_v55 = vadd.f32 %v5937_v40, %v10795_v5  ;;  %v6087_v31 = vmax.f32 %v5936_v18, 0.0  ;;  %v6072_v40 = vmax.f32 %v5914_v16, 0.0 }
 0x7ec   : > { %v5941_v38 = vpop.f32.mrf.mxu0  ;;  %v6027_v18 = vadd.f32 %v10777_v49, %v10820_v45 }
 0x7ed   : > { %v10779_v39 = vpop.f32.mrf.mxu1  ;;  %v5942_v27 = vadd.f32 %v5941_v38, %v10791_v17  ;;  %v6088_v26 = vmax.f32 %v5938_v55, 0.0 }
 0x7ee   : > { %v5943_v13 = vpop.f32.mrf.mxu0  ;;  %v6074_v49 = vmax.f32 %v6027_v18, 0.0 }
 0x7ef   : > { %v10783_v15 = vpop.f32.mrf.mxu1  ;;  %v5944_v60 = vadd.f32 %v5943_v13, %v10791_v17  ;;  %v6091_v29 = vmax.f32 %v5942_v27, 0.0  ;;  %v6071_v13 = vmax.f32 %v5912_v58, 0.0 }
 0x7f0   : > { %v5947_v2 = vpop.f32.mrf.mxu0 }
 0x7f1   : > { %v10787_v50 = vpop.f32.mrf.mxu1  ;;  %v5948_v0 = vadd.f32 %v5947_v2, %v10785_v10  ;;  %v6092_v19 = vmax.f32 %v5944_v60, 0.0 }
 0x7f2   : > { %v5949_v53 = vpop.f32.mrf.mxu0 }
 0x7f3   : > { %v10789_v34 = vpop.f32.mrf.mxu1  ;;  %v5950_v41 = vadd.f32 %v5949_v53, %v10785_v10  ;;  %v6095_v48 = vmax.f32 %v5948_v0, 0.0 }
 0x7f4   : > { %v5953_v61 = vpop.f32.mrf.mxu0  ;;  %v6039_v55 = vadd.f32 %v10789_v34, %v10810_v11  ;;  %v6031_v34 = vadd.f32 %v10779_v39, %v10816_v14 }
 0x7f5   : > { %v10793_v6 = vpop.f32.mrf.mxu1  ;;  %v5954_v62 = vadd.f32 %v5953_v61, %v10781_v37  ;;  %v6096_v43 = vmax.f32 %v5950_v41, 0.0 }
 0x7f6   : > { %v5955_v46 = vpop.f32.mrf.mxu0  ;;  %v6043_v27 = vadd.f32 %v10793_v6, %v10806_v3  ;;  %v6033_v6 = vadd.f32 %v10783_v15, %v10816_v14  ;;  %v7406_v15 = vld [vmem:[%s11153_s7 + $0x158] sm:$0xff]  ;;  %v6077_v59 = vmax.f32 %v6031_v34, 0.0 }
 0x7f7   : > { %v10798_v28 = vpop.f32.mrf.mxu1  ;;  %v5956_v8 = vadd.f32 %v5955_v46, %v10781_v37  ;;  %v6099_v47 = vmax.f32 %v5954_v62, 0.0 }
 0x7f8   : > { %v6078_v39 = vmax.f32 %v6033_v6, 0.0 }
 0x7f9   : > { %v10803_v33 = vpop.f32.mrf.mxu1  ;;  %v6100_v24 = vmax.f32 %v5956_v8, 0.0 }
 0x7fa   : > { %v6049_v0 = vadd.f32 %v10803_v33, %v10795_v5 }
 0x7fb   : > { %v6050_v44 = vpop.f32.mrf.mxu1  ;;  %6201 = vmatprep.subr.mxu0 %v6100_v24 }
 0x7fc   : > { %6202 = vmatpush1.msra.mxu0 %v6099_v47  ;;  %v6051_v8 = vadd.f32 %v6050_v44, %v10795_v5  ;;  %v7405_v5 = vld [vmem:[%s11153_s7 + $0x150] sm:$0xff]  ;;  %v6089_v33 = vmax.f32 %v6049_v0, 0.0 }
 0x7fd   : > { %v6054_v12 = vpop.f32.mrf.mxu1  ;;  %6203 = vmatprep.subr.mxu0 %v6096_v43  ;;  %v6085_v43 = vmax.f32 %v6043_v27, 0.0 }
 0x7fe   : > { %6204 = vmatpush1.msra.mxu0 %v6095_v48  ;;  %v6055_v46 = vadd.f32 %v6054_v12, %v10791_v17  ;;  %v6090_v44 = vmax.f32 %v6051_v8, 0.0  ;;  %v6082_v48 = vmax.f32 %v6039_v55, 0.0  ;;  %v7407_v12 = vld [vmem:[%s11153_s7 + $0x160] sm:$0xff] }
 0x7ff   : > { %v6056_v35 = vpop.f32.mrf.mxu1  ;;  %6205 = vmatprep.subr.mxu0 %v6092_v19 }
 0x800   : > { %6206 = vmatpush1.msra.mxu0 %v6091_v29  ;;  %v6057_v61 = vadd.f32 %v6056_v35, %v10791_v17  ;;  %v6045_v17 = vadd.f32 %v10798_v28, %v10806_v3  ;;  %v6093_v47 = vmax.f32 %v6055_v46, 0.0  ;;  %v6037_v28 = vadd.f32 %v10787_v50, %v10810_v11  ;;  %v7410_v29 = vld [vmem:[%s11153_s7 + $0x178] sm:$0xff] }
 0x801   : > { %v6060_v4 = vpop.f32.mrf.mxu1  ;;  %6207 = vmatprep.subr.mxu0 %v6088_v26  ;;  %v6025_v50 = vadd.f32 %v10775_v51, %v10820_v45  ;;  %v7408_v51 = vld [vmem:[%s11153_s7 + $0x168] sm:$0xff] }
 0x802   : > { %6208 = vmatpush1.msra.mxu0 %v6087_v31  ;;  %v6061_v53 = vadd.f32 %v6060_v4, %v10785_v10  ;;  %v6094_v24 = vmax.f32 %v6057_v61, 0.0  ;;  %v6086_v3 = vmax.f32 %v6045_v17, 0.0  ;;  %v6081_v11 = vmax.f32 %v6037_v28, 0.0 }
 0x803   : > { %v6062_v42 = vpop.f32.mrf.mxu1  ;;  %6209 = vmatprep.subr.mxu0 %v6084_v63  ;;  %v6073_v19 = vmax.f32 %v6025_v50, 0.0 }
 0x804   : > { %6210 = vmatpush1.msra.mxu0 %v6083_v7  ;;  %v6063_v9 = vadd.f32 %v6062_v42, %v10785_v10  ;;  %v7404_v10 = vld [vmem:[%s11153_s7 + $0x148] sm:$0xff]  ;;  %v6097_v60 = vmax.f32 %v6061_v53, 0.0  ;;  %v10921_v42 = vpop.permute.xlu1 %6158 }
 0x805   : > { %v6066_v32 = vpop.f32.mrf.mxu1  ;;  %6211 = vmatprep.subr.mxu0 %v6080_v56 }
 0x806   : > { %6212 = vmatpush1.msra.mxu0 %v6079_v54  ;;  %v6067_v30 = vadd.f32 %v6066_v32, %v10781_v37 }
 0x807   : > { %v6068_v38 = vpop.f32.mrf.mxu1  ;;  %6213 = vmatprep.subr.mxu0 %v6076_v21  ;;  %v10925_v21 = vpop.permute.xlu0 %6153 }
 0x808   : > { %v6069_v2 = vadd.f32 %v6068_v38, %v10781_v37  ;;  %6214 = vmatpush1.msra.mxu0 %v6075_v52  ;;  %v6101_v41 = vmax.f32 %v6067_v30, 0.0  ;;  %v6098_v37 = vmax.f32 %v6063_v9, 0.0  ;;  %v10931_v38 = vpop.permute.xlu1 %6148 }
 0x809   : > { %6215 = vmatprep.subr.mxu0 %v6072_v40 }
 0x80a   : > { %v6102_v62 = vmax.f32 %v6069_v2, 0.0  ;;  %6216 = vmatpush1.msra.mxu0 %v6071_v13 }
 0x80b   : > { %7419 = vmatmul.mubr.msk.f32.vlgmr.msra.gmra.mxu0 %vm4509_vm10, %v7403_v57  ;;  %v10935_v2 = vpop.permute.xlu0 %6143 }
 0x80c   : > { %6314 = vmatprep.subr.mxu1 %v6102_v62  ;;  %6255 = vmatprep.mubr.f32.mxu0 %v11341_v20  ;;  %v10946_v0 = vpop.permute.xlu1 %6138 }
 0x80d   : > { %6315 = vmatpush1.msra.mxu1 %v6101_v41 }
 0x80e   : > { %6316 = vmatprep.subr.mxu1 %v6098_v37 }
 0x80f   : > { %6317 = vmatpush1.msra.mxu1 %v6097_v60  ;;  %7420 = vmatmul.mubr.msk.f32.gmra.mxu0 %vm4509_vm10, %v7404_v10  ;;  %v10950_v55 = vpop.permute.xlu0 %6133 }
 0x810   : > { %6318 = vmatprep.subr.mxu1 %v6094_v24  ;;  %6261 = vmatprep.mubr.f32.mxu0 %v11341_v20 }
 0x811   : > { %6319 = vmatpush1.msra.mxu1 %v6093_v47 }
 0x812   : > { %6320 = vmatprep.subr.mxu1 %v6090_v44 }
 0x813   : > { %6321 = vmatpush1.msra.mxu1 %v6089_v33  ;;  %7421 = vmatmul.mubr.msk.f32.gmra.mxu0 %vm4509_vm10, %v7405_v5 }
 0x814   : > { %6322 = vmatprep.subr.mxu1 %v6086_v3  ;;  %6267 = vmatprep.mubr.f32.mxu0 %v11341_v20 }
 0x815   : > { %6323 = vmatpush1.msra.mxu1 %v6085_v43 }
 0x816   : > { %6324 = vmatprep.subr.mxu1 %v6082_v48 }
 0x817   : > { %6325 = vmatpush1.msra.mxu1 %v6081_v11  ;;  %7422 = vmatmul.mubr.msk.f32.gmra.mxu0 %vm4509_vm10, %v7406_v15 }
 0x818   : > { %6326 = vmatprep.subr.mxu1 %v6078_v39  ;;  %6273 = vmatprep.mubr.f32.mxu0 %v11341_v20 }
 0x819   : > { %6327 = vmatpush1.msra.mxu1 %v6077_v59 }
 0x81a   : > { %6328 = vmatprep.subr.mxu1 %v6074_v49 }
 0x81b   : > { %6329 = vmatpush1.msra.mxu1 %v6073_v19  ;;  %7423 = vmatmul.mubr.msk.f32.gmra.mxu0 %vm4509_vm10, %v7407_v12 }
 0x81c   : > { %7427 = vmatmul.mubr.msk.f32.vlgmr.msra.gmra.mxu1 %vm4509_vm10, %v7403_v57  ;;  %6279 = vmatprep.mubr.f32.mxu0 %v11341_v20 }
 0x81d   : > { %6368 = vmatprep.mubr.f32.mxu1 %v11341_v20 }
 0x81f   : > { %7424 = vmatmul.mubr.msk.f32.gmra.mxu0 %vm4509_vm10, %v7408_v51 }
 0x820   : > { %7428 = vmatmul.mubr.msk.f32.gmra.mxu1 %vm4509_vm10, %v7404_v10  ;;  %6285 = vmatprep.mubr.f32.mxu0 %v11341_v20 }
 0x821   : > { %6374 = vmatprep.mubr.f32.mxu1 %v11341_v20 }
 0x823   : > { %7425 = vmatmul.mubr.msk.f32.gmra.mxu0 %vm4509_vm10, %v7409_v23 }
 0x824   : > { %7429 = vmatmul.mubr.msk.f32.gmra.mxu1 %vm4509_vm10, %v7405_v5  ;;  %6291 = vmatprep.mubr.f32.mxu0 %v11341_v20 }
 0x825   : > { %6380 = vmatprep.mubr.f32.mxu1 %v11341_v20 }
 0x827   : > { %7426 = vmatmul.mubr.msk.f32.gmra.mxu0 %vm4509_vm10, %v7410_v29 }
 0x828   : > { %7430 = vmatmul.mubr.msk.f32.gmra.mxu1 %vm4509_vm10, %v7406_v15  ;;  %6589 = vmatprep.mubr.f32.mxu0 %v11341_v20  ;;  %v10956_v15 = vpop.permute.xlu1 %6128 }
 0x829   : > { %6386 = vmatprep.mubr.f32.mxu1 %v11341_v20 }
 0x82c   : > { %7431 = vmatmul.mubr.msk.f32.gmra.mxu1 %vm4509_vm10, %v7407_v12  ;;  %v10960_v12 = vpop.permute.xlu0 %6123 }
 0x82d   : > { %6392 = vmatprep.mubr.f32.mxu1 %v11341_v20 }
 0x830   : > { %7432 = vmatmul.mubr.msk.f32.gmra.mxu1 %vm4509_vm10, %v7408_v51 }
 0x831   : > { %6398 = vmatprep.mubr.f32.mxu1 %v11341_v20 }
 0x834   : > { %7433 = vmatmul.mubr.msk.f32.gmra.mxu1 %vm4509_vm10, %v7409_v23 }
 0x835   : > { %6404 = vmatprep.mubr.f32.mxu1 %v11341_v20 }
 0x838   : > { %7434 = vmatmul.mubr.msk.f32.gmra.mxu1 %vm4509_vm10, %v7410_v29 }
 0x839   : > { %6702 = vmatprep.mubr.f32.mxu1 %v11341_v20 }
 0x8cb   : > { %v10909_v36 = vpop.f32.mrf.mxu0 }
 0x8cd   : > { %v10911_v26 = vpop.f32.mrf.mxu0 }
 0x8ce   : > { %v6254_v23 = vadd.f32 %v10911_v26, %v10960_v12 }
 0x8cf   : > { %v10913_v35 = vpop.f32.mrf.mxu0 }
 0x8d0   : > { %v6258_v19 = vadd.f32 %v10913_v35, %v10956_v15 }
 0x8d1   : > { %v6259_v14 = vpop.f32.mrf.mxu0 }
 0x8d2   : > { %v6260_v39 = vadd.f32 %v6259_v14, %v10956_v15 }
 0x8d3   : > { %v6263_v22 = vpop.f32.mrf.mxu0 }
 0x8d4   : > { %v6264_v50 = vadd.f32 %v6263_v22, %v10950_v55  ;;  %v6252_v22 = vadd.f32 %v10909_v36, %v10960_v12  ;;  %v7435_v36 = vld [vmem:[%s11153_s7 + $0x180] sm:$0xff] }
 0x8d5   : > { %v6265_v31 = vpop.f32.mrf.mxu0 }
 0x8d6   : > { %v6266_v43 = vadd.f32 %v6265_v31, %v10950_v55  ;;  %v6419_v14 = vmax.f32 %v6264_v50, 0.0 }
 0x8d7   : > { %v6269_v25 = vpop.f32.mrf.mxu0 }
 0x8d8   : > { %v6270_v3 = vadd.f32 %v6269_v25, %v10946_v0  ;;  %v6420_v29 = vmax.f32 %v6266_v43, 0.0  ;;  %v6416_v25 = vmax.f32 %v6260_v39, 0.0 }
 0x8d9   : > { %v6271_v63 = vpop.f32.mrf.mxu0 }
 0x8da   : > { %v6272_v28 = vadd.f32 %v6271_v63, %v10946_v0  ;;  %v6423_v51 = vmax.f32 %v6270_v3, 0.0  ;;  %v7441_v3 = vld [vmem:[%s11153_s7 + $0x1b0] sm:$0xff] }
 0x8db   : > { %v6275_v4 = vpop.f32.mrf.mxu0 }
 0x8dc   : > { %v10915_v45 = vpop.f32.mrf.mxu1  ;;  %v6276_v44 = vadd.f32 %v6275_v4, %v10935_v2  ;;  %v6424_v59 = vmax.f32 %v6272_v28, 0.0  ;;  %v6415_v4 = vmax.f32 %v6258_v19, 0.0 }
 0x8dd   : > { %v6277_v1 = vpop.f32.mrf.mxu0 }
 0x8de   : > { %v10917_v7 = vpop.f32.mrf.mxu1  ;;  %v6278_v24 = vadd.f32 %v6277_v1, %v10935_v2  ;;  %v6427_v11 = vmax.f32 %v6276_v44, 0.0  ;;  %v6412_v1 = vmax.f32 %v6254_v23, 0.0 }
 0x8df   : > { %v6281_v16 = vpop.f32.mrf.mxu0  ;;  %v6367_v44 = vadd.f32 %v10917_v7, %v10960_v12 }
 0x8e0   : > { %v10919_v56 = vpop.f32.mrf.mxu1  ;;  %v6282_v60 = vadd.f32 %v6281_v16, %v10931_v38  ;;  %v6428_v18 = vmax.f32 %v6278_v24, 0.0 }
 0x8e1   : > { %v6283_v58 = vpop.f32.mrf.mxu0  ;;  %v6414_v7 = vmax.f32 %v6367_v44, 0.0 }
 0x8e2   : > { %v10923_v54 = vpop.f32.mrf.mxu1  ;;  %v6284_v37 = vadd.f32 %v6283_v58, %v10931_v38  ;;  %v6431_v34 = vmax.f32 %v6282_v60, 0.0  ;;  %v6411_v58 = vmax.f32 %v6252_v22, 0.0 }
 0x8e3   : > { %v6287_v32 = vpop.f32.mrf.mxu0 }
 0x8e4   : > { %v10927_v52 = vpop.f32.mrf.mxu1  ;;  %v6288_v41 = vadd.f32 %v6287_v32, %v10925_v21  ;;  %v6432_v6 = vmax.f32 %v6284_v37, 0.0 }
 0x8e5   : > { %v6289_v40 = vpop.f32.mrf.mxu0 }
 0x8e6   : > { %v10929_v30 = vpop.f32.mrf.mxu1  ;;  %v6290_v62 = vadd.f32 %v6289_v40, %v10925_v21  ;;  %v6435_v5 = vmax.f32 %v6288_v41, 0.0 }
 0x8e7   : > { %v6293_v13 = vpop.f32.mrf.mxu0  ;;  %v6379_v24 = vadd.f32 %v10929_v30, %v10950_v55  ;;  %v6371_v30 = vadd.f32 %v10919_v56, %v10956_v15 }
 0x8e8   : > { %v10933_v9 = vpop.f32.mrf.mxu1  ;;  %v6294_v57 = vadd.f32 %v6293_v13, %v10921_v42  ;;  %v6436_v47 = vmax.f32 %v6290_v62, 0.0 }
 0x8e9   : > { %v6295_v53 = vpop.f32.mrf.mxu0  ;;  %v6383_v60 = vadd.f32 %v10933_v9, %v10946_v0  ;;  %v6373_v9 = vadd.f32 %v10923_v54, %v10956_v15  ;;  %v7438_v54 = vld [vmem:[%s11153_s7 + $0x198] sm:$0xff]  ;;  %v6417_v28 = vmax.f32 %v6371_v30, 0.0 }
 0x8ea   : > { %v10938_v61 = vpop.f32.mrf.mxu1  ;;  %v6296_v46 = vadd.f32 %v6295_v53, %v10921_v42  ;;  %v6439_v17 = vmax.f32 %v6294_v57, 0.0 }
 0x8eb   : > { %v6418_v56 = vmax.f32 %v6373_v9, 0.0 }
 0x8ec   : > { %v10943_v8 = vpop.f32.mrf.mxu1  ;;  %v6440_v10 = vmax.f32 %v6296_v46, 0.0 }
 0x8ed   : > { %v6389_v41 = vadd.f32 %v10943_v8, %v10935_v2 }
 0x8ee   : > { %v6390_v27 = vpop.f32.mrf.mxu1  ;;  %6541 = vmatprep.subr.mxu0 %v6440_v10 }
 0x8ef   : > { %6542 = vmatpush1.msra.mxu0 %v6439_v17  ;;  %v6391_v46 = vadd.f32 %v6390_v27, %v10935_v2  ;;  %v7437_v2 = vld [vmem:[%s11153_s7 + $0x190] sm:$0xff]  ;;  %v6429_v8 = vmax.f32 %v6389_v41, 0.0 }
 0x8f0   : > { %v6394_v33 = vpop.f32.mrf.mxu1  ;;  %6543 = vmatprep.subr.mxu0 %v6436_v47  ;;  %v6425_v47 = vmax.f32 %v6383_v60, 0.0 }
 0x8f1   : > { %6544 = vmatpush1.msra.mxu0 %v6435_v5  ;;  %v6395_v53 = vadd.f32 %v6394_v33, %v10931_v38  ;;  %v6430_v27 = vmax.f32 %v6391_v46, 0.0  ;;  %v6422_v5 = vmax.f32 %v6379_v24, 0.0  ;;  %v7439_v33 = vld [vmem:[%s11153_s7 + $0x1a0] sm:$0xff] }
 0x8f2   : > { %v6396_v48 = vpop.f32.mrf.mxu1  ;;  %6545 = vmatprep.subr.mxu0 %v6432_v6 }
 0x8f3   : > { %6546 = vmatpush1.msra.mxu0 %v6431_v34  ;;  %v6397_v13 = vadd.f32 %v6396_v48, %v10931_v38  ;;  %v6385_v38 = vadd.f32 %v10938_v61, %v10946_v0  ;;  %v6433_v17 = vmax.f32 %v6395_v53, 0.0  ;;  %v6377_v61 = vadd.f32 %v10927_v52, %v10950_v55  ;;  %v7442_v34 = vld [vmem:[%s11153_s7 + $0x1b8] sm:$0xff] }
 0x8f4   : > { %v6400_v49 = vpop.f32.mrf.mxu1  ;;  %6547 = vmatprep.subr.mxu0 %v6428_v18  ;;  %v6365_v52 = vadd.f32 %v10915_v45, %v10960_v12  ;;  %v7440_v45 = vld [vmem:[%s11153_s7 + $0x1a8] sm:$0xff] }
 0x8f5   : > { %6548 = vmatpush1.msra.mxu0 %v6427_v11  ;;  %v6401_v40 = vadd.f32 %v6400_v49, %v10925_v21  ;;  %v6434_v10 = vmax.f32 %v6397_v13, 0.0  ;;  %v6426_v0 = vmax.f32 %v6385_v38, 0.0  ;;  %v6421_v55 = vmax.f32 %v6377_v61, 0.0 }
 0x8f6   : > { %v6402_v31 = vpop.f32.mrf.mxu1  ;;  %6549 = vmatprep.subr.mxu0 %v6424_v59  ;;  %v6413_v6 = vmax.f32 %v6365_v52, 0.0 }
 0x8f7   : > { %6550 = vmatpush1.msra.mxu0 %v6423_v51  ;;  %v6403_v26 = vadd.f32 %v6402_v31, %v10925_v21  ;;  %v7436_v21 = vld [vmem:[%s11153_s7 + $0x188] sm:$0xff]  ;;  %v6437_v37 = vmax.f32 %v6401_v40, 0.0 }
 0x8f8   : > { %v6406_v63 = vpop.f32.mrf.mxu1  ;;  %6551 = vmatprep.subr.mxu0 %v6420_v29 }
 0x8f9   : > { %6552 = vmatpush1.msra.mxu0 %v6419_v14  ;;  %v6407_v35 = vadd.f32 %v6406_v63, %v10921_v42  ;;  %v11065_v14 = vpop.permute.xlu0 %6493 }
 0x8fa   : > { %v6408_v16 = vpop.f32.mrf.mxu1  ;;  %6553 = vmatprep.subr.mxu0 %v6416_v25 }
 0x8fb   : > { %v6409_v32 = vadd.f32 %v6408_v16, %v10921_v42  ;;  %6554 = vmatpush1.msra.mxu0 %v6415_v4  ;;  %v6441_v62 = vmax.f32 %v6407_v35, 0.0  ;;  %v6438_v42 = vmax.f32 %v6403_v26, 0.0 }
 0x8fc   : > { %6555 = vmatprep.subr.mxu0 %v6412_v1 }
 0x8fd   : > { %v6442_v57 = vmax.f32 %v6409_v32, 0.0  ;;  %6556 = vmatpush1.msra.mxu0 %v6411_v58  ;;  %v11075_v26 = vpop.permute.xlu0 %6483 }
 0x8fe   : > { %7451 = vmatmul.mubr.msk.f32.vlgmr.msra.gmra.mxu0 %vm4509_vm10, %v7435_v36 }
 0x8ff   : > { %6654 = vmatprep.subr.mxu1 %v6442_v57  ;;  %6595 = vmatprep.mubr.f32.mxu0 %v11341_v20 }
 0x900   : > { %6655 = vmatpush1.msra.mxu1 %v6441_v62 }
 0x901   : > { %6656 = vmatprep.subr.mxu1 %v6438_v42 }
 0x902   : > { %6657 = vmatpush1.msra.mxu1 %v6437_v37  ;;  %7452 = vmatmul.mubr.msk.f32.gmra.mxu0 %vm4509_vm10, %v7436_v21 }
 0x903   : > { %6658 = vmatprep.subr.mxu1 %v6434_v10  ;;  %6601 = vmatprep.mubr.f32.mxu0 %v11341_v20 }
 0x904   : > { %6659 = vmatpush1.msra.mxu1 %v6433_v17  ;;  %v11090_v17 = vpop.permute.xlu0 %6473 }
 0x905   : > { %6660 = vmatprep.subr.mxu1 %v6430_v27 }
 0x906   : > { %6661 = vmatpush1.msra.mxu1 %v6429_v8  ;;  %7453 = vmatmul.mubr.msk.f32.gmra.mxu0 %vm4509_vm10, %v7437_v2 }
 0x907   : > { %6662 = vmatprep.subr.mxu1 %v6426_v0  ;;  %6607 = vmatprep.mubr.f32.mxu0 %v11341_v20 }
 0x908   : > { %6663 = vmatpush1.msra.mxu1 %v6425_v47 }
 0x909   : > { %6664 = vmatprep.subr.mxu1 %v6422_v5 }
 0x90a   : > { %6665 = vmatpush1.msra.mxu1 %v6421_v55  ;;  %7454 = vmatmul.mubr.msk.f32.gmra.mxu0 %vm4509_vm10, %v7438_v54 }
 0x90b   : > { %6666 = vmatprep.subr.mxu1 %v6418_v56  ;;  %6613 = vmatprep.mubr.f32.mxu0 %v11341_v20 }
 0x90c   : > { %6667 = vmatpush1.msra.mxu1 %v6417_v28 }
 0x90d   : > { %6668 = vmatprep.subr.mxu1 %v6414_v7  ;;  %v6464_v7 = vpop.permute.xlu0 %6463 }
 0x90e   : > { %6669 = vmatpush1.msra.mxu1 %v6413_v6  ;;  %7455 = vmatmul.mubr.msk.f32.gmra.mxu0 %vm4509_vm10, %v7439_v33 }
 0x90f   : > { %7459 = vmatmul.mubr.msk.f32.vlgmr.msra.gmra.mxu1 %vm4509_vm10, %v7435_v36  ;;  %6619 = vmatprep.mubr.f32.mxu0 %v11341_v20 }
 0x910   : > { %6708 = vmatprep.mubr.f32.mxu1 %v11341_v20 }
 0x912   : > { %7456 = vmatmul.mubr.msk.f32.gmra.mxu0 %vm4509_vm10, %v7440_v45 }
 0x913   : > { %7460 = vmatmul.mubr.msk.f32.gmra.mxu1 %vm4509_vm10, %v7436_v21  ;;  %6625 = vmatprep.mubr.f32.mxu0 %v11341_v20 }
 0x914   : > { %6714 = vmatprep.mubr.f32.mxu1 %v11341_v20 }
 0x916   : > { %7457 = vmatmul.mubr.msk.f32.gmra.mxu0 %vm4509_vm10, %v7441_v3 }
 0x917   : > { %7461 = vmatmul.mubr.msk.f32.gmra.mxu1 %vm4509_vm10, %v7437_v2  ;;  %6631 = vmatprep.mubr.f32.mxu0 %v11341_v20 }
 0x918   : > { %6720 = vmatprep.mubr.f32.mxu1 %v11341_v20 }
 0x91a   : > { %7458 = vmatmul.mubr.msk.f32.gmra.mxu0 %vm4509_vm10, %v7442_v34 }
 0x91b   : > { %7462 = vmatmul.mubr.msk.f32.gmra.mxu1 %vm4509_vm10, %v7438_v54  ;;  %6857 = vmatprep.mubr.f32.mxu0 %v11341_v20 }
 0x91c   : > { %6726 = vmatprep.mubr.f32.mxu1 %v11341_v20 }
 0x91f   : > { %7463 = vmatmul.mubr.msk.f32.gmra.mxu1 %vm4509_vm10, %v7439_v33 }
 0x920   : > { %6732 = vmatprep.mubr.f32.mxu1 %v11341_v20 }
 0x923   : > { %7464 = vmatmul.mubr.msk.f32.gmra.mxu1 %vm4509_vm10, %v7440_v45 }
 0x924   : > { %6738 = vmatprep.mubr.f32.mxu1 %v11341_v20 }
 0x927   : > { %7465 = vmatmul.mubr.msk.f32.gmra.mxu1 %vm4509_vm10, %v7441_v3 }
 0x928   : > { %6744 = vmatprep.mubr.f32.mxu1 %v11341_v20 }
 0x92b   : > { %7466 = vmatmul.mubr.msk.f32.gmra.mxu1 %vm4509_vm10, %v7442_v34 }
 0x92c   : > { %6928 = vmatprep.mubr.f32.mxu1 %v11341_v20  ;;  %v11061_v20 = vpop.permute.xlu1 %6498 }
 0x930   : > { %v11071_v35 = vpop.permute.xlu1 %6488 }
 0x934   : > { %v11086_v21 = vpop.permute.xlu1 %6478 }
 0x938   : > { %v6469_v5 = vpop.permute.xlu1 %6468 }
 0x9be   : > { %v11049_v43 = vpop.f32.mrf.mxu0 }
 0x9c0   : > { %v11051_v18 = vpop.f32.mrf.mxu0 }
 0x9c1   : > { %v6594_v45 = vadd.f32 %v11051_v18, %v6464_v7 }
 0x9c2   : > { %v11053_v48 = vpop.f32.mrf.mxu0 }
 0x9c3   : > { %v6598_v33 = vadd.f32 %v11053_v48, %v6469_v5 }
 0x9c4   : > { %v6599_v15 = vpop.f32.mrf.mxu0 }
 0x9c5   : > { %v6600_v55 = vadd.f32 %v6599_v15, %v6469_v5  ;;  %v6755_v15 = vmax.f32 %v6598_v33, 0.0 }
 0x9c6   : > { %v6603_v50 = vpop.f32.mrf.mxu0 }
 0x9c7   : > { %v6604_v54 = vadd.f32 %v6603_v50, %v11090_v17  ;;  %v6756_v50 = vmax.f32 %v6600_v55, 0.0 }
 0x9c8   : > { %v6605_v11 = vpop.f32.mrf.mxu0 }
 0x9c9   : > { %v6606_v30 = vadd.f32 %v6605_v11, %v11090_v17  ;;  %v6592_v11 = vadd.f32 %v11049_v43, %v6464_v7  ;;  %v6783_v43 = vld [vmem:[%s11155_s9] sm:$0xf] }
 0x9ca   : > { %v6609_v39 = vpop.f32.mrf.mxu0 }
 0x9cb   : > { %v6610_v9 = vadd.f32 %v6609_v39, %v11086_v21  ;;  %v6760_v3 = vmax.f32 %v6606_v30, 0.0  ;;  %v6759_v39 = vmax.f32 %v6604_v54, 0.0 }
 0x9cc   : > { %v6611_v59 = vpop.f32.mrf.mxu0 }
 0x9cd   : > { %v6612_v2 = vadd.f32 %v6611_v59, %v11086_v21  ;;  %v6763_v6 = vmax.f32 %v6610_v9, 0.0 }
 0x9ce   : > { %v6615_v49 = vpop.f32.mrf.mxu0 }
 0x9cf   : > { %v11055_v12 = vpop.f32.mrf.mxu1  ;;  %v6616_v24 = vadd.f32 %v6615_v49, %v11075_v26  ;;  %v6764_v56 = vmax.f32 %v6612_v2, 0.0  ;;  %v6752_v49 = vmax.f32 %v6594_v45, 0.0 }
 0x9d0   : > { %v6617_v19 = vpop.f32.mrf.mxu0 }
 0x9d1   : > { %v11057_v51 = vpop.f32.mrf.mxu1  ;;  %v6618_v38 = vadd.f32 %v6617_v19, %v11075_v26  ;;  %v6767_v52 = vmax.f32 %v6616_v24, 0.0 }
 0x9d2   : > { %v6621_v23 = vpop.f32.mrf.mxu0 }
 0x9d3   : > { %v11059_v29 = vpop.f32.mrf.mxu1  ;;  %v6622_v41 = vadd.f32 %v6621_v23, %v11071_v35  ;;  %v6768_v47 = vmax.f32 %v6618_v38, 0.0  ;;  %v6751_v23 = vmax.f32 %v6592_v11, 0.0 }
 0x9d4   : > { %v6623_v31 = vpop.f32.mrf.mxu0 }
 0x9d5   : > { %v11063_v22 = vpop.f32.mrf.mxu1  ;;  %v6624_v46 = vadd.f32 %v6623_v31, %v11071_v35  ;;  %v6771_v0 = vmax.f32 %v6622_v41, 0.0 }
 0x9d6   : > { %v6627_v25 = vpop.f32.mrf.mxu0  ;;  %v6713_v38 = vadd.f32 %v11063_v22, %v6469_v5 }
 0x9d7   : > { %v11067_v63 = vpop.f32.mrf.mxu1  ;;  %v6628_v53 = vadd.f32 %v6627_v25, %v11065_v14  ;;  %v6772_v8 = vmax.f32 %v6624_v46, 0.0 }
 0x9d8   : > { %v6629_v4 = vpop.f32.mrf.mxu0 }
 0x9d9   : > { %v11069_v1 = vpop.f32.mrf.mxu1  ;;  %v6630_v13 = vadd.f32 %v6629_v4, %v11065_v14  ;;  %v6775_v27 = vmax.f32 %v6628_v53, 0.0 }
 0x9da   : > { %v6633_v16 = vpop.f32.mrf.mxu0  ;;  %v6719_v41 = vadd.f32 %v11069_v1, %v11090_v17  ;;  %v6705_v1 = vadd.f32 %v11055_v12, %v6464_v7  ;;  %v6788_v12 = vpop.permute.xlu1 %6787 }
 0x9db   : > { %v11073_v58 = vpop.f32.mrf.mxu1  ;;  %v6634_v32 = vadd.f32 %v6633_v16, %v11061_v20  ;;  %v6776_v60 = vmax.f32 %v6630_v13, 0.0 }
 0x9dc   : > { %v6635_v36 = vpop.f32.mrf.mxu0 }
 0x9dd   : > { %v11078_v40 = vpop.f32.mrf.mxu1  ;;  %v6636_v57 = vadd.f32 %v6635_v36, %v11061_v20  ;;  %v6779_v37 = vmax.f32 %v6634_v32, 0.0 }
 0x9df   : > { %v11083_v62 = vpop.f32.mrf.mxu1  ;;  %v6780_v42 = vmax.f32 %v6636_v57, 0.0 }
 0x9e0   : > { %v6729_v57 = vadd.f32 %v11083_v62, %v11075_v26 }
 0x9e1   : > { %v6730_v10 = vpop.f32.mrf.mxu1  ;;  %6809 = vmatprep.subr.mxu0 %v6780_v42 }
 0x9e2   : > { %6810 = vmatpush1.msra.mxu0 %v6779_v37  ;;  %v6731_v13 = vadd.f32 %v6730_v10, %v11075_v26  ;;  %v6717_v26 = vadd.f32 %v11067_v63, %v11090_v17  ;;  %v6769_v62 = vmax.f32 %v6729_v57, 0.0  ;;  %v6711_v10 = vadd.f32 %v11059_v29, %v6469_v5  ;;  %v6936_v5 = vld [vmem:[%s404_s27 + $0x8] sm:$0xff] }
 0x9e3   : > { %v6734_v61 = vpop.f32.mrf.mxu1  ;;  %6811 = vmatprep.subr.mxu0 %v6776_v60  ;;  %v6758_v63 = vmax.f32 %v6713_v38, 0.0  ;;  %v6940_v55 = vcombine.high %v6936_v5, %v6936_v5 }
 0x9e4   : > { %6812 = vmatpush1.msra.mxu0 %v6775_v27  ;;  %v6735_v32 = vadd.f32 %v6734_v61, %v11071_v35  ;;  %v6770_v37 = vmax.f32 %v6731_v13, 0.0  ;;  %v6761_v24 = vmax.f32 %v6717_v26, 0.0  ;;  %v6757_v17 = vmax.f32 %v6711_v10, 0.0 }
 0x9e5   : > { %v6736_v44 = vpop.f32.mrf.mxu1  ;;  %6813 = vmatprep.subr.mxu0 %v6772_v8  ;;  %v6753_v27 = vmax.f32 %v6705_v1, 0.0 }
 0x9e6   : > { %6814 = vmatpush1.msra.mxu0 %v6771_v0  ;;  %v6737_v4 = vadd.f32 %v6736_v44, %v11071_v35  ;;  %v6723_v35 = vadd.f32 %v11073_v58, %v11086_v21  ;;  %v6773_v42 = vmax.f32 %v6735_v32, 0.0  ;;  %v6707_v58 = vadd.f32 %v11057_v51, %v6464_v7  ;;  %v6935_v51 = vld [vmem:[%s404_s27] sm:$0xff] }
 0x9e7   : > { %v6740_v28 = vpop.f32.mrf.mxu1  ;;  %6815 = vmatprep.subr.mxu0 %v6768_v47  ;;  %v6939_v61 = vcombine.high %v6935_v51, %v6935_v51 }
 0x9e8   : > { %6816 = vmatpush1.msra.mxu0 %v6767_v52  ;;  %v6741_v25 = vadd.f32 %v6740_v28, %v11065_v14  ;;  %v6774_v46 = vmax.f32 %v6737_v4, 0.0  ;;  %v6765_v60 = vmax.f32 %v6723_v35, 0.0  ;;  %v6754_v22 = vmax.f32 %v6707_v58, 0.0 }
 0x9e9   : > { %v6742_v34 = vpop.f32.mrf.mxu1  ;;  %6817 = vmatprep.subr.mxu0 %v6764_v56 }
 0x9ea   : > { %6818 = vmatpush1.msra.mxu0 %v6763_v6  ;;  %v6743_v18 = vadd.f32 %v6742_v34, %v11065_v14  ;;  %v6777_v53 = vmax.f32 %v6741_v25, 0.0  ;;  %v6725_v14 = vadd.f32 %v11078_v40, %v11086_v21  ;;  %v6762_v21 = vmax.f32 %v6719_v41, 0.0 }
 0x9eb   : > { %v6746_v59 = vpop.f32.mrf.mxu1  ;;  %6819 = vmatprep.subr.mxu0 %v6760_v3 }
 0x9ec   : > { %6820 = vmatpush1.msra.mxu0 %v6759_v39  ;;  %v6747_v19 = vadd.f32 %v6746_v59, %v11061_v20  ;;  %v6766_v40 = vmax.f32 %v6725_v14, 0.0  ;;  %v11411_v59 = vld [vmem:[#allocation2_spill] sm:$0xff] }
 0x9ed   : > { %v6748_v48 = vpop.f32.mrf.mxu1  ;;  %6821 = vmatprep.subr.mxu0 %v6756_v50  ;;  %vm6949_vm13 = vcmp.lt.s32.totalorder %v11411_v59, 3 }
 0x9ee   : > { %v6749_v31 = vadd.f32 %v6748_v48, %v11061_v20  ;;  %6822 = vmatpush1.msra.mxu0 %v6755_v15  ;;  %v6781_v36 = vmax.f32 %v6747_v19, 0.0  ;;  %v6778_v20 = vmax.f32 %v6743_v18, 0.0 }
 0x9ef   : > { %6823 = vmatprep.subr.mxu0 %v6752_v49 }
 0x9f0   : > { %v6782_v16 = vmax.f32 %v6749_v31, 0.0  ;;  %6824 = vmatpush1.msra.mxu0 %v6751_v23 }
 0x9f1   : > { %7467 = vmatmul.mubr.msk.f32.vlgmr.msra.gmra.mxu0 %vm4509_vm10, %v6783_v43 }
 0x9f2   : > { %6880 = vmatprep.subr.mxu1 %v6782_v16 }
 0x9f3   : > { %6881 = vmatpush1.msra.mxu1 %v6781_v36 }
 0x9f4   : > { %6882 = vmatprep.subr.mxu1 %v6778_v20 }
 0x9f5   : > { %6883 = vmatpush1.msra.mxu1 %v6777_v53 }
 0x9f6   : > { %6884 = vmatprep.subr.mxu1 %v6774_v46 }
 0x9f7   : > { %6885 = vmatpush1.msra.mxu1 %v6773_v42 }
 0x9f8   : > { %6886 = vmatprep.subr.mxu1 %v6770_v37 }
 0x9f9   : > { %6887 = vmatpush1.msra.mxu1 %v6769_v62 }
 0x9fa   : > { %6888 = vmatprep.subr.mxu1 %v6766_v40 }
 0x9fb   : > { %6889 = vmatpush1.msra.mxu1 %v6765_v60 }
 0x9fc   : > { %6890 = vmatprep.subr.mxu1 %v6762_v21 }
 0x9fd   : > { %6891 = vmatpush1.msra.mxu1 %v6761_v24 }
 0x9fe   : > { %6892 = vmatprep.subr.mxu1 %v6758_v63 }
 0x9ff   : > { %6893 = vmatpush1.msra.mxu1 %v6757_v17 }
 0xa00   : > { %6894 = vmatprep.subr.mxu1 %v6754_v22 }
 0xa01   : > { %6895 = vmatpush1.msra.mxu1 %v6753_v27 }
 0xa02   : > { %7468 = vmatmul.mubr.msk.f32.vlgmr.msra.gmra.mxu1 %vm4509_vm10, %v6783_v43 }
 0xab1   : > { %v6859_v29 = vpop.f32.mrf.mxu0 }
 0xab2   : > { %v6860_v2 = vadd.f32 %v6859_v29, %v6788_v12 }
 0xab3   : > { %v6861_v8 = vpop.f32.mrf.mxu0 }
 0xab4   : > { %v6943_v9 = vadd.f32 %v6935_v51, %v6860_v2  ;;  %v6862_v0 = vadd.f32 %v6861_v8, %v6788_v12 }
 0xab6   : > { %v7469_v30 = vmul.f32 -1.442695, %v6943_v9  ;;  %v6944_v47 = vadd.f32 %v6939_v61, %v6862_v0  ;;  %v6974_v49 = vmax.f32 %v6943_v9, 0.0 }
 0xab8   : > { %7593 = vpow2.f32 %v7469_v30  ;;  %v7470_v44 = vmul.f32 -1.442695, %v6944_v47  ;;  %v6975_v19 = vmax.f32 %v6944_v47, 0.0 }
 0xaba   : > { %7595 = vpow2.f32 %v7470_v44 }
 0xac2   : > { %v6930_v54 = vpop.f32.mrf.mxu1 }
 0xac3   : > { %v6931_v52 = vadd.f32 %v6930_v54, %v6788_v12 }
 0xac4   : > { %v6932_v56 = vpop.f32.mrf.mxu1 }
 0xac5   : > { %v7594_v28 = vpop.eup %7593  ;;  %v6945_v7 = vadd.f32 %v6936_v5, %v6931_v52  ;;  %v6933_v33 = vadd.f32 %v6932_v56, %v6788_v12 }
 0xac6   : > { %v6962_v6 = vadd.f32 1.0, %v7594_v28 }
 0xac7   : > { %v7596_v45 = vpop.eup %7595  ;;  %v7471_v3 = vmul.f32 -1.442695, %v6945_v7  ;;  %v6946_v34 = vadd.f32 %v6940_v55, %v6933_v33  ;;  %v6976_v32 = vmax.f32 %v6945_v7, 0.0 }
 0xac8   : > { %7597 = vrcp.f32 %v6962_v6  ;;  %v6963_v11 = vadd.f32 1.0, %v7596_v45 }
 0xac9   : > { %7599 = vpow2.f32 %v7471_v3  ;;  %v7472_v39 = vmul.f32 -1.442695, %v6946_v34  ;;  %v6977_v36 = vmax.f32 %v6946_v34, 0.0 }
 0xaca   : > { %7601 = vrcp.f32 %v6963_v11 }
 0xacb   : > { %7603 = vpow2.f32 %v7472_v39 }
 0xad5   : > { %v7598_v50 = vpop.eup %7597 }
 0xad6   : > { %v7600_v15 = vpop.eup %7599  ;;  %v6978_v31 = vsel %vm6949_vm13, %v7598_v50, %v6974_v49 }
 0xad7   : > { %v7602_v48 = vpop.eup %7601  ;;  %v6964_v23 = vadd.f32 1.0, %v7600_v15 }
 0xad8   : > { %v7604_v18 = vpop.eup %7603  ;;  %v6979_v43 = vsel %vm6949_vm13, %v7602_v48, %v6975_v19 }
 0xad9   : > { %7605 = vrcp.f32 %v6964_v23  ;;  %v6986_v25 = vcombine.low %v6978_v31, %v6979_v43  ;;  %v6965_v4 = vadd.f32 1.0, %v7604_v18 }
 0xadb   : > { %6990 = vst [vmem:[%s410_s12] sm:$0xff] %v6986_v25  ;;  %7607 = vrcp.f32 %v6965_v4 }
 0xae6   : > { %v7606_v16 = vpop.eup %7605 }
 0xae7   : > { %v6980_v20 = vsel %vm6949_vm13, %v7606_v16, %v6976_v32 }
 0xae8   : > { %v7608_v13 = vpop.eup %7607 }
 0xae9   : > { %v6981_v57 = vsel %vm6949_vm13, %v7608_v13, %v6977_v36 }
 0xaea   : > { %v6987_v53 = vcombine.low %v6980_v20, %v6981_v57 }
 0xaec   : > { %6991 = vst [vmem:[%s410_s12 + $0x8] sm:$0xff] %v6987_v53 }
 0xaed PF: > { %s21_s17 = sadd.s32 1, %s7619_s17  }
 0xaee   : > { %p18_p4 = scmp.ge.s32.totalorder %s21_s17, 4  }
 0xaf0   :  { %20 = sbr.rel (!%p18_p4) target bundleno = 1 (0x1), region = 108 }

</bundles_post_ra>
